<compile_context>
chip_gen: v6e
topology: v6e:2x2x1
jax: 0.10.0
libtpu: 0.0.40
codegen_flags: <defaults>
</compile_context>

<pallas_src>
import math

import jax
import jax.numpy as jnp
from jax.experimental import pallas as pl
from jax.experimental.pallas import tpu as pltpu


def _round_up(x, m):
    return ((x + m - 1) // m) * m


def ged_kernel(e1_ref, e2t_ref, wstack_ref,
               w1_ref, b1_ref, w2_ref, b2_ref, w3_ref, b3_ref,
               out_ref, u_ref):
    """One grid step emits one (TM, TN) output tile.

    Grid = (j: column tiles, outer, "parallel"; i: row tiles, inner, "arbitrary").

    e1_ref    : (TM, d)    row block of embedding_1        (matmul dtype)
    e2t_ref   : (d, TN)    column block of embedding_2^T   (matmul dtype)
    wstack_ref: (k*d, d)   W.reshape(k*d, d), resident     (matmul dtype)
    w1_ref    : (2k, k)  SMEM   b1_ref: (2k,) SMEM
    w2_ref    : (k, 2k)  SMEM   b2_ref: (k,)  SMEM
    w3_ref    : (k,)     SMEM   b3_ref: (1,)  SMEM
    out_ref   : (TM, TN)
    u_ref     : (k*d, TN)  VMEM scratch; carried across the inner i axis
    """
    tm, d = e1_ref.shape
    tn = e2t_ref.shape[1]
    k = w2_ref.shape[0]
    two_k = w1_ref.shape[0]

    # ---- first bilinear stage (MXU), once per column tile j ---------------
    # U[c*d + e, j] = (W[c] @ e2[j, :]^T)[e]; depends only on j, so compute it
    # when the inner ("arbitrary") row axis is at 0 and reuse across row tiles.
    @pl.when(pl.program_id(1) == 0)
    def _():
        u = jnp.dot(wstack_ref[...], e2t_ref[...],
                    preferred_element_type=jnp.float32)
        u_ref[...] = u.astype(u_ref.dtype)

    # Hoist every SMEM scalar read out of the unrolled chunk loops.
    w1 = [[w1_ref[m, c] for c in range(k)] for m in range(two_k)]
    b1 = [b1_ref[m] for m in range(two_k)]
    w2 = [[w2_ref[p, m] for m in range(two_k)] for p in range(k)]
    b2 = [b2_ref[p] for p in range(k)]
    w3 = [w3_ref[p] for p in range(k)]
    b3 = b3_ref[0]

    # ---- second stage + MLP epilogue, micro-tiled for vreg residency ------
    # (rm, cn) f32 micro-tiles are 1-2 vregs each, so the k s-channels, the k
    # h2 accumulators and h1 (~18 arrays) all stay in registers — no spills.
    rm = 16 if tm % 16 == 0 else 8
    cn = 128

    for cs in range(0, tn, cn):
        for rs in range(0, tm, rm):
            e1_blk = e1_ref[rs:rs + rm, :]                         # (rm, d)
            # S_c[i, j] = e1[i, :] @ U_c[:, j]; channel slices of U are
            # sublane-aligned (c*d is a multiple of the sublane tile).
            s = [jnp.dot(e1_blk, u_ref[c * d:(c + 1) * d, cs:cs + cn],
                         preferred_element_type=jnp.float32)
                 for c in range(k)]                                # k x (rm, cn) f32

            # MLP (k -> 2k -> k -> 1) as scalar-broadcast FMAs on the VPU.
            h2 = [None] * k
            for m in range(two_k):
                h1 = s[0] * w1[m][0]
                for c in range(1, k):
                    h1 = h1 + s[c] * w1[m][c]
                h1 = jnp.maximum(h1 + b1[m], 0.0)                  # ReLU layer 1
                if m == 0:
                    for p in range(k):
                        h2[p] = h1 * w2[p][0]
                else:
                    for p in range(k):
                        h2[p] = h2[p] + h1 * w2[p][m]
            out = jnp.maximum(h2[0] + b2[0], 0.0) * w3[0] + b3     # ReLU layer 2 + layer 3
            for p in range(1, k):
                out = out + jnp.maximum(h2[p] + b2[p], 0.0) * w3[p]

            out_ref[rs:rs + rm, cs:cs + cn] = out.astype(out_ref.dtype)


def _pick_row_tile(n1, block_m):
    cands = [c for c in (128, 64, 32, 16, 8) if c <= max(block_m, 8)]
    # Largest tile whose padding waste is modest; else minimize padding.
    for c in cands:
        if _round_up(n1, c) - n1 <= max(n1 // 4, 8):
            return c
    return min(cands, key=lambda c: (_round_up(n1, c), -c))


def _pick_col_tile(n2, block_n):
    n2p = _round_up(n2, 128)
    cands = [c for c in (512, 384, 256, 128) if c <= max(block_n, 128)]
    best = None
    for c in cands:                      # iterate large -> small; keep min padding
        padded = _round_up(n2p, c)
        if best is None or padded < best[0]:
            best = (padded, c)
    return best[1]


def ged_matrix_forward(e1, e2, W, w1, b1, w2, b2, w3, b3, *,
                       matmul_dtype=jnp.bfloat16, out_dtype=jnp.float32,
                       block_m=128, block_n=512):
    """Pallas forward.  e1: (n1, d), e2: (n2, d)  ->  (n1, n2) out_dtype."""
    n1, d = e1.shape
    n2, d2 = e2.shape
    k = W.shape[0]
    assert d == d2 and W.shape == (k, d, d)

    # --- glue: tiling choice / padding / dtype casts only (no compute) -----
    tm = _pick_row_tile(n1, block_m)                 # sublane-dense rows
    tn = _pick_col_tile(n2, block_n)                 # lane-dense columns
    n1p = _round_up(n1, tm)
    n2p = _round_up(_round_up(n2, 128), tn)

    e1_p = jnp.zeros((n1p, d), matmul_dtype).at[:n1, :].set(
        e1.astype(matmul_dtype))
    e2t_p = jnp.zeros((d, n2p), matmul_dtype).at[:, :n2].set(
        e2.T.astype(matmul_dtype))
    w_stack = W.reshape(k * d, d).astype(matmul_dtype)   # fused bilinear W

    # MLP parameters live in SMEM (scalar reads inside the kernel); f32.
    w1s = w1.astype(jnp.float32)                         # (2k, k)
    b1s = b1.reshape(2 * k).astype(jnp.float32)
    w2s = w2.astype(jnp.float32)                         # (k, 2k)
    b2s = b2.reshape(k).astype(jnp.float32)
    w3s = w3.reshape(k).astype(jnp.float32)
    b3s = b3.reshape(1).astype(jnp.float32)

    grid = (n2p // tn, n1p // tm)          # (j outer/parallel, i inner/arbitrary)
    smem = pl.BlockSpec(memory_space=pltpu.MemorySpace.SMEM)

    # Rough VMEM footprint (now tiny — the epilogue no longer materializes
    # full-tile intermediates).  Only raise the scoped limit if ever needed,
    # and cap it to the device's physical VMEM (v7x has only 64 MiB).
    itm = jnp.dtype(matmul_dtype).itemsize
    est = (2 * (tm * d + d * tn + k * d * d) * itm          # double-buffered inputs
           + 2 * tm * tn * jnp.dtype(out_dtype).itemsize    # output double-buffer
           + k * d * tn * itm)                              # carried U scratch
    cp = dict(dimension_semantics=("parallel", "arbitrary"))
    if est > 24 * (1 << 20):
        try:
            cap = int(pltpu.get_tpu_info().vmem_capacity_bytes)
        except Exception:
            cap = 64 << 20
        cp["vmem_limit_bytes"] = int(min(est + (8 << 20), cap - (4 << 20)))

    out = pl.pallas_call(
        ged_kernel,
        out_shape=jax.ShapeDtypeStruct((n1p, n2p), out_dtype),
        grid_spec=pltpu.PrefetchScalarGridSpec(
            num_scalar_prefetch=0,
            grid=grid,
            in_specs=[
                pl.BlockSpec((tm, d), lambda j, i: (i, 0)),       # e1 row block
                pl.BlockSpec((d, tn), lambda j, i: (0, j)),       # e2^T col block
                pl.BlockSpec((k * d, d), lambda j, i: (0, 0)),    # W_stack (resident)
                smem, smem, smem, smem, smem, smem,               # MLP params
            ],
            out_specs=pl.BlockSpec((tm, tn), lambda j, i: (i, j)),
            scratch_shapes=[pltpu.VMEM((k * d, tn), matmul_dtype)],  # carried U
        ),
        compiler_params=pltpu.CompilerParams(**cp),
    )(e1_p, e2t_p, w_stack, w1s, b1s, w2s, b2s, w3s, b3s)

    return out[:n1, :n2]


def ged_matrix_ref(e1, e2, W, w1, b1, w2, b2, w3, b3):
    """Pure-JAX f32 reference matching the PyTorch forward exactly."""
    n1, n2, k = e1.shape[0], e2.shape[0], W.shape[0]
    hp = jax.lax.Precision.HIGHEST
    m = jnp.einsum('id,cde->cie', e1, W, precision=hp)      # (k, n1, d)
    s = jnp.einsum('cie,je->cij', m, e2, precision=hp)      # (k, n1, n2)
    feat = s.reshape(k, -1).T                               # (n1*n2, k)
    h1 = jax.nn.relu(jnp.matmul(feat, w1.T, precision=hp) + b1)
    h2 = jax.nn.relu(jnp.matmul(h1, w2.T, precision=hp) + b2)
    o = jnp.matmul(h2, w3.T, precision=hp) + b3
    return o.reshape(n1, n2)


def _init_linear(key, out_f, in_f):
    kw, kb = jax.random.split(key)
    bound = 1.0 / math.sqrt(in_f)
    w = jax.random.uniform(kw, (out_f, in_f), jnp.float32, -bound, bound)
    b = jax.random.uniform(kb, (out_f,), jnp.float32, -bound, bound)
    return w, b


if __name__ == "__main__":
    n1, n2, d, k = 16, 16, 32, 8

    key = jax.random.PRNGKey(0)
    k_e1, k_e2, k_wm, k_l1, k_l2, k_l3 = jax.random.split(key, 6)

    # Inputs
    e1 = jax.random.normal(k_e1, (n1, d), jnp.float32)
    e2 = jax.random.normal(k_e2, (n2, d), jnp.float32)

    # Parameters (synthetic init mirroring the module's shapes).
    xavier_bound = math.sqrt(6.0 / (d + d))
    W = jax.random.uniform(k_wm, (k, d, d), jnp.float32,
                           -xavier_bound, xavier_bound)
    w1, b1 = _init_linear(k_l1, 2 * k, k)
    w2, b2 = _init_linear(k_l2, k, 2 * k)
    w3, b3 = _init_linear(k_l3, 1, k)

    ref = ged_matrix_ref(e1, e2, W, w1, b1, w2, b2, w3, b3)

    # Exact-semantics check: f32 MXU inputs (recommended path on v5e).
    out_f32 = jax.block_until_ready(
        ged_matrix_forward(e1, e2, W, w1, b1, w2, b2, w3, b3,
                           matmul_dtype=jnp.float32))
    assert out_f32.shape == (n1, n2), out_f32.shape
    if not jnp.allclose(out_f32, ref, atol=1e-2, rtol=1e-2):
        raise AssertionError(
            f"f32 mismatch, max abs err = {jnp.max(jnp.abs(out_f32 - ref))}")

    # Fast path: bf16 MXU inputs with f32 accumulation (v6e/v7x).
    # Note: U is accumulated in f32 then recast to bf16 (slight double-rounding).
    out_bf16 = jax.block_until_ready(
        ged_matrix_forward(e1, e2, W, w1, b1, w2, b2, w3, b3,
                           matmul_dtype=jnp.bfloat16))
    if not jnp.allclose(out_bf16, ref, atol=1e-1, rtol=5e-2):
        raise AssertionError(
            f"bf16 mismatch, max abs err = {jnp.max(jnp.abs(out_bf16 - ref))}")

    print("KERNEL_OK")
</pallas_src>

<mosaic_0001>
module attributes {stable_mosaic.version = 11 : i64} {
  func.func @ged_kernel(%arg0: i32, %arg1: i32, %arg2: memref<16x32xf32, #tpu.memory_space<vmem>>, %arg3: memref<32x128xf32, #tpu.memory_space<vmem>>, %arg4: memref<256x32xf32, #tpu.memory_space<vmem>>, %arg5: memref<16x8xf32, #tpu.memory_space<smem>>, %arg6: memref<16xf32, #tpu.memory_space<smem>>, %arg7: memref<8x16xf32, #tpu.memory_space<smem>>, %arg8: memref<8xf32, #tpu.memory_space<smem>>, %arg9: memref<8xf32, #tpu.memory_space<smem>>, %arg10: memref<1xf32, #tpu.memory_space<smem>>, %arg11: memref<16x128xf32, #tpu.memory_space<vmem>>, %arg12: memref<256x128xf32, #tpu.memory_space<vmem>>) attributes {dimension_semantics = [#tpu.dimension_semantics<parallel>, #tpu.dimension_semantics<arbitrary>], iteration_bounds = array<i64: 1, 1>, scalar_prefetch = 0 : i64, scratch_operands = 1 : i64, tpu.core_type = #tpu.core_type<tc>, window_params = [{transform_indices = @transform_0, window_bounds = array<i64: 16, 32>}, {transform_indices = @transform_1, window_bounds = array<i64: 32, 128>}, {pipeline_mode = #tpu.pipeline_mode<synchronous>, transform_indices = @transform_2, window_bounds = array<i64: 256, 32>}, {transform_indices = @transform_3, window_bounds = array<i64: 16, 8>}, {transform_indices = @transform_4, window_bounds = array<i64: 16>}, {transform_indices = @transform_5, window_bounds = array<i64: 8, 16>}, {transform_indices = @transform_6, window_bounds = array<i64: 8>}, {transform_indices = @transform_7, window_bounds = array<i64: 8>}, {transform_indices = @transform_8, window_bounds = array<i64: 1>}, {transform_indices = @transform_9, window_bounds = array<i64: 16, 128>}]} {
    %c0_i32 = arith.constant 0 : i32
    %0 = arith.cmpi eq, %arg1, %c0_i32 : i32
    %1 = arith.extui %0 : i1 to i32
    %c0_i32_0 = arith.constant 0 : i32
    %2 = arith.cmpi ne, %1, %c0_i32_0 : i32
    scf.if %2 {
      %c0_574 = arith.constant 0 : index
      %c0_575 = arith.constant 0 : index
      %1175 = vector.load %arg4[%c0_574, %c0_575] : memref<256x32xf32, #tpu.memory_space<vmem>>, vector<256x32xf32>
      %c0_576 = arith.constant 0 : index
      %c0_577 = arith.constant 0 : index
      %1176 = vector.load %arg3[%c0_576, %c0_577] : memref<32x128xf32, #tpu.memory_space<vmem>>, vector<32x128xf32>
      %cst_578 = arith.constant dense<0.000000e+00> : vector<256x128xf32>
      %1177 = tpu.matmul %1175, %1176, %cst_578 {dimension_numbers = #tpu.dot_dimension_numbers<[1], [0], [0], [1], [0, 0, 1, 1], [], []>} : vector<256x32xf32>, vector<32x128xf32>, vector<256x128xf32> -> vector<256x128xf32>
      %c0_579 = arith.constant 0 : index
      %c0_580 = arith.constant 0 : index
      %1178 = vector.load %arg12[%c0_579, %c0_580] : memref<256x128xf32, #tpu.memory_space<vmem>>, vector<256x128xf32>
      tpu.vector_store %arg12[%c0_579, %c0_580], %1177 {strides = array<i32>} : memref<256x128xf32, #tpu.memory_space<vmem>>, vector<256x128xf32>,
    } else {
    }
    %c0 = arith.constant 0 : index
    %c0_1 = arith.constant 0 : index
    %3 = memref.load %arg5[%c0, %c0_1] : memref<16x8xf32, #tpu.memory_space<smem>>
    %c0_2 = arith.constant 0 : index
    %c1 = arith.constant 1 : index
    %4 = memref.load %arg5[%c0_2, %c1] : memref<16x8xf32, #tpu.memory_space<smem>>
    %c0_3 = arith.constant 0 : index
    %c2 = arith.constant 2 : index
    %5 = memref.load %arg5[%c0_3, %c2] : memref<16x8xf32, #tpu.memory_space<smem>>
    %c0_4 = arith.constant 0 : index
    %c3 = arith.constant 3 : index
    %6 = memref.load %arg5[%c0_4, %c3] : memref<16x8xf32, #tpu.memory_space<smem>>
    %c0_5 = arith.constant 0 : index
    %c4 = arith.constant 4 : index
    %7 = memref.load %arg5[%c0_5, %c4] : memref<16x8xf32, #tpu.memory_space<smem>>
    %c0_6 = arith.constant 0 : index
    %c5 = arith.constant 5 : index
    %8 = memref.load %arg5[%c0_6, %c5] : memref<16x8xf32, #tpu.memory_space<smem>>
    %c0_7 = arith.constant 0 : index
    %c6 = arith.constant 6 : index
    %9 = memref.load %arg5[%c0_7, %c6] : memref<16x8xf32, #tpu.memory_space<smem>>
    %c0_8 = arith.constant 0 : index
    %c7 = arith.constant 7 : index
    %10 = memref.load %arg5[%c0_8, %c7] : memref<16x8xf32, #tpu.memory_space<smem>>
    %c1_9 = arith.constant 1 : index
    %c0_10 = arith.constant 0 : index
    %11 = memref.load %arg5[%c1_9, %c0_10] : memref<16x8xf32, #tpu.memory_space<smem>>
    %c1_11 = arith.constant 1 : index
    %c1_12 = arith.constant 1 : index
    %12 = memref.load %arg5[%c1_11, %c1_12] : memref<16x8xf32, #tpu.memory_space<smem>>
    %c1_13 = arith.constant 1 : index
    %c2_14 = arith.constant 2 : index
    %13 = memref.load %arg5[%c1_13, %c2_14] : memref<16x8xf32, #tpu.memory_space<smem>>
    %c1_15 = arith.constant 1 : index
    %c3_16 = arith.constant 3 : index
    %14 = memref.load %arg5[%c1_15, %c3_16] : memref<16x8xf32, #tpu.memory_space<smem>>
    %c1_17 = arith.constant 1 : index
    %c4_18 = arith.constant 4 : index
    %15 = memref.load %arg5[%c1_17, %c4_18] : memref<16x8xf32, #tpu.memory_space<smem>>
    %c1_19 = arith.constant 1 : index
    %c5_20 = arith.constant 5 : index
    %16 = memref.load %arg5[%c1_19, %c5_20] : memref<16x8xf32, #tpu.memory_space<smem>>
    %c1_21 = arith.constant 1 : index
    %c6_22 = arith.constant 6 : index
    %17 = memref.load %arg5[%c1_21, %c6_22] : memref<16x8xf32, #tpu.memory_space<smem>>
    %c1_23 = arith.constant 1 : index
    %c7_24 = arith.constant 7 : index
    %18 = memref.load %arg5[%c1_23, %c7_24] : memref<16x8xf32, #tpu.memory_space<smem>>
    %c2_25 = arith.constant 2 : index
    %c0_26 = arith.constant 0 : index
    %19 = memref.load %arg5[%c2_25, %c0_26] : memref<16x8xf32, #tpu.memory_space<smem>>
    %c2_27 = arith.constant 2 : index
    %c1_28 = arith.constant 1 : index
    %20 = memref.load %arg5[%c2_27, %c1_28] : memref<16x8xf32, #tpu.memory_space<smem>>
    %c2_29 = arith.constant 2 : index
    %c2_30 = arith.constant 2 : index
    %21 = memref.load %arg5[%c2_29, %c2_30] : memref<16x8xf32, #tpu.memory_space<smem>>
    %c2_31 = arith.constant 2 : index
    %c3_32 = arith.constant 3 : index
    %22 = memref.load %arg5[%c2_31, %c3_32] : memref<16x8xf32, #tpu.memory_space<smem>>
    %c2_33 = arith.constant 2 : index
    %c4_34 = arith.constant 4 : index
    %23 = memref.load %arg5[%c2_33, %c4_34] : memref<16x8xf32, #tpu.memory_space<smem>>
    %c2_35 = arith.constant 2 : index
    %c5_36 = arith.constant 5 : index
    %24 = memref.load %arg5[%c2_35, %c5_36] : memref<16x8xf32, #tpu.memory_space<smem>>
    %c2_37 = arith.constant 2 : index
    %c6_38 = arith.constant 6 : index
    %25 = memref.load %arg5[%c2_37, %c6_38] : memref<16x8xf32, #tpu.memory_space<smem>>
    %c2_39 = arith.constant 2 : index
    %c7_40 = arith.constant 7 : index
    %26 = memref.load %arg5[%c2_39, %c7_40] : memref<16x8xf32, #tpu.memory_space<smem>>
    %c3_41 = arith.constant 3 : index
    %c0_42 = arith.constant 0 : index
    %27 = memref.load %arg5[%c3_41, %c0_42] : memref<16x8xf32, #tpu.memory_space<smem>>
    %c3_43 = arith.constant 3 : index
    %c1_44 = arith.constant 1 : index
    %28 = memref.load %arg5[%c3_43, %c1_44] : memref<16x8xf32, #tpu.memory_space<smem>>
    %c3_45 = arith.constant 3 : index
    %c2_46 = arith.constant 2 : index
    %29 = memref.load %arg5[%c3_45, %c2_46] : memref<16x8xf32, #tpu.memory_space<smem>>
    %c3_47 = arith.constant 3 : index
    %c3_48 = arith.constant 3 : index
    %30 = memref.load %arg5[%c3_47, %c3_48] : memref<16x8xf32, #tpu.memory_space<smem>>
    %c3_49 = arith.constant 3 : index
    %c4_50 = arith.constant 4 : index
    %31 = memref.load %arg5[%c3_49, %c4_50] : memref<16x8xf32, #tpu.memory_space<smem>>
    %c3_51 = arith.constant 3 : index
    %c5_52 = arith.constant 5 : index
    %32 = memref.load %arg5[%c3_51, %c5_52] : memref<16x8xf32, #tpu.memory_space<smem>>
    %c3_53 = arith.constant 3 : index
    %c6_54 = arith.constant 6 : index
    %33 = memref.load %arg5[%c3_53, %c6_54] : memref<16x8xf32, #tpu.memory_space<smem>>
    %c3_55 = arith.constant 3 : index
    %c7_56 = arith.constant 7 : index
    %34 = memref.load %arg5[%c3_55, %c7_56] : memref<16x8xf32, #tpu.memory_space<smem>>
    %c4_57 = arith.constant 4 : index
    %c0_58 = arith.constant 0 : index
    %35 = memref.load %arg5[%c4_57, %c0_58] : memref<16x8xf32, #tpu.memory_space<smem>>
    %c4_59 = arith.constant 4 : index
    %c1_60 = arith.constant 1 : index
    %36 = memref.load %arg5[%c4_59, %c1_60] : memref<16x8xf32, #tpu.memory_space<smem>>
    %c4_61 = arith.constant 4 : index
    %c2_62 = arith.constant 2 : index
    %37 = memref.load %arg5[%c4_61, %c2_62] : memref<16x8xf32, #tpu.memory_space<smem>>
    %c4_63 = arith.constant 4 : index
    %c3_64 = arith.constant 3 : index
    %38 = memref.load %arg5[%c4_63, %c3_64] : memref<16x8xf32, #tpu.memory_space<smem>>
    %c4_65 = arith.constant 4 : index
    %c4_66 = arith.constant 4 : index
    %39 = memref.load %arg5[%c4_65, %c4_66] : memref<16x8xf32, #tpu.memory_space<smem>>
    %c4_67 = arith.constant 4 : index
    %c5_68 = arith.constant 5 : index
    %40 = memref.load %arg5[%c4_67, %c5_68] : memref<16x8xf32, #tpu.memory_space<smem>>
    %c4_69 = arith.constant 4 : index
    %c6_70 = arith.constant 6 : index
    %41 = memref.load %arg5[%c4_69, %c6_70] : memref<16x8xf32, #tpu.memory_space<smem>>
    %c4_71 = arith.constant 4 : index
    %c7_72 = arith.constant 7 : index
    %42 = memref.load %arg5[%c4_71, %c7_72] : memref<16x8xf32, #tpu.memory_space<smem>>
    %c5_73 = arith.constant 5 : index
    %c0_74 = arith.constant 0 : index
    %43 = memref.load %arg5[%c5_73, %c0_74] : memref<16x8xf32, #tpu.memory_space<smem>>
    %c5_75 = arith.constant 5 : index
    %c1_76 = arith.constant 1 : index
    %44 = memref.load %arg5[%c5_75, %c1_76] : memref<16x8xf32, #tpu.memory_space<smem>>
    %c5_77 = arith.constant 5 : index
    %c2_78 = arith.constant 2 : index
    %45 = memref.load %arg5[%c5_77, %c2_78] : memref<16x8xf32, #tpu.memory_space<smem>>
    %c5_79 = arith.constant 5 : index
    %c3_80 = arith.constant 3 : index
    %46 = memref.load %arg5[%c5_79, %c3_80] : memref<16x8xf32, #tpu.memory_space<smem>>
    %c5_81 = arith.constant 5 : index
    %c4_82 = arith.constant 4 : index
    %47 = memref.load %arg5[%c5_81, %c4_82] : memref<16x8xf32, #tpu.memory_space<smem>>
    %c5_83 = arith.constant 5 : index
    %c5_84 = arith.constant 5 : index
    %48 = memref.load %arg5[%c5_83, %c5_84] : memref<16x8xf32, #tpu.memory_space<smem>>
    %c5_85 = arith.constant 5 : index
    %c6_86 = arith.constant 6 : index
    %49 = memref.load %arg5[%c5_85, %c6_86] : memref<16x8xf32, #tpu.memory_space<smem>>
    %c5_87 = arith.constant 5 : index
    %c7_88 = arith.constant 7 : index
    %50 = memref.load %arg5[%c5_87, %c7_88] : memref<16x8xf32, #tpu.memory_space<smem>>
    %c6_89 = arith.constant 6 : index
    %c0_90 = arith.constant 0 : index
    %51 = memref.load %arg5[%c6_89, %c0_90] : memref<16x8xf32, #tpu.memory_space<smem>>
    %c6_91 = arith.constant 6 : index
    %c1_92 = arith.constant 1 : index
    %52 = memref.load %arg5[%c6_91, %c1_92] : memref<16x8xf32, #tpu.memory_space<smem>>
    %c6_93 = arith.constant 6 : index
    %c2_94 = arith.constant 2 : index
    %53 = memref.load %arg5[%c6_93, %c2_94] : memref<16x8xf32, #tpu.memory_space<smem>>
    %c6_95 = arith.constant 6 : index
    %c3_96 = arith.constant 3 : index
    %54 = memref.load %arg5[%c6_95, %c3_96] : memref<16x8xf32, #tpu.memory_space<smem>>
    %c6_97 = arith.constant 6 : index
    %c4_98 = arith.constant 4 : index
    %55 = memref.load %arg5[%c6_97, %c4_98] : memref<16x8xf32, #tpu.memory_space<smem>>
    %c6_99 = arith.constant 6 : index
    %c5_100 = arith.constant 5 : index
    %56 = memref.load %arg5[%c6_99, %c5_100] : memref<16x8xf32, #tpu.memory_space<smem>>
    %c6_101 = arith.constant 6 : index
    %c6_102 = arith.constant 6 : index
    %57 = memref.load %arg5[%c6_101, %c6_102] : memref<16x8xf32, #tpu.memory_space<smem>>
    %c6_103 = arith.constant 6 : index
    %c7_104 = arith.constant 7 : index
    %58 = memref.load %arg5[%c6_103, %c7_104] : memref<16x8xf32, #tpu.memory_space<smem>>
    %c7_105 = arith.constant 7 : index
    %c0_106 = arith.constant 0 : index
    %59 = memref.load %arg5[%c7_105, %c0_106] : memref<16x8xf32, #tpu.memory_space<smem>>
    %c7_107 = arith.constant 7 : index
    %c1_108 = arith.constant 1 : index
    %60 = memref.load %arg5[%c7_107, %c1_108] : memref<16x8xf32, #tpu.memory_space<smem>>
    %c7_109 = arith.constant 7 : index
    %c2_110 = arith.constant 2 : index
    %61 = memref.load %arg5[%c7_109, %c2_110] : memref<16x8xf32, #tpu.memory_space<smem>>
    %c7_111 = arith.constant 7 : index
    %c3_112 = arith.constant 3 : index
    %62 = memref.load %arg5[%c7_111, %c3_112] : memref<16x8xf32, #tpu.memory_space<smem>>
    %c7_113 = arith.constant 7 : index
    %c4_114 = arith.constant 4 : index
    %63 = memref.load %arg5[%c7_113, %c4_114] : memref<16x8xf32, #tpu.memory_space<smem>>
    %c7_115 = arith.constant 7 : index
    %c5_116 = arith.constant 5 : index
    %64 = memref.load %arg5[%c7_115, %c5_116] : memref<16x8xf32, #tpu.memory_space<smem>>
    %c7_117 = arith.constant 7 : index
    %c6_118 = arith.constant 6 : index
    %65 = memref.load %arg5[%c7_117, %c6_118] : memref<16x8xf32, #tpu.memory_space<smem>>
    %c7_119 = arith.constant 7 : index
    %c7_120 = arith.constant 7 : index
    %66 = memref.load %arg5[%c7_119, %c7_120] : memref<16x8xf32, #tpu.memory_space<smem>>
    %c8 = arith.constant 8 : index
    %c0_121 = arith.constant 0 : index
    %67 = memref.load %arg5[%c8, %c0_121] : memref<16x8xf32, #tpu.memory_space<smem>>
    %c8_122 = arith.constant 8 : index
    %c1_123 = arith.constant 1 : index
    %68 = memref.load %arg5[%c8_122, %c1_123] : memref<16x8xf32, #tpu.memory_space<smem>>
    %c8_124 = arith.constant 8 : index
    %c2_125 = arith.constant 2 : index
    %69 = memref.load %arg5[%c8_124, %c2_125] : memref<16x8xf32, #tpu.memory_space<smem>>
    %c8_126 = arith.constant 8 : index
    %c3_127 = arith.constant 3 : index
    %70 = memref.load %arg5[%c8_126, %c3_127] : memref<16x8xf32, #tpu.memory_space<smem>>
    %c8_128 = arith.constant 8 : index
    %c4_129 = arith.constant 4 : index
    %71 = memref.load %arg5[%c8_128, %c4_129] : memref<16x8xf32, #tpu.memory_space<smem>>
    %c8_130 = arith.constant 8 : index
    %c5_131 = arith.constant 5 : index
    %72 = memref.load %arg5[%c8_130, %c5_131] : memref<16x8xf32, #tpu.memory_space<smem>>
    %c8_132 = arith.constant 8 : index
    %c6_133 = arith.constant 6 : index
    %73 = memref.load %arg5[%c8_132, %c6_133] : memref<16x8xf32, #tpu.memory_space<smem>>
    %c8_134 = arith.constant 8 : index
    %c7_135 = arith.constant 7 : index
    %74 = memref.load %arg5[%c8_134, %c7_135] : memref<16x8xf32, #tpu.memory_space<smem>>
    %c9 = arith.constant 9 : index
    %c0_136 = arith.constant 0 : index
    %75 = memref.load %arg5[%c9, %c0_136] : memref<16x8xf32, #tpu.memory_space<smem>>
    %c9_137 = arith.constant 9 : index
    %c1_138 = arith.constant 1 : index
    %76 = memref.load %arg5[%c9_137, %c1_138] : memref<16x8xf32, #tpu.memory_space<smem>>
    %c9_139 = arith.constant 9 : index
    %c2_140 = arith.constant 2 : index
    %77 = memref.load %arg5[%c9_139, %c2_140] : memref<16x8xf32, #tpu.memory_space<smem>>
    %c9_141 = arith.constant 9 : index
    %c3_142 = arith.constant 3 : index
    %78 = memref.load %arg5[%c9_141, %c3_142] : memref<16x8xf32, #tpu.memory_space<smem>>
    %c9_143 = arith.constant 9 : index
    %c4_144 = arith.constant 4 : index
    %79 = memref.load %arg5[%c9_143, %c4_144] : memref<16x8xf32, #tpu.memory_space<smem>>
    %c9_145 = arith.constant 9 : index
    %c5_146 = arith.constant 5 : index
    %80 = memref.load %arg5[%c9_145, %c5_146] : memref<16x8xf32, #tpu.memory_space<smem>>
    %c9_147 = arith.constant 9 : index
    %c6_148 = arith.constant 6 : index
    %81 = memref.load %arg5[%c9_147, %c6_148] : memref<16x8xf32, #tpu.memory_space<smem>>
    %c9_149 = arith.constant 9 : index
    %c7_150 = arith.constant 7 : index
    %82 = memref.load %arg5[%c9_149, %c7_150] : memref<16x8xf32, #tpu.memory_space<smem>>
    %c10 = arith.constant 10 : index
    %c0_151 = arith.constant 0 : index
    %83 = memref.load %arg5[%c10, %c0_151] : memref<16x8xf32, #tpu.memory_space<smem>>
    %c10_152 = arith.constant 10 : index
    %c1_153 = arith.constant 1 : index
    %84 = memref.load %arg5[%c10_152, %c1_153] : memref<16x8xf32, #tpu.memory_space<smem>>
    %c10_154 = arith.constant 10 : index
    %c2_155 = arith.constant 2 : index
    %85 = memref.load %arg5[%c10_154, %c2_155] : memref<16x8xf32, #tpu.memory_space<smem>>
    %c10_156 = arith.constant 10 : index
    %c3_157 = arith.constant 3 : index
    %86 = memref.load %arg5[%c10_156, %c3_157] : memref<16x8xf32, #tpu.memory_space<smem>>
    %c10_158 = arith.constant 10 : index
    %c4_159 = arith.constant 4 : index
    %87 = memref.load %arg5[%c10_158, %c4_159] : memref<16x8xf32, #tpu.memory_space<smem>>
    %c10_160 = arith.constant 10 : index
    %c5_161 = arith.constant 5 : index
    %88 = memref.load %arg5[%c10_160, %c5_161] : memref<16x8xf32, #tpu.memory_space<smem>>
    %c10_162 = arith.constant 10 : index
    %c6_163 = arith.constant 6 : index
    %89 = memref.load %arg5[%c10_162, %c6_163] : memref<16x8xf32, #tpu.memory_space<smem>>
    %c10_164 = arith.constant 10 : index
    %c7_165 = arith.constant 7 : index
    %90 = memref.load %arg5[%c10_164, %c7_165] : memref<16x8xf32, #tpu.memory_space<smem>>
    %c11 = arith.constant 11 : index
    %c0_166 = arith.constant 0 : index
    %91 = memref.load %arg5[%c11, %c0_166] : memref<16x8xf32, #tpu.memory_space<smem>>
    %c11_167 = arith.constant 11 : index
    %c1_168 = arith.constant 1 : index
    %92 = memref.load %arg5[%c11_167, %c1_168] : memref<16x8xf32, #tpu.memory_space<smem>>
    %c11_169 = arith.constant 11 : index
    %c2_170 = arith.constant 2 : index
    %93 = memref.load %arg5[%c11_169, %c2_170] : memref<16x8xf32, #tpu.memory_space<smem>>
    %c11_171 = arith.constant 11 : index
    %c3_172 = arith.constant 3 : index
    %94 = memref.load %arg5[%c11_171, %c3_172] : memref<16x8xf32, #tpu.memory_space<smem>>
    %c11_173 = arith.constant 11 : index
    %c4_174 = arith.constant 4 : index
    %95 = memref.load %arg5[%c11_173, %c4_174] : memref<16x8xf32, #tpu.memory_space<smem>>
    %c11_175 = arith.constant 11 : index
    %c5_176 = arith.constant 5 : index
    %96 = memref.load %arg5[%c11_175, %c5_176] : memref<16x8xf32, #tpu.memory_space<smem>>
    %c11_177 = arith.constant 11 : index
    %c6_178 = arith.constant 6 : index
    %97 = memref.load %arg5[%c11_177, %c6_178] : memref<16x8xf32, #tpu.memory_space<smem>>
    %c11_179 = arith.constant 11 : index
    %c7_180 = arith.constant 7 : index
    %98 = memref.load %arg5[%c11_179, %c7_180] : memref<16x8xf32, #tpu.memory_space<smem>>
    %c12 = arith.constant 12 : index
    %c0_181 = arith.constant 0 : index
    %99 = memref.load %arg5[%c12, %c0_181] : memref<16x8xf32, #tpu.memory_space<smem>>
    %c12_182 = arith.constant 12 : index
    %c1_183 = arith.constant 1 : index
    %100 = memref.load %arg5[%c12_182, %c1_183] : memref<16x8xf32, #tpu.memory_space<smem>>
    %c12_184 = arith.constant 12 : index
    %c2_185 = arith.constant 2 : index
    %101 = memref.load %arg5[%c12_184, %c2_185] : memref<16x8xf32, #tpu.memory_space<smem>>
    %c12_186 = arith.constant 12 : index
    %c3_187 = arith.constant 3 : index
    %102 = memref.load %arg5[%c12_186, %c3_187] : memref<16x8xf32, #tpu.memory_space<smem>>
    %c12_188 = arith.constant 12 : index
    %c4_189 = arith.constant 4 : index
    %103 = memref.load %arg5[%c12_188, %c4_189] : memref<16x8xf32, #tpu.memory_space<smem>>
    %c12_190 = arith.constant 12 : index
    %c5_191 = arith.constant 5 : index
    %104 = memref.load %arg5[%c12_190, %c5_191] : memref<16x8xf32, #tpu.memory_space<smem>>
    %c12_192 = arith.constant 12 : index
    %c6_193 = arith.constant 6 : index
    %105 = memref.load %arg5[%c12_192, %c6_193] : memref<16x8xf32, #tpu.memory_space<smem>>
    %c12_194 = arith.constant 12 : index
    %c7_195 = arith.constant 7 : index
    %106 = memref.load %arg5[%c12_194, %c7_195] : memref<16x8xf32, #tpu.memory_space<smem>>
    %c13 = arith.constant 13 : index
    %c0_196 = arith.constant 0 : index
    %107 = memref.load %arg5[%c13, %c0_196] : memref<16x8xf32, #tpu.memory_space<smem>>
    %c13_197 = arith.constant 13 : index
    %c1_198 = arith.constant 1 : index
    %108 = memref.load %arg5[%c13_197, %c1_198] : memref<16x8xf32, #tpu.memory_space<smem>>
    %c13_199 = arith.constant 13 : index
    %c2_200 = arith.constant 2 : index
    %109 = memref.load %arg5[%c13_199, %c2_200] : memref<16x8xf32, #tpu.memory_space<smem>>
    %c13_201 = arith.constant 13 : index
    %c3_202 = arith.constant 3 : index
    %110 = memref.load %arg5[%c13_201, %c3_202] : memref<16x8xf32, #tpu.memory_space<smem>>
    %c13_203 = arith.constant 13 : index
    %c4_204 = arith.constant 4 : index
    %111 = memref.load %arg5[%c13_203, %c4_204] : memref<16x8xf32, #tpu.memory_space<smem>>
    %c13_205 = arith.constant 13 : index
    %c5_206 = arith.constant 5 : index
    %112 = memref.load %arg5[%c13_205, %c5_206] : memref<16x8xf32, #tpu.memory_space<smem>>
    %c13_207 = arith.constant 13 : index
    %c6_208 = arith.constant 6 : index
    %113 = memref.load %arg5[%c13_207, %c6_208] : memref<16x8xf32, #tpu.memory_space<smem>>
    %c13_209 = arith.constant 13 : index
    %c7_210 = arith.constant 7 : index
    %114 = memref.load %arg5[%c13_209, %c7_210] : memref<16x8xf32, #tpu.memory_space<smem>>
    %c14 = arith.constant 14 : index
    %c0_211 = arith.constant 0 : index
    %115 = memref.load %arg5[%c14, %c0_211] : memref<16x8xf32, #tpu.memory_space<smem>>
    %c14_212 = arith.constant 14 : index
    %c1_213 = arith.constant 1 : index
    %116 = memref.load %arg5[%c14_212, %c1_213] : memref<16x8xf32, #tpu.memory_space<smem>>
    %c14_214 = arith.constant 14 : index
    %c2_215 = arith.constant 2 : index
    %117 = memref.load %arg5[%c14_214, %c2_215] : memref<16x8xf32, #tpu.memory_space<smem>>
    %c14_216 = arith.constant 14 : index
    %c3_217 = arith.constant 3 : index
    %118 = memref.load %arg5[%c14_216, %c3_217] : memref<16x8xf32, #tpu.memory_space<smem>>
    %c14_218 = arith.constant 14 : index
    %c4_219 = arith.constant 4 : index
    %119 = memref.load %arg5[%c14_218, %c4_219] : memref<16x8xf32, #tpu.memory_space<smem>>
    %c14_220 = arith.constant 14 : index
    %c5_221 = arith.constant 5 : index
    %120 = memref.load %arg5[%c14_220, %c5_221] : memref<16x8xf32, #tpu.memory_space<smem>>
    %c14_222 = arith.constant 14 : index
    %c6_223 = arith.constant 6 : index
    %121 = memref.load %arg5[%c14_222, %c6_223] : memref<16x8xf32, #tpu.memory_space<smem>>
    %c14_224 = arith.constant 14 : index
    %c7_225 = arith.constant 7 : index
    %122 = memref.load %arg5[%c14_224, %c7_225] : memref<16x8xf32, #tpu.memory_space<smem>>
    %c15 = arith.constant 15 : index
    %c0_226 = arith.constant 0 : index
    %123 = memref.load %arg5[%c15, %c0_226] : memref<16x8xf32, #tpu.memory_space<smem>>
    %c15_227 = arith.constant 15 : index
    %c1_228 = arith.constant 1 : index
    %124 = memref.load %arg5[%c15_227, %c1_228] : memref<16x8xf32, #tpu.memory_space<smem>>
    %c15_229 = arith.constant 15 : index
    %c2_230 = arith.constant 2 : index
    %125 = memref.load %arg5[%c15_229, %c2_230] : memref<16x8xf32, #tpu.memory_space<smem>>
    %c15_231 = arith.constant 15 : index
    %c3_232 = arith.constant 3 : index
    %126 = memref.load %arg5[%c15_231, %c3_232] : memref<16x8xf32, #tpu.memory_space<smem>>
    %c15_233 = arith.constant 15 : index
    %c4_234 = arith.constant 4 : index
    %127 = memref.load %arg5[%c15_233, %c4_234] : memref<16x8xf32, #tpu.memory_space<smem>>
    %c15_235 = arith.constant 15 : index
    %c5_236 = arith.constant 5 : index
    %128 = memref.load %arg5[%c15_235, %c5_236] : memref<16x8xf32, #tpu.memory_space<smem>>
    %c15_237 = arith.constant 15 : index
    %c6_238 = arith.constant 6 : index
    %129 = memref.load %arg5[%c15_237, %c6_238] : memref<16x8xf32, #tpu.memory_space<smem>>
    %c15_239 = arith.constant 15 : index
    %c7_240 = arith.constant 7 : index
    %130 = memref.load %arg5[%c15_239, %c7_240] : memref<16x8xf32, #tpu.memory_space<smem>>
    %c0_241 = arith.constant 0 : index
    %131 = memref.load %arg6[%c0_241] : memref<16xf32, #tpu.memory_space<smem>>
    %c1_242 = arith.constant 1 : index
    %132 = memref.load %arg6[%c1_242] : memref<16xf32, #tpu.memory_space<smem>>
    %c2_243 = arith.constant 2 : index
    %133 = memref.load %arg6[%c2_243] : memref<16xf32, #tpu.memory_space<smem>>
    %c3_244 = arith.constant 3 : index
    %134 = memref.load %arg6[%c3_244] : memref<16xf32, #tpu.memory_space<smem>>
    %c4_245 = arith.constant 4 : index
    %135 = memref.load %arg6[%c4_245] : memref<16xf32, #tpu.memory_space<smem>>
    %c5_246 = arith.constant 5 : index
    %136 = memref.load %arg6[%c5_246] : memref<16xf32, #tpu.memory_space<smem>>
    %c6_247 = arith.constant 6 : index
    %137 = memref.load %arg6[%c6_247] : memref<16xf32, #tpu.memory_space<smem>>
    %c7_248 = arith.constant 7 : index
    %138 = memref.load %arg6[%c7_248] : memref<16xf32, #tpu.memory_space<smem>>
    %c8_249 = arith.constant 8 : index
    %139 = memref.load %arg6[%c8_249] : memref<16xf32, #tpu.memory_space<smem>>
    %c9_250 = arith.constant 9 : index
    %140 = memref.load %arg6[%c9_250] : memref<16xf32, #tpu.memory_space<smem>>
    %c10_251 = arith.constant 10 : index
    %141 = memref.load %arg6[%c10_251] : memref<16xf32, #tpu.memory_space<smem>>
    %c11_252 = arith.constant 11 : index
    %142 = memref.load %arg6[%c11_252] : memref<16xf32, #tpu.memory_space<smem>>
    %c12_253 = arith.constant 12 : index
    %143 = memref.load %arg6[%c12_253] : memref<16xf32, #tpu.memory_space<smem>>
    %c13_254 = arith.constant 13 : index
    %144 = memref.load %arg6[%c13_254] : memref<16xf32, #tpu.memory_space<smem>>
    %c14_255 = arith.constant 14 : index
    %145 = memref.load %arg6[%c14_255] : memref<16xf32, #tpu.memory_space<smem>>
    %c15_256 = arith.constant 15 : index
    %146 = memref.load %arg6[%c15_256] : memref<16xf32, #tpu.memory_space<smem>>
    %c0_257 = arith.constant 0 : index
    %c0_258 = arith.constant 0 : index
    %147 = memref.load %arg7[%c0_257, %c0_258] : memref<8x16xf32, #tpu.memory_space<smem>>
    %c0_259 = arith.constant 0 : index
    %c1_260 = arith.constant 1 : index
    %148 = memref.load %arg7[%c0_259, %c1_260] : memref<8x16xf32, #tpu.memory_space<smem>>
    %c0_261 = arith.constant 0 : index
    %c2_262 = arith.constant 2 : index
    %149 = memref.load %arg7[%c0_261, %c2_262] : memref<8x16xf32, #tpu.memory_space<smem>>
    %c0_263 = arith.constant 0 : index
    %c3_264 = arith.constant 3 : index
    %150 = memref.load %arg7[%c0_263, %c3_264] : memref<8x16xf32, #tpu.memory_space<smem>>
    %c0_265 = arith.constant 0 : index
    %c4_266 = arith.constant 4 : index
    %151 = memref.load %arg7[%c0_265, %c4_266] : memref<8x16xf32, #tpu.memory_space<smem>>
    %c0_267 = arith.constant 0 : index
    %c5_268 = arith.constant 5 : index
    %152 = memref.load %arg7[%c0_267, %c5_268] : memref<8x16xf32, #tpu.memory_space<smem>>
    %c0_269 = arith.constant 0 : index
    %c6_270 = arith.constant 6 : index
    %153 = memref.load %arg7[%c0_269, %c6_270] : memref<8x16xf32, #tpu.memory_space<smem>>
    %c0_271 = arith.constant 0 : index
    %c7_272 = arith.constant 7 : index
    %154 = memref.load %arg7[%c0_271, %c7_272] : memref<8x16xf32, #tpu.memory_space<smem>>
    %c0_273 = arith.constant 0 : index
    %c8_274 = arith.constant 8 : index
    %155 = memref.load %arg7[%c0_273, %c8_274] : memref<8x16xf32, #tpu.memory_space<smem>>
    %c0_275 = arith.constant 0 : index
    %c9_276 = arith.constant 9 : index
    %156 = memref.load %arg7[%c0_275, %c9_276] : memref<8x16xf32, #tpu.memory_space<smem>>
    %c0_277 = arith.constant 0 : index
    %c10_278 = arith.constant 10 : index
    %157 = memref.load %arg7[%c0_277, %c10_278] : memref<8x16xf32, #tpu.memory_space<smem>>
    %c0_279 = arith.constant 0 : index
    %c11_280 = arith.constant 11 : index
    %158 = memref.load %arg7[%c0_279, %c11_280] : memref<8x16xf32, #tpu.memory_space<smem>>
    %c0_281 = arith.constant 0 : index
    %c12_282 = arith.constant 12 : index
    %159 = memref.load %arg7[%c0_281, %c12_282] : memref<8x16xf32, #tpu.memory_space<smem>>
    %c0_283 = arith.constant 0 : index
    %c13_284 = arith.constant 13 : index
    %160 = memref.load %arg7[%c0_283, %c13_284] : memref<8x16xf32, #tpu.memory_space<smem>>
    %c0_285 = arith.constant 0 : index
    %c14_286 = arith.constant 14 : index
    %161 = memref.load %arg7[%c0_285, %c14_286] : memref<8x16xf32, #tpu.memory_space<smem>>
    %c0_287 = arith.constant 0 : index
    %c15_288 = arith.constant 15 : index
    %162 = memref.load %arg7[%c0_287, %c15_288] : memref<8x16xf32, #tpu.memory_space<smem>>
    %c1_289 = arith.constant 1 : index
    %c0_290 = arith.constant 0 : index
    %163 = memref.load %arg7[%c1_289, %c0_290] : memref<8x16xf32, #tpu.memory_space<smem>>
    %c1_291 = arith.constant 1 : index
    %c1_292 = arith.constant 1 : index
    %164 = memref.load %arg7[%c1_291, %c1_292] : memref<8x16xf32, #tpu.memory_space<smem>>
    %c1_293 = arith.constant 1 : index
    %c2_294 = arith.constant 2 : index
    %165 = memref.load %arg7[%c1_293, %c2_294] : memref<8x16xf32, #tpu.memory_space<smem>>
    %c1_295 = arith.constant 1 : index
    %c3_296 = arith.constant 3 : index
    %166 = memref.load %arg7[%c1_295, %c3_296] : memref<8x16xf32, #tpu.memory_space<smem>>
    %c1_297 = arith.constant 1 : index
    %c4_298 = arith.constant 4 : index
    %167 = memref.load %arg7[%c1_297, %c4_298] : memref<8x16xf32, #tpu.memory_space<smem>>
    %c1_299 = arith.constant 1 : index
    %c5_300 = arith.constant 5 : index
    %168 = memref.load %arg7[%c1_299, %c5_300] : memref<8x16xf32, #tpu.memory_space<smem>>
    %c1_301 = arith.constant 1 : index
    %c6_302 = arith.constant 6 : index
    %169 = memref.load %arg7[%c1_301, %c6_302] : memref<8x16xf32, #tpu.memory_space<smem>>
    %c1_303 = arith.constant 1 : index
    %c7_304 = arith.constant 7 : index
    %170 = memref.load %arg7[%c1_303, %c7_304] : memref<8x16xf32, #tpu.memory_space<smem>>
    %c1_305 = arith.constant 1 : index
    %c8_306 = arith.constant 8 : index
    %171 = memref.load %arg7[%c1_305, %c8_306] : memref<8x16xf32, #tpu.memory_space<smem>>
    %c1_307 = arith.constant 1 : index
    %c9_308 = arith.constant 9 : index
    %172 = memref.load %arg7[%c1_307, %c9_308] : memref<8x16xf32, #tpu.memory_space<smem>>
    %c1_309 = arith.constant 1 : index
    %c10_310 = arith.constant 10 : index
    %173 = memref.load %arg7[%c1_309, %c10_310] : memref<8x16xf32, #tpu.memory_space<smem>>
    %c1_311 = arith.constant 1 : index
    %c11_312 = arith.constant 11 : index
    %174 = memref.load %arg7[%c1_311, %c11_312] : memref<8x16xf32, #tpu.memory_space<smem>>
    %c1_313 = arith.constant 1 : index
    %c12_314 = arith.constant 12 : index
    %175 = memref.load %arg7[%c1_313, %c12_314] : memref<8x16xf32, #tpu.memory_space<smem>>
    %c1_315 = arith.constant 1 : index
    %c13_316 = arith.constant 13 : index
    %176 = memref.load %arg7[%c1_315, %c13_316] : memref<8x16xf32, #tpu.memory_space<smem>>
    %c1_317 = arith.constant 1 : index
    %c14_318 = arith.constant 14 : index
    %177 = memref.load %arg7[%c1_317, %c14_318] : memref<8x16xf32, #tpu.memory_space<smem>>
    %c1_319 = arith.constant 1 : index
    %c15_320 = arith.constant 15 : index
    %178 = memref.load %arg7[%c1_319, %c15_320] : memref<8x16xf32, #tpu.memory_space<smem>>
    %c2_321 = arith.constant 2 : index
    %c0_322 = arith.constant 0 : index
    %179 = memref.load %arg7[%c2_321, %c0_322] : memref<8x16xf32, #tpu.memory_space<smem>>
    %c2_323 = arith.constant 2 : index
    %c1_324 = arith.constant 1 : index
    %180 = memref.load %arg7[%c2_323, %c1_324] : memref<8x16xf32, #tpu.memory_space<smem>>
    %c2_325 = arith.constant 2 : index
    %c2_326 = arith.constant 2 : index
    %181 = memref.load %arg7[%c2_325, %c2_326] : memref<8x16xf32, #tpu.memory_space<smem>>
    %c2_327 = arith.constant 2 : index
    %c3_328 = arith.constant 3 : index
    %182 = memref.load %arg7[%c2_327, %c3_328] : memref<8x16xf32, #tpu.memory_space<smem>>
    %c2_329 = arith.constant 2 : index
    %c4_330 = arith.constant 4 : index
    %183 = memref.load %arg7[%c2_329, %c4_330] : memref<8x16xf32, #tpu.memory_space<smem>>
    %c2_331 = arith.constant 2 : index
    %c5_332 = arith.constant 5 : index
    %184 = memref.load %arg7[%c2_331, %c5_332] : memref<8x16xf32, #tpu.memory_space<smem>>
    %c2_333 = arith.constant 2 : index
    %c6_334 = arith.constant 6 : index
    %185 = memref.load %arg7[%c2_333, %c6_334] : memref<8x16xf32, #tpu.memory_space<smem>>
    %c2_335 = arith.constant 2 : index
    %c7_336 = arith.constant 7 : index
    %186 = memref.load %arg7[%c2_335, %c7_336] : memref<8x16xf32, #tpu.memory_space<smem>>
    %c2_337 = arith.constant 2 : index
    %c8_338 = arith.constant 8 : index
    %187 = memref.load %arg7[%c2_337, %c8_338] : memref<8x16xf32, #tpu.memory_space<smem>>
    %c2_339 = arith.constant 2 : index
    %c9_340 = arith.constant 9 : index
    %188 = memref.load %arg7[%c2_339, %c9_340] : memref<8x16xf32, #tpu.memory_space<smem>>
    %c2_341 = arith.constant 2 : index
    %c10_342 = arith.constant 10 : index
    %189 = memref.load %arg7[%c2_341, %c10_342] : memref<8x16xf32, #tpu.memory_space<smem>>
    %c2_343 = arith.constant 2 : index
    %c11_344 = arith.constant 11 : index
    %190 = memref.load %arg7[%c2_343, %c11_344] : memref<8x16xf32, #tpu.memory_space<smem>>
    %c2_345 = arith.constant 2 : index
    %c12_346 = arith.constant 12 : index
    %191 = memref.load %arg7[%c2_345, %c12_346] : memref<8x16xf32, #tpu.memory_space<smem>>
    %c2_347 = arith.constant 2 : index
    %c13_348 = arith.constant 13 : index
    %192 = memref.load %arg7[%c2_347, %c13_348] : memref<8x16xf32, #tpu.memory_space<smem>>
    %c2_349 = arith.constant 2 : index
    %c14_350 = arith.constant 14 : index
    %193 = memref.load %arg7[%c2_349, %c14_350] : memref<8x16xf32, #tpu.memory_space<smem>>
    %c2_351 = arith.constant 2 : index
    %c15_352 = arith.constant 15 : index
    %194 = memref.load %arg7[%c2_351, %c15_352] : memref<8x16xf32, #tpu.memory_space<smem>>
    %c3_353 = arith.constant 3 : index
    %c0_354 = arith.constant 0 : index
    %195 = memref.load %arg7[%c3_353, %c0_354] : memref<8x16xf32, #tpu.memory_space<smem>>
    %c3_355 = arith.constant 3 : index
    %c1_356 = arith.constant 1 : index
    %196 = memref.load %arg7[%c3_355, %c1_356] : memref<8x16xf32, #tpu.memory_space<smem>>
    %c3_357 = arith.constant 3 : index
    %c2_358 = arith.constant 2 : index
    %197 = memref.load %arg7[%c3_357, %c2_358] : memref<8x16xf32, #tpu.memory_space<smem>>
    %c3_359 = arith.constant 3 : index
    %c3_360 = arith.constant 3 : index
    %198 = memref.load %arg7[%c3_359, %c3_360] : memref<8x16xf32, #tpu.memory_space<smem>>
    %c3_361 = arith.constant 3 : index
    %c4_362 = arith.constant 4 : index
    %199 = memref.load %arg7[%c3_361, %c4_362] : memref<8x16xf32, #tpu.memory_space<smem>>
    %c3_363 = arith.constant 3 : index
    %c5_364 = arith.constant 5 : index
    %200 = memref.load %arg7[%c3_363, %c5_364] : memref<8x16xf32, #tpu.memory_space<smem>>
    %c3_365 = arith.constant 3 : index
    %c6_366 = arith.constant 6 : index
    %201 = memref.load %arg7[%c3_365, %c6_366] : memref<8x16xf32, #tpu.memory_space<smem>>
    %c3_367 = arith.constant 3 : index
    %c7_368 = arith.constant 7 : index
    %202 = memref.load %arg7[%c3_367, %c7_368] : memref<8x16xf32, #tpu.memory_space<smem>>
    %c3_369 = arith.constant 3 : index
    %c8_370 = arith.constant 8 : index
    %203 = memref.load %arg7[%c3_369, %c8_370] : memref<8x16xf32, #tpu.memory_space<smem>>
    %c3_371 = arith.constant 3 : index
    %c9_372 = arith.constant 9 : index
    %204 = memref.load %arg7[%c3_371, %c9_372] : memref<8x16xf32, #tpu.memory_space<smem>>
    %c3_373 = arith.constant 3 : index
    %c10_374 = arith.constant 10 : index
    %205 = memref.load %arg7[%c3_373, %c10_374] : memref<8x16xf32, #tpu.memory_space<smem>>
    %c3_375 = arith.constant 3 : index
    %c11_376 = arith.constant 11 : index
    %206 = memref.load %arg7[%c3_375, %c11_376] : memref<8x16xf32, #tpu.memory_space<smem>>
    %c3_377 = arith.constant 3 : index
    %c12_378 = arith.constant 12 : index
    %207 = memref.load %arg7[%c3_377, %c12_378] : memref<8x16xf32, #tpu.memory_space<smem>>
    %c3_379 = arith.constant 3 : index
    %c13_380 = arith.constant 13 : index
    %208 = memref.load %arg7[%c3_379, %c13_380] : memref<8x16xf32, #tpu.memory_space<smem>>
    %c3_381 = arith.constant 3 : index
    %c14_382 = arith.constant 14 : index
    %209 = memref.load %arg7[%c3_381, %c14_382] : memref<8x16xf32, #tpu.memory_space<smem>>
    %c3_383 = arith.constant 3 : index
    %c15_384 = arith.constant 15 : index
    %210 = memref.load %arg7[%c3_383, %c15_384] : memref<8x16xf32, #tpu.memory_space<smem>>
    %c4_385 = arith.constant 4 : index
    %c0_386 = arith.constant 0 : index
    %211 = memref.load %arg7[%c4_385, %c0_386] : memref<8x16xf32, #tpu.memory_space<smem>>
    %c4_387 = arith.constant 4 : index
    %c1_388 = arith.constant 1 : index
    %212 = memref.load %arg7[%c4_387, %c1_388] : memref<8x16xf32, #tpu.memory_space<smem>>
    %c4_389 = arith.constant 4 : index
    %c2_390 = arith.constant 2 : index
    %213 = memref.load %arg7[%c4_389, %c2_390] : memref<8x16xf32, #tpu.memory_space<smem>>
    %c4_391 = arith.constant 4 : index
    %c3_392 = arith.constant 3 : index
    %214 = memref.load %arg7[%c4_391, %c3_392] : memref<8x16xf32, #tpu.memory_space<smem>>
    %c4_393 = arith.constant 4 : index
    %c4_394 = arith.constant 4 : index
    %215 = memref.load %arg7[%c4_393, %c4_394] : memref<8x16xf32, #tpu.memory_space<smem>>
    %c4_395 = arith.constant 4 : index
    %c5_396 = arith.constant 5 : index
    %216 = memref.load %arg7[%c4_395, %c5_396] : memref<8x16xf32, #tpu.memory_space<smem>>
    %c4_397 = arith.constant 4 : index
    %c6_398 = arith.constant 6 : index
    %217 = memref.load %arg7[%c4_397, %c6_398] : memref<8x16xf32, #tpu.memory_space<smem>>
    %c4_399 = arith.constant 4 : index
    %c7_400 = arith.constant 7 : index
    %218 = memref.load %arg7[%c4_399, %c7_400] : memref<8x16xf32, #tpu.memory_space<smem>>
    %c4_401 = arith.constant 4 : index
    %c8_402 = arith.constant 8 : index
    %219 = memref.load %arg7[%c4_401, %c8_402] : memref<8x16xf32, #tpu.memory_space<smem>>
    %c4_403 = arith.constant 4 : index
    %c9_404 = arith.constant 9 : index
    %220 = memref.load %arg7[%c4_403, %c9_404] : memref<8x16xf32, #tpu.memory_space<smem>>
    %c4_405 = arith.constant 4 : index
    %c10_406 = arith.constant 10 : index
    %221 = memref.load %arg7[%c4_405, %c10_406] : memref<8x16xf32, #tpu.memory_space<smem>>
    %c4_407 = arith.constant 4 : index
    %c11_408 = arith.constant 11 : index
    %222 = memref.load %arg7[%c4_407, %c11_408] : memref<8x16xf32, #tpu.memory_space<smem>>
    %c4_409 = arith.constant 4 : index
    %c12_410 = arith.constant 12 : index
    %223 = memref.load %arg7[%c4_409, %c12_410] : memref<8x16xf32, #tpu.memory_space<smem>>
    %c4_411 = arith.constant 4 : index
    %c13_412 = arith.constant 13 : index
    %224 = memref.load %arg7[%c4_411, %c13_412] : memref<8x16xf32, #tpu.memory_space<smem>>
    %c4_413 = arith.constant 4 : index
    %c14_414 = arith.constant 14 : index
    %225 = memref.load %arg7[%c4_413, %c14_414] : memref<8x16xf32, #tpu.memory_space<smem>>
    %c4_415 = arith.constant 4 : index
    %c15_416 = arith.constant 15 : index
    %226 = memref.load %arg7[%c4_415, %c15_416] : memref<8x16xf32, #tpu.memory_space<smem>>
    %c5_417 = arith.constant 5 : index
    %c0_418 = arith.constant 0 : index
    %227 = memref.load %arg7[%c5_417, %c0_418] : memref<8x16xf32, #tpu.memory_space<smem>>
    %c5_419 = arith.constant 5 : index
    %c1_420 = arith.constant 1 : index
    %228 = memref.load %arg7[%c5_419, %c1_420] : memref<8x16xf32, #tpu.memory_space<smem>>
    %c5_421 = arith.constant 5 : index
    %c2_422 = arith.constant 2 : index
    %229 = memref.load %arg7[%c5_421, %c2_422] : memref<8x16xf32, #tpu.memory_space<smem>>
    %c5_423 = arith.constant 5 : index
    %c3_424 = arith.constant 3 : index
    %230 = memref.load %arg7[%c5_423, %c3_424] : memref<8x16xf32, #tpu.memory_space<smem>>
    %c5_425 = arith.constant 5 : index
    %c4_426 = arith.constant 4 : index
    %231 = memref.load %arg7[%c5_425, %c4_426] : memref<8x16xf32, #tpu.memory_space<smem>>
    %c5_427 = arith.constant 5 : index
    %c5_428 = arith.constant 5 : index
    %232 = memref.load %arg7[%c5_427, %c5_428] : memref<8x16xf32, #tpu.memory_space<smem>>
    %c5_429 = arith.constant 5 : index
    %c6_430 = arith.constant 6 : index
    %233 = memref.load %arg7[%c5_429, %c6_430] : memref<8x16xf32, #tpu.memory_space<smem>>
    %c5_431 = arith.constant 5 : index
    %c7_432 = arith.constant 7 : index
    %234 = memref.load %arg7[%c5_431, %c7_432] : memref<8x16xf32, #tpu.memory_space<smem>>
    %c5_433 = arith.constant 5 : index
    %c8_434 = arith.constant 8 : index
    %235 = memref.load %arg7[%c5_433, %c8_434] : memref<8x16xf32, #tpu.memory_space<smem>>
    %c5_435 = arith.constant 5 : index
    %c9_436 = arith.constant 9 : index
    %236 = memref.load %arg7[%c5_435, %c9_436] : memref<8x16xf32, #tpu.memory_space<smem>>
    %c5_437 = arith.constant 5 : index
    %c10_438 = arith.constant 10 : index
    %237 = memref.load %arg7[%c5_437, %c10_438] : memref<8x16xf32, #tpu.memory_space<smem>>
    %c5_439 = arith.constant 5 : index
    %c11_440 = arith.constant 11 : index
    %238 = memref.load %arg7[%c5_439, %c11_440] : memref<8x16xf32, #tpu.memory_space<smem>>
    %c5_441 = arith.constant 5 : index
    %c12_442 = arith.constant 12 : index
    %239 = memref.load %arg7[%c5_441, %c12_442] : memref<8x16xf32, #tpu.memory_space<smem>>
    %c5_443 = arith.constant 5 : index
    %c13_444 = arith.constant 13 : index
    %240 = memref.load %arg7[%c5_443, %c13_444] : memref<8x16xf32, #tpu.memory_space<smem>>
    %c5_445 = arith.constant 5 : index
    %c14_446 = arith.constant 14 : index
    %241 = memref.load %arg7[%c5_445, %c14_446] : memref<8x16xf32, #tpu.memory_space<smem>>
    %c5_447 = arith.constant 5 : index
    %c15_448 = arith.constant 15 : index
    %242 = memref.load %arg7[%c5_447, %c15_448] : memref<8x16xf32, #tpu.memory_space<smem>>
    %c6_449 = arith.constant 6 : index
    %c0_450 = arith.constant 0 : index
    %243 = memref.load %arg7[%c6_449, %c0_450] : memref<8x16xf32, #tpu.memory_space<smem>>
    %c6_451 = arith.constant 6 : index
    %c1_452 = arith.constant 1 : index
    %244 = memref.load %arg7[%c6_451, %c1_452] : memref<8x16xf32, #tpu.memory_space<smem>>
    %c6_453 = arith.constant 6 : index
    %c2_454 = arith.constant 2 : index
    %245 = memref.load %arg7[%c6_453, %c2_454] : memref<8x16xf32, #tpu.memory_space<smem>>
    %c6_455 = arith.constant 6 : index
    %c3_456 = arith.constant 3 : index
    %246 = memref.load %arg7[%c6_455, %c3_456] : memref<8x16xf32, #tpu.memory_space<smem>>
    %c6_457 = arith.constant 6 : index
    %c4_458 = arith.constant 4 : index
    %247 = memref.load %arg7[%c6_457, %c4_458] : memref<8x16xf32, #tpu.memory_space<smem>>
    %c6_459 = arith.constant 6 : index
    %c5_460 = arith.constant 5 : index
    %248 = memref.load %arg7[%c6_459, %c5_460] : memref<8x16xf32, #tpu.memory_space<smem>>
    %c6_461 = arith.constant 6 : index
    %c6_462 = arith.constant 6 : index
    %249 = memref.load %arg7[%c6_461, %c6_462] : memref<8x16xf32, #tpu.memory_space<smem>>
    %c6_463 = arith.constant 6 : index
    %c7_464 = arith.constant 7 : index
    %250 = memref.load %arg7[%c6_463, %c7_464] : memref<8x16xf32, #tpu.memory_space<smem>>
    %c6_465 = arith.constant 6 : index
    %c8_466 = arith.constant 8 : index
    %251 = memref.load %arg7[%c6_465, %c8_466] : memref<8x16xf32, #tpu.memory_space<smem>>
    %c6_467 = arith.constant 6 : index
    %c9_468 = arith.constant 9 : index
    %252 = memref.load %arg7[%c6_467, %c9_468] : memref<8x16xf32, #tpu.memory_space<smem>>
    %c6_469 = arith.constant 6 : index
    %c10_470 = arith.constant 10 : index
    %253 = memref.load %arg7[%c6_469, %c10_470] : memref<8x16xf32, #tpu.memory_space<smem>>
    %c6_471 = arith.constant 6 : index
    %c11_472 = arith.constant 11 : index
    %254 = memref.load %arg7[%c6_471, %c11_472] : memref<8x16xf32, #tpu.memory_space<smem>>
    %c6_473 = arith.constant 6 : index
    %c12_474 = arith.constant 12 : index
    %255 = memref.load %arg7[%c6_473, %c12_474] : memref<8x16xf32, #tpu.memory_space<smem>>
    %c6_475 = arith.constant 6 : index
    %c13_476 = arith.constant 13 : index
    %256 = memref.load %arg7[%c6_475, %c13_476] : memref<8x16xf32, #tpu.memory_space<smem>>
    %c6_477 = arith.constant 6 : index
    %c14_478 = arith.constant 14 : index
    %257 = memref.load %arg7[%c6_477, %c14_478] : memref<8x16xf32, #tpu.memory_space<smem>>
    %c6_479 = arith.constant 6 : index
    %c15_480 = arith.constant 15 : index
    %258 = memref.load %arg7[%c6_479, %c15_480] : memref<8x16xf32, #tpu.memory_space<smem>>
    %c7_481 = arith.constant 7 : index
    %c0_482 = arith.constant 0 : index
    %259 = memref.load %arg7[%c7_481, %c0_482] : memref<8x16xf32, #tpu.memory_space<smem>>
    %c7_483 = arith.constant 7 : index
    %c1_484 = arith.constant 1 : index
    %260 = memref.load %arg7[%c7_483, %c1_484] : memref<8x16xf32, #tpu.memory_space<smem>>
    %c7_485 = arith.constant 7 : index
    %c2_486 = arith.constant 2 : index
    %261 = memref.load %arg7[%c7_485, %c2_486] : memref<8x16xf32, #tpu.memory_space<smem>>
    %c7_487 = arith.constant 7 : index
    %c3_488 = arith.constant 3 : index
    %262 = memref.load %arg7[%c7_487, %c3_488] : memref<8x16xf32, #tpu.memory_space<smem>>
    %c7_489 = arith.constant 7 : index
    %c4_490 = arith.constant 4 : index
    %263 = memref.load %arg7[%c7_489, %c4_490] : memref<8x16xf32, #tpu.memory_space<smem>>
    %c7_491 = arith.constant 7 : index
    %c5_492 = arith.constant 5 : index
    %264 = memref.load %arg7[%c7_491, %c5_492] : memref<8x16xf32, #tpu.memory_space<smem>>
    %c7_493 = arith.constant 7 : index
    %c6_494 = arith.constant 6 : index
    %265 = memref.load %arg7[%c7_493, %c6_494] : memref<8x16xf32, #tpu.memory_space<smem>>
    %c7_495 = arith.constant 7 : index
    %c7_496 = arith.constant 7 : index
    %266 = memref.load %arg7[%c7_495, %c7_496] : memref<8x16xf32, #tpu.memory_space<smem>>
    %c7_497 = arith.constant 7 : index
    %c8_498 = arith.constant 8 : index
    %267 = memref.load %arg7[%c7_497, %c8_498] : memref<8x16xf32, #tpu.memory_space<smem>>
    %c7_499 = arith.constant 7 : index
    %c9_500 = arith.constant 9 : index
    %268 = memref.load %arg7[%c7_499, %c9_500] : memref<8x16xf32, #tpu.memory_space<smem>>
    %c7_501 = arith.constant 7 : index
    %c10_502 = arith.constant 10 : index
    %269 = memref.load %arg7[%c7_501, %c10_502] : memref<8x16xf32, #tpu.memory_space<smem>>
    %c7_503 = arith.constant 7 : index
    %c11_504 = arith.constant 11 : index
    %270 = memref.load %arg7[%c7_503, %c11_504] : memref<8x16xf32, #tpu.memory_space<smem>>
    %c7_505 = arith.constant 7 : index
    %c12_506 = arith.constant 12 : index
    %271 = memref.load %arg7[%c7_505, %c12_506] : memref<8x16xf32, #tpu.memory_space<smem>>
    %c7_507 = arith.constant 7 : index
    %c13_508 = arith.constant 13 : index
    %272 = memref.load %arg7[%c7_507, %c13_508] : memref<8x16xf32, #tpu.memory_space<smem>>
    %c7_509 = arith.constant 7 : index
    %c14_510 = arith.constant 14 : index
    %273 = memref.load %arg7[%c7_509, %c14_510] : memref<8x16xf32, #tpu.memory_space<smem>>
    %c7_511 = arith.constant 7 : index
    %c15_512 = arith.constant 15 : index
    %274 = memref.load %arg7[%c7_511, %c15_512] : memref<8x16xf32, #tpu.memory_space<smem>>
    %c0_513 = arith.constant 0 : index
    %275 = memref.load %arg8[%c0_513] : memref<8xf32, #tpu.memory_space<smem>>
    %c1_514 = arith.constant 1 : index
    %276 = memref.load %arg8[%c1_514] : memref<8xf32, #tpu.memory_space<smem>>
    %c2_515 = arith.constant 2 : index
    %277 = memref.load %arg8[%c2_515] : memref<8xf32, #tpu.memory_space<smem>>
    %c3_516 = arith.constant 3 : index
    %278 = memref.load %arg8[%c3_516] : memref<8xf32, #tpu.memory_space<smem>>
    %c4_517 = arith.constant 4 : index
    %279 = memref.load %arg8[%c4_517] : memref<8xf32, #tpu.memory_space<smem>>
    %c5_518 = arith.constant 5 : index
    %280 = memref.load %arg8[%c5_518] : memref<8xf32, #tpu.memory_space<smem>>
    %c6_519 = arith.constant 6 : index
    %281 = memref.load %arg8[%c6_519] : memref<8xf32, #tpu.memory_space<smem>>
    %c7_520 = arith.constant 7 : index
    %282 = memref.load %arg8[%c7_520] : memref<8xf32, #tpu.memory_space<smem>>
    %c0_521 = arith.constant 0 : index
    %283 = memref.load %arg9[%c0_521] : memref<8xf32, #tpu.memory_space<smem>>
    %c1_522 = arith.constant 1 : index
    %284 = memref.load %arg9[%c1_522] : memref<8xf32, #tpu.memory_space<smem>>
    %c2_523 = arith.constant 2 : index
    %285 = memref.load %arg9[%c2_523] : memref<8xf32, #tpu.memory_space<smem>>
    %c3_524 = arith.constant 3 : index
    %286 = memref.load %arg9[%c3_524] : memref<8xf32, #tpu.memory_space<smem>>
    %c4_525 = arith.constant 4 : index
    %287 = memref.load %arg9[%c4_525] : memref<8xf32, #tpu.memory_space<smem>>
    %c5_526 = arith.constant 5 : index
    %288 = memref.load %arg9[%c5_526] : memref<8xf32, #tpu.memory_space<smem>>
    %c6_527 = arith.constant 6 : index
    %289 = memref.load %arg9[%c6_527] : memref<8xf32, #tpu.memory_space<smem>>
    %c7_528 = arith.constant 7 : index
    %290 = memref.load %arg9[%c7_528] : memref<8xf32, #tpu.memory_space<smem>>
    %c0_529 = arith.constant 0 : index
    %291 = memref.load %arg10[%c0_529] : memref<1xf32, #tpu.memory_space<smem>>
    %c0_530 = arith.constant 0 : index
    %c0_531 = arith.constant 0 : index
    %292 = vector.load %arg2[%c0_530, %c0_531] : memref<16x32xf32, #tpu.memory_space<vmem>>, vector<16x32xf32>
    %c0_532 = arith.constant 0 : index
    %c0_533 = arith.constant 0 : index
    %293 = vector.load %arg12[%c0_532, %c0_533] : memref<256x128xf32, #tpu.memory_space<vmem>>, vector<32x128xf32>
    %cst = arith.constant dense<0.000000e+00> : vector<16x128xf32>
    %294 = tpu.matmul %292, %293, %cst {dimension_numbers = #tpu.dot_dimension_numbers<[1], [0], [0], [1], [0, 0, 1, 1], [], []>} : vector<16x32xf32>, vector<32x128xf32>, vector<16x128xf32> -> vector<16x128xf32>
    %c32 = arith.constant 32 : index
    %c0_534 = arith.constant 0 : index
    %295 = vector.load %arg12[%c32, %c0_534] : memref<256x128xf32, #tpu.memory_space<vmem>>, vector<32x128xf32>
    %cst_535 = arith.constant dense<0.000000e+00> : vector<16x128xf32>
    %296 = tpu.matmul %292, %295, %cst_535 {dimension_numbers = #tpu.dot_dimension_numbers<[1], [0], [0], [1], [0, 0, 1, 1], [], []>} : vector<16x32xf32>, vector<32x128xf32>, vector<16x128xf32> -> vector<16x128xf32>
    %c64 = arith.constant 64 : index
    %c0_536 = arith.constant 0 : index
    %297 = vector.load %arg12[%c64, %c0_536] : memref<256x128xf32, #tpu.memory_space<vmem>>, vector<32x128xf32>
    %cst_537 = arith.constant dense<0.000000e+00> : vector<16x128xf32>
    %298 = tpu.matmul %292, %297, %cst_537 {dimension_numbers = #tpu.dot_dimension_numbers<[1], [0], [0], [1], [0, 0, 1, 1], [], []>} : vector<16x32xf32>, vector<32x128xf32>, vector<16x128xf32> -> vector<16x128xf32>
    %c96 = arith.constant 96 : index
    %c0_538 = arith.constant 0 : index
    %299 = vector.load %arg12[%c96, %c0_538] : memref<256x128xf32, #tpu.memory_space<vmem>>, vector<32x128xf32>
    %cst_539 = arith.constant dense<0.000000e+00> : vector<16x128xf32>
    %300 = tpu.matmul %292, %299, %cst_539 {dimension_numbers = #tpu.dot_dimension_numbers<[1], [0], [0], [1], [0, 0, 1, 1], [], []>} : vector<16x32xf32>, vector<32x128xf32>, vector<16x128xf32> -> vector<16x128xf32>
    %c128 = arith.constant 128 : index
    %c0_540 = arith.constant 0 : index
    %301 = vector.load %arg12[%c128, %c0_540] : memref<256x128xf32, #tpu.memory_space<vmem>>, vector<32x128xf32>
    %cst_541 = arith.constant dense<0.000000e+00> : vector<16x128xf32>
    %302 = tpu.matmul %292, %301, %cst_541 {dimension_numbers = #tpu.dot_dimension_numbers<[1], [0], [0], [1], [0, 0, 1, 1], [], []>} : vector<16x32xf32>, vector<32x128xf32>, vector<16x128xf32> -> vector<16x128xf32>
    %c160 = arith.constant 160 : index
    %c0_542 = arith.constant 0 : index
    %303 = vector.load %arg12[%c160, %c0_542] : memref<256x128xf32, #tpu.memory_space<vmem>>, vector<32x128xf32>
    %cst_543 = arith.constant dense<0.000000e+00> : vector<16x128xf32>
    %304 = tpu.matmul %292, %303, %cst_543 {dimension_numbers = #tpu.dot_dimension_numbers<[1], [0], [0], [1], [0, 0, 1, 1], [], []>} : vector<16x32xf32>, vector<32x128xf32>, vector<16x128xf32> -> vector<16x128xf32>
    %c192 = arith.constant 192 : index
    %c0_544 = arith.constant 0 : index
    %305 = vector.load %arg12[%c192, %c0_544] : memref<256x128xf32, #tpu.memory_space<vmem>>, vector<32x128xf32>
    %cst_545 = arith.constant dense<0.000000e+00> : vector<16x128xf32>
    %306 = tpu.matmul %292, %305, %cst_545 {dimension_numbers = #tpu.dot_dimension_numbers<[1], [0], [0], [1], [0, 0, 1, 1], [], []>} : vector<16x32xf32>, vector<32x128xf32>, vector<16x128xf32> -> vector<16x128xf32>
    %c224 = arith.constant 224 : index
    %c0_546 = arith.constant 0 : index
    %307 = vector.load %arg12[%c224, %c0_546] : memref<256x128xf32, #tpu.memory_space<vmem>>, vector<32x128xf32>
    %cst_547 = arith.constant dense<0.000000e+00> : vector<16x128xf32>
    %308 = tpu.matmul %292, %307, %cst_547 {dimension_numbers = #tpu.dot_dimension_numbers<[1], [0], [0], [1], [0, 0, 1, 1], [], []>} : vector<16x32xf32>, vector<32x128xf32>, vector<16x128xf32> -> vector<16x128xf32>
    %309 = vector.broadcast %3 : f32 to vector<16x128xf32>
    %310 = arith.mulf %294, %309 : vector<16x128xf32>
    %311 = vector.broadcast %4 : f32 to vector<16x128xf32>
    %312 = arith.mulf %296, %311 : vector<16x128xf32>
    %313 = arith.addf %310, %312 : vector<16x128xf32>
    %314 = vector.broadcast %5 : f32 to vector<16x128xf32>
    %315 = arith.mulf %298, %314 : vector<16x128xf32>
    %316 = arith.addf %313, %315 : vector<16x128xf32>
    %317 = vector.broadcast %6 : f32 to vector<16x128xf32>
    %318 = arith.mulf %300, %317 : vector<16x128xf32>
    %319 = arith.addf %316, %318 : vector<16x128xf32>
    %320 = vector.broadcast %7 : f32 to vector<16x128xf32>
    %321 = arith.mulf %302, %320 : vector<16x128xf32>
    %322 = arith.addf %319, %321 : vector<16x128xf32>
    %323 = vector.broadcast %8 : f32 to vector<16x128xf32>
    %324 = arith.mulf %304, %323 : vector<16x128xf32>
    %325 = arith.addf %322, %324 : vector<16x128xf32>
    %326 = vector.broadcast %9 : f32 to vector<16x128xf32>
    %327 = arith.mulf %306, %326 : vector<16x128xf32>
    %328 = arith.addf %325, %327 : vector<16x128xf32>
    %329 = vector.broadcast %10 : f32 to vector<16x128xf32>
    %330 = arith.mulf %308, %329 : vector<16x128xf32>
    %331 = arith.addf %328, %330 : vector<16x128xf32>
    %332 = vector.broadcast %131 : f32 to vector<16x128xf32>
    %333 = arith.addf %331, %332 : vector<16x128xf32>
    %cst_548 = arith.constant 0.000000e+00 : f32
    %334 = vector.broadcast %cst_548 : f32 to vector<16x128xf32>
    %335 = arith.maximumf %333, %334 : vector<16x128xf32>
    %336 = vector.broadcast %147 : f32 to vector<16x128xf32>
    %337 = arith.mulf %335, %336 : vector<16x128xf32>
    %338 = vector.broadcast %163 : f32 to vector<16x128xf32>
    %339 = arith.mulf %335, %338 : vector<16x128xf32>
    %340 = vector.broadcast %179 : f32 to vector<16x128xf32>
    %341 = arith.mulf %335, %340 : vector<16x128xf32>
    %342 = vector.broadcast %195 : f32 to vector<16x128xf32>
    %343 = arith.mulf %335, %342 : vector<16x128xf32>
    %344 = vector.broadcast %211 : f32 to vector<16x128xf32>
    %345 = arith.mulf %335, %344 : vector<16x128xf32>
    %346 = vector.broadcast %227 : f32 to vector<16x128xf32>
    %347 = arith.mulf %335, %346 : vector<16x128xf32>
    %348 = vector.broadcast %243 : f32 to vector<16x128xf32>
    %349 = arith.mulf %335, %348 : vector<16x128xf32>
    %350 = vector.broadcast %259 : f32 to vector<16x128xf32>
    %351 = arith.mulf %335, %350 : vector<16x128xf32>
    %352 = vector.broadcast %11 : f32 to vector<16x128xf32>
    %353 = arith.mulf %294, %352 : vector<16x128xf32>
    %354 = vector.broadcast %12 : f32 to vector<16x128xf32>
    %355 = arith.mulf %296, %354 : vector<16x128xf32>
    %356 = arith.addf %353, %355 : vector<16x128xf32>
    %357 = vector.broadcast %13 : f32 to vector<16x128xf32>
    %358 = arith.mulf %298, %357 : vector<16x128xf32>
    %359 = arith.addf %356, %358 : vector<16x128xf32>
    %360 = vector.broadcast %14 : f32 to vector<16x128xf32>
    %361 = arith.mulf %300, %360 : vector<16x128xf32>
    %362 = arith.addf %359, %361 : vector<16x128xf32>
    %363 = vector.broadcast %15 : f32 to vector<16x128xf32>
    %364 = arith.mulf %302, %363 : vector<16x128xf32>
    %365 = arith.addf %362, %364 : vector<16x128xf32>
    %366 = vector.broadcast %16 : f32 to vector<16x128xf32>
    %367 = arith.mulf %304, %366 : vector<16x128xf32>
    %368 = arith.addf %365, %367 : vector<16x128xf32>
    %369 = vector.broadcast %17 : f32 to vector<16x128xf32>
    %370 = arith.mulf %306, %369 : vector<16x128xf32>
    %371 = arith.addf %368, %370 : vector<16x128xf32>
    %372 = vector.broadcast %18 : f32 to vector<16x128xf32>
    %373 = arith.mulf %308, %372 : vector<16x128xf32>
    %374 = arith.addf %371, %373 : vector<16x128xf32>
    %375 = vector.broadcast %132 : f32 to vector<16x128xf32>
    %376 = arith.addf %374, %375 : vector<16x128xf32>
    %cst_549 = arith.constant 0.000000e+00 : f32
    %377 = vector.broadcast %cst_549 : f32 to vector<16x128xf32>
    %378 = arith.maximumf %376, %377 : vector<16x128xf32>
    %379 = vector.broadcast %148 : f32 to vector<16x128xf32>
    %380 = arith.mulf %378, %379 : vector<16x128xf32>
    %381 = arith.addf %337, %380 : vector<16x128xf32>
    %382 = vector.broadcast %164 : f32 to vector<16x128xf32>
    %383 = arith.mulf %378, %382 : vector<16x128xf32>
    %384 = arith.addf %339, %383 : vector<16x128xf32>
    %385 = vector.broadcast %180 : f32 to vector<16x128xf32>
    %386 = arith.mulf %378, %385 : vector<16x128xf32>
    %387 = arith.addf %341, %386 : vector<16x128xf32>
    %388 = vector.broadcast %196 : f32 to vector<16x128xf32>
    %389 = arith.mulf %378, %388 : vector<16x128xf32>
    %390 = arith.addf %343, %389 : vector<16x128xf32>
    %391 = vector.broadcast %212 : f32 to vector<16x128xf32>
    %392 = arith.mulf %378, %391 : vector<16x128xf32>
    %393 = arith.addf %345, %392 : vector<16x128xf32>
    %394 = vector.broadcast %228 : f32 to vector<16x128xf32>
    %395 = arith.mulf %378, %394 : vector<16x128xf32>
    %396 = arith.addf %347, %395 : vector<16x128xf32>
    %397 = vector.broadcast %244 : f32 to vector<16x128xf32>
    %398 = arith.mulf %378, %397 : vector<16x128xf32>
    %399 = arith.addf %349, %398 : vector<16x128xf32>
    %400 = vector.broadcast %260 : f32 to vector<16x128xf32>
    %401 = arith.mulf %378, %400 : vector<16x128xf32>
    %402 = arith.addf %351, %401 : vector<16x128xf32>
    %403 = vector.broadcast %19 : f32 to vector<16x128xf32>
    %404 = arith.mulf %294, %403 : vector<16x128xf32>
    %405 = vector.broadcast %20 : f32 to vector<16x128xf32>
    %406 = arith.mulf %296, %405 : vector<16x128xf32>
    %407 = arith.addf %404, %406 : vector<16x128xf32>
    %408 = vector.broadcast %21 : f32 to vector<16x128xf32>
    %409 = arith.mulf %298, %408 : vector<16x128xf32>
    %410 = arith.addf %407, %409 : vector<16x128xf32>
    %411 = vector.broadcast %22 : f32 to vector<16x128xf32>
    %412 = arith.mulf %300, %411 : vector<16x128xf32>
    %413 = arith.addf %410, %412 : vector<16x128xf32>
    %414 = vector.broadcast %23 : f32 to vector<16x128xf32>
    %415 = arith.mulf %302, %414 : vector<16x128xf32>
    %416 = arith.addf %413, %415 : vector<16x128xf32>
    %417 = vector.broadcast %24 : f32 to vector<16x128xf32>
    %418 = arith.mulf %304, %417 : vector<16x128xf32>
    %419 = arith.addf %416, %418 : vector<16x128xf32>
    %420 = vector.broadcast %25 : f32 to vector<16x128xf32>
    %421 = arith.mulf %306, %420 : vector<16x128xf32>
    %422 = arith.addf %419, %421 : vector<16x128xf32>
    %423 = vector.broadcast %26 : f32 to vector<16x128xf32>
    %424 = arith.mulf %308, %423 : vector<16x128xf32>
    %425 = arith.addf %422, %424 : vector<16x128xf32>
    %426 = vector.broadcast %133 : f32 to vector<16x128xf32>
    %427 = arith.addf %425, %426 : vector<16x128xf32>
    %cst_550 = arith.constant 0.000000e+00 : f32
    %428 = vector.broadcast %cst_550 : f32 to vector<16x128xf32>
    %429 = arith.maximumf %427, %428 : vector<16x128xf32>
    %430 = vector.broadcast %149 : f32 to vector<16x128xf32>
    %431 = arith.mulf %429, %430 : vector<16x128xf32>
    %432 = arith.addf %381, %431 : vector<16x128xf32>
    %433 = vector.broadcast %165 : f32 to vector<16x128xf32>
    %434 = arith.mulf %429, %433 : vector<16x128xf32>
    %435 = arith.addf %384, %434 : vector<16x128xf32>
    %436 = vector.broadcast %181 : f32 to vector<16x128xf32>
    %437 = arith.mulf %429, %436 : vector<16x128xf32>
    %438 = arith.addf %387, %437 : vector<16x128xf32>
    %439 = vector.broadcast %197 : f32 to vector<16x128xf32>
    %440 = arith.mulf %429, %439 : vector<16x128xf32>
    %441 = arith.addf %390, %440 : vector<16x128xf32>
    %442 = vector.broadcast %213 : f32 to vector<16x128xf32>
    %443 = arith.mulf %429, %442 : vector<16x128xf32>
    %444 = arith.addf %393, %443 : vector<16x128xf32>
    %445 = vector.broadcast %229 : f32 to vector<16x128xf32>
    %446 = arith.mulf %429, %445 : vector<16x128xf32>
    %447 = arith.addf %396, %446 : vector<16x128xf32>
    %448 = vector.broadcast %245 : f32 to vector<16x128xf32>
    %449 = arith.mulf %429, %448 : vector<16x128xf32>
    %450 = arith.addf %399, %449 : vector<16x128xf32>
    %451 = vector.broadcast %261 : f32 to vector<16x128xf32>
    %452 = arith.mulf %429, %451 : vector<16x128xf32>
    %453 = arith.addf %402, %452 : vector<16x128xf32>
    %454 = vector.broadcast %27 : f32 to vector<16x128xf32>
    %455 = arith.mulf %294, %454 : vector<16x128xf32>
    %456 = vector.broadcast %28 : f32 to vector<16x128xf32>
    %457 = arith.mulf %296, %456 : vector<16x128xf32>
    %458 = arith.addf %455, %457 : vector<16x128xf32>
    %459 = vector.broadcast %29 : f32 to vector<16x128xf32>
    %460 = arith.mulf %298, %459 : vector<16x128xf32>
    %461 = arith.addf %458, %460 : vector<16x128xf32>
    %462 = vector.broadcast %30 : f32 to vector<16x128xf32>
    %463 = arith.mulf %300, %462 : vector<16x128xf32>
    %464 = arith.addf %461, %463 : vector<16x128xf32>
    %465 = vector.broadcast %31 : f32 to vector<16x128xf32>
    %466 = arith.mulf %302, %465 : vector<16x128xf32>
    %467 = arith.addf %464, %466 : vector<16x128xf32>
    %468 = vector.broadcast %32 : f32 to vector<16x128xf32>
    %469 = arith.mulf %304, %468 : vector<16x128xf32>
    %470 = arith.addf %467, %469 : vector<16x128xf32>
    %471 = vector.broadcast %33 : f32 to vector<16x128xf32>
    %472 = arith.mulf %306, %471 : vector<16x128xf32>
    %473 = arith.addf %470, %472 : vector<16x128xf32>
    %474 = vector.broadcast %34 : f32 to vector<16x128xf32>
    %475 = arith.mulf %308, %474 : vector<16x128xf32>
    %476 = arith.addf %473, %475 : vector<16x128xf32>
    %477 = vector.broadcast %134 : f32 to vector<16x128xf32>
    %478 = arith.addf %476, %477 : vector<16x128xf32>
    %cst_551 = arith.constant 0.000000e+00 : f32
    %479 = vector.broadcast %cst_551 : f32 to vector<16x128xf32>
    %480 = arith.maximumf %478, %479 : vector<16x128xf32>
    %481 = vector.broadcast %150 : f32 to vector<16x128xf32>
    %482 = arith.mulf %480, %481 : vector<16x128xf32>
    %483 = arith.addf %432, %482 : vector<16x128xf32>
    %484 = vector.broadcast %166 : f32 to vector<16x128xf32>
    %485 = arith.mulf %480, %484 : vector<16x128xf32>
    %486 = arith.addf %435, %485 : vector<16x128xf32>
    %487 = vector.broadcast %182 : f32 to vector<16x128xf32>
    %488 = arith.mulf %480, %487 : vector<16x128xf32>
    %489 = arith.addf %438, %488 : vector<16x128xf32>
    %490 = vector.broadcast %198 : f32 to vector<16x128xf32>
    %491 = arith.mulf %480, %490 : vector<16x128xf32>
    %492 = arith.addf %441, %491 : vector<16x128xf32>
    %493 = vector.broadcast %214 : f32 to vector<16x128xf32>
    %494 = arith.mulf %480, %493 : vector<16x128xf32>
    %495 = arith.addf %444, %494 : vector<16x128xf32>
    %496 = vector.broadcast %230 : f32 to vector<16x128xf32>
    %497 = arith.mulf %480, %496 : vector<16x128xf32>
    %498 = arith.addf %447, %497 : vector<16x128xf32>
    %499 = vector.broadcast %246 : f32 to vector<16x128xf32>
    %500 = arith.mulf %480, %499 : vector<16x128xf32>
    %501 = arith.addf %450, %500 : vector<16x128xf32>
    %502 = vector.broadcast %262 : f32 to vector<16x128xf32>
    %503 = arith.mulf %480, %502 : vector<16x128xf32>
    %504 = arith.addf %453, %503 : vector<16x128xf32>
    %505 = vector.broadcast %35 : f32 to vector<16x128xf32>
    %506 = arith.mulf %294, %505 : vector<16x128xf32>
    %507 = vector.broadcast %36 : f32 to vector<16x128xf32>
    %508 = arith.mulf %296, %507 : vector<16x128xf32>
    %509 = arith.addf %506, %508 : vector<16x128xf32>
    %510 = vector.broadcast %37 : f32 to vector<16x128xf32>
    %511 = arith.mulf %298, %510 : vector<16x128xf32>
    %512 = arith.addf %509, %511 : vector<16x128xf32>
    %513 = vector.broadcast %38 : f32 to vector<16x128xf32>
    %514 = arith.mulf %300, %513 : vector<16x128xf32>
    %515 = arith.addf %512, %514 : vector<16x128xf32>
    %516 = vector.broadcast %39 : f32 to vector<16x128xf32>
    %517 = arith.mulf %302, %516 : vector<16x128xf32>
    %518 = arith.addf %515, %517 : vector<16x128xf32>
    %519 = vector.broadcast %40 : f32 to vector<16x128xf32>
    %520 = arith.mulf %304, %519 : vector<16x128xf32>
    %521 = arith.addf %518, %520 : vector<16x128xf32>
    %522 = vector.broadcast %41 : f32 to vector<16x128xf32>
    %523 = arith.mulf %306, %522 : vector<16x128xf32>
    %524 = arith.addf %521, %523 : vector<16x128xf32>
    %525 = vector.broadcast %42 : f32 to vector<16x128xf32>
    %526 = arith.mulf %308, %525 : vector<16x128xf32>
    %527 = arith.addf %524, %526 : vector<16x128xf32>
    %528 = vector.broadcast %135 : f32 to vector<16x128xf32>
    %529 = arith.addf %527, %528 : vector<16x128xf32>
    %cst_552 = arith.constant 0.000000e+00 : f32
    %530 = vector.broadcast %cst_552 : f32 to vector<16x128xf32>
    %531 = arith.maximumf %529, %530 : vector<16x128xf32>
    %532 = vector.broadcast %151 : f32 to vector<16x128xf32>
    %533 = arith.mulf %531, %532 : vector<16x128xf32>
    %534 = arith.addf %483, %533 : vector<16x128xf32>
    %535 = vector.broadcast %167 : f32 to vector<16x128xf32>
    %536 = arith.mulf %531, %535 : vector<16x128xf32>
    %537 = arith.addf %486, %536 : vector<16x128xf32>
    %538 = vector.broadcast %183 : f32 to vector<16x128xf32>
    %539 = arith.mulf %531, %538 : vector<16x128xf32>
    %540 = arith.addf %489, %539 : vector<16x128xf32>
    %541 = vector.broadcast %199 : f32 to vector<16x128xf32>
    %542 = arith.mulf %531, %541 : vector<16x128xf32>
    %543 = arith.addf %492, %542 : vector<16x128xf32>
    %544 = vector.broadcast %215 : f32 to vector<16x128xf32>
    %545 = arith.mulf %531, %544 : vector<16x128xf32>
    %546 = arith.addf %495, %545 : vector<16x128xf32>
    %547 = vector.broadcast %231 : f32 to vector<16x128xf32>
    %548 = arith.mulf %531, %547 : vector<16x128xf32>
    %549 = arith.addf %498, %548 : vector<16x128xf32>
    %550 = vector.broadcast %247 : f32 to vector<16x128xf32>
    %551 = arith.mulf %531, %550 : vector<16x128xf32>
    %552 = arith.addf %501, %551 : vector<16x128xf32>
    %553 = vector.broadcast %263 : f32 to vector<16x128xf32>
    %554 = arith.mulf %531, %553 : vector<16x128xf32>
    %555 = arith.addf %504, %554 : vector<16x128xf32>
    %556 = vector.broadcast %43 : f32 to vector<16x128xf32>
    %557 = arith.mulf %294, %556 : vector<16x128xf32>
    %558 = vector.broadcast %44 : f32 to vector<16x128xf32>
    %559 = arith.mulf %296, %558 : vector<16x128xf32>
    %560 = arith.addf %557, %559 : vector<16x128xf32>
    %561 = vector.broadcast %45 : f32 to vector<16x128xf32>
    %562 = arith.mulf %298, %561 : vector<16x128xf32>
    %563 = arith.addf %560, %562 : vector<16x128xf32>
    %564 = vector.broadcast %46 : f32 to vector<16x128xf32>
    %565 = arith.mulf %300, %564 : vector<16x128xf32>
    %566 = arith.addf %563, %565 : vector<16x128xf32>
    %567 = vector.broadcast %47 : f32 to vector<16x128xf32>
    %568 = arith.mulf %302, %567 : vector<16x128xf32>
    %569 = arith.addf %566, %568 : vector<16x128xf32>
    %570 = vector.broadcast %48 : f32 to vector<16x128xf32>
    %571 = arith.mulf %304, %570 : vector<16x128xf32>
    %572 = arith.addf %569, %571 : vector<16x128xf32>
    %573 = vector.broadcast %49 : f32 to vector<16x128xf32>
    %574 = arith.mulf %306, %573 : vector<16x128xf32>
    %575 = arith.addf %572, %574 : vector<16x128xf32>
    %576 = vector.broadcast %50 : f32 to vector<16x128xf32>
    %577 = arith.mulf %308, %576 : vector<16x128xf32>
    %578 = arith.addf %575, %577 : vector<16x128xf32>
    %579 = vector.broadcast %136 : f32 to vector<16x128xf32>
    %580 = arith.addf %578, %579 : vector<16x128xf32>
    %cst_553 = arith.constant 0.000000e+00 : f32
    %581 = vector.broadcast %cst_553 : f32 to vector<16x128xf32>
    %582 = arith.maximumf %580, %581 : vector<16x128xf32>
    %583 = vector.broadcast %152 : f32 to vector<16x128xf32>
    %584 = arith.mulf %582, %583 : vector<16x128xf32>
    %585 = arith.addf %534, %584 : vector<16x128xf32>
    %586 = vector.broadcast %168 : f32 to vector<16x128xf32>
    %587 = arith.mulf %582, %586 : vector<16x128xf32>
    %588 = arith.addf %537, %587 : vector<16x128xf32>
    %589 = vector.broadcast %184 : f32 to vector<16x128xf32>
    %590 = arith.mulf %582, %589 : vector<16x128xf32>
    %591 = arith.addf %540, %590 : vector<16x128xf32>
    %592 = vector.broadcast %200 : f32 to vector<16x128xf32>
    %593 = arith.mulf %582, %592 : vector<16x128xf32>
    %594 = arith.addf %543, %593 : vector<16x128xf32>
    %595 = vector.broadcast %216 : f32 to vector<16x128xf32>
    %596 = arith.mulf %582, %595 : vector<16x128xf32>
    %597 = arith.addf %546, %596 : vector<16x128xf32>
    %598 = vector.broadcast %232 : f32 to vector<16x128xf32>
    %599 = arith.mulf %582, %598 : vector<16x128xf32>
    %600 = arith.addf %549, %599 : vector<16x128xf32>
    %601 = vector.broadcast %248 : f32 to vector<16x128xf32>
    %602 = arith.mulf %582, %601 : vector<16x128xf32>
    %603 = arith.addf %552, %602 : vector<16x128xf32>
    %604 = vector.broadcast %264 : f32 to vector<16x128xf32>
    %605 = arith.mulf %582, %604 : vector<16x128xf32>
    %606 = arith.addf %555, %605 : vector<16x128xf32>
    %607 = vector.broadcast %51 : f32 to vector<16x128xf32>
    %608 = arith.mulf %294, %607 : vector<16x128xf32>
    %609 = vector.broadcast %52 : f32 to vector<16x128xf32>
    %610 = arith.mulf %296, %609 : vector<16x128xf32>
    %611 = arith.addf %608, %610 : vector<16x128xf32>
    %612 = vector.broadcast %53 : f32 to vector<16x128xf32>
    %613 = arith.mulf %298, %612 : vector<16x128xf32>
    %614 = arith.addf %611, %613 : vector<16x128xf32>
    %615 = vector.broadcast %54 : f32 to vector<16x128xf32>
    %616 = arith.mulf %300, %615 : vector<16x128xf32>
    %617 = arith.addf %614, %616 : vector<16x128xf32>
    %618 = vector.broadcast %55 : f32 to vector<16x128xf32>
    %619 = arith.mulf %302, %618 : vector<16x128xf32>
    %620 = arith.addf %617, %619 : vector<16x128xf32>
    %621 = vector.broadcast %56 : f32 to vector<16x128xf32>
    %622 = arith.mulf %304, %621 : vector<16x128xf32>
    %623 = arith.addf %620, %622 : vector<16x128xf32>
    %624 = vector.broadcast %57 : f32 to vector<16x128xf32>
    %625 = arith.mulf %306, %624 : vector<16x128xf32>
    %626 = arith.addf %623, %625 : vector<16x128xf32>
    %627 = vector.broadcast %58 : f32 to vector<16x128xf32>
    %628 = arith.mulf %308, %627 : vector<16x128xf32>
    %629 = arith.addf %626, %628 : vector<16x128xf32>
    %630 = vector.broadcast %137 : f32 to vector<16x128xf32>
    %631 = arith.addf %629, %630 : vector<16x128xf32>
    %cst_554 = arith.constant 0.000000e+00 : f32
    %632 = vector.broadcast %cst_554 : f32 to vector<16x128xf32>
    %633 = arith.maximumf %631, %632 : vector<16x128xf32>
    %634 = vector.broadcast %153 : f32 to vector<16x128xf32>
    %635 = arith.mulf %633, %634 : vector<16x128xf32>
    %636 = arith.addf %585, %635 : vector<16x128xf32>
    %637 = vector.broadcast %169 : f32 to vector<16x128xf32>
    %638 = arith.mulf %633, %637 : vector<16x128xf32>
    %639 = arith.addf %588, %638 : vector<16x128xf32>
    %640 = vector.broadcast %185 : f32 to vector<16x128xf32>
    %641 = arith.mulf %633, %640 : vector<16x128xf32>
    %642 = arith.addf %591, %641 : vector<16x128xf32>
    %643 = vector.broadcast %201 : f32 to vector<16x128xf32>
    %644 = arith.mulf %633, %643 : vector<16x128xf32>
    %645 = arith.addf %594, %644 : vector<16x128xf32>
    %646 = vector.broadcast %217 : f32 to vector<16x128xf32>
    %647 = arith.mulf %633, %646 : vector<16x128xf32>
    %648 = arith.addf %597, %647 : vector<16x128xf32>
    %649 = vector.broadcast %233 : f32 to vector<16x128xf32>
    %650 = arith.mulf %633, %649 : vector<16x128xf32>
    %651 = arith.addf %600, %650 : vector<16x128xf32>
    %652 = vector.broadcast %249 : f32 to vector<16x128xf32>
    %653 = arith.mulf %633, %652 : vector<16x128xf32>
    %654 = arith.addf %603, %653 : vector<16x128xf32>
    %655 = vector.broadcast %265 : f32 to vector<16x128xf32>
    %656 = arith.mulf %633, %655 : vector<16x128xf32>
    %657 = arith.addf %606, %656 : vector<16x128xf32>
    %658 = vector.broadcast %59 : f32 to vector<16x128xf32>
    %659 = arith.mulf %294, %658 : vector<16x128xf32>
    %660 = vector.broadcast %60 : f32 to vector<16x128xf32>
    %661 = arith.mulf %296, %660 : vector<16x128xf32>
    %662 = arith.addf %659, %661 : vector<16x128xf32>
    %663 = vector.broadcast %61 : f32 to vector<16x128xf32>
    %664 = arith.mulf %298, %663 : vector<16x128xf32>
    %665 = arith.addf %662, %664 : vector<16x128xf32>
    %666 = vector.broadcast %62 : f32 to vector<16x128xf32>
    %667 = arith.mulf %300, %666 : vector<16x128xf32>
    %668 = arith.addf %665, %667 : vector<16x128xf32>
    %669 = vector.broadcast %63 : f32 to vector<16x128xf32>
    %670 = arith.mulf %302, %669 : vector<16x128xf32>
    %671 = arith.addf %668, %670 : vector<16x128xf32>
    %672 = vector.broadcast %64 : f32 to vector<16x128xf32>
    %673 = arith.mulf %304, %672 : vector<16x128xf32>
    %674 = arith.addf %671, %673 : vector<16x128xf32>
    %675 = vector.broadcast %65 : f32 to vector<16x128xf32>
    %676 = arith.mulf %306, %675 : vector<16x128xf32>
    %677 = arith.addf %674, %676 : vector<16x128xf32>
    %678 = vector.broadcast %66 : f32 to vector<16x128xf32>
    %679 = arith.mulf %308, %678 : vector<16x128xf32>
    %680 = arith.addf %677, %679 : vector<16x128xf32>
    %681 = vector.broadcast %138 : f32 to vector<16x128xf32>
    %682 = arith.addf %680, %681 : vector<16x128xf32>
    %cst_555 = arith.constant 0.000000e+00 : f32
    %683 = vector.broadcast %cst_555 : f32 to vector<16x128xf32>
    %684 = arith.maximumf %682, %683 : vector<16x128xf32>
    %685 = vector.broadcast %154 : f32 to vector<16x128xf32>
    %686 = arith.mulf %684, %685 : vector<16x128xf32>
    %687 = arith.addf %636, %686 : vector<16x128xf32>
    %688 = vector.broadcast %170 : f32 to vector<16x128xf32>
    %689 = arith.mulf %684, %688 : vector<16x128xf32>
    %690 = arith.addf %639, %689 : vector<16x128xf32>
    %691 = vector.broadcast %186 : f32 to vector<16x128xf32>
    %692 = arith.mulf %684, %691 : vector<16x128xf32>
    %693 = arith.addf %642, %692 : vector<16x128xf32>
    %694 = vector.broadcast %202 : f32 to vector<16x128xf32>
    %695 = arith.mulf %684, %694 : vector<16x128xf32>
    %696 = arith.addf %645, %695 : vector<16x128xf32>
    %697 = vector.broadcast %218 : f32 to vector<16x128xf32>
    %698 = arith.mulf %684, %697 : vector<16x128xf32>
    %699 = arith.addf %648, %698 : vector<16x128xf32>
    %700 = vector.broadcast %234 : f32 to vector<16x128xf32>
    %701 = arith.mulf %684, %700 : vector<16x128xf32>
    %702 = arith.addf %651, %701 : vector<16x128xf32>
    %703 = vector.broadcast %250 : f32 to vector<16x128xf32>
    %704 = arith.mulf %684, %703 : vector<16x128xf32>
    %705 = arith.addf %654, %704 : vector<16x128xf32>
    %706 = vector.broadcast %266 : f32 to vector<16x128xf32>
    %707 = arith.mulf %684, %706 : vector<16x128xf32>
    %708 = arith.addf %657, %707 : vector<16x128xf32>
    %709 = vector.broadcast %67 : f32 to vector<16x128xf32>
    %710 = arith.mulf %294, %709 : vector<16x128xf32>
    %711 = vector.broadcast %68 : f32 to vector<16x128xf32>
    %712 = arith.mulf %296, %711 : vector<16x128xf32>
    %713 = arith.addf %710, %712 : vector<16x128xf32>
    %714 = vector.broadcast %69 : f32 to vector<16x128xf32>
    %715 = arith.mulf %298, %714 : vector<16x128xf32>
    %716 = arith.addf %713, %715 : vector<16x128xf32>
    %717 = vector.broadcast %70 : f32 to vector<16x128xf32>
    %718 = arith.mulf %300, %717 : vector<16x128xf32>
    %719 = arith.addf %716, %718 : vector<16x128xf32>
    %720 = vector.broadcast %71 : f32 to vector<16x128xf32>
    %721 = arith.mulf %302, %720 : vector<16x128xf32>
    %722 = arith.addf %719, %721 : vector<16x128xf32>
    %723 = vector.broadcast %72 : f32 to vector<16x128xf32>
    %724 = arith.mulf %304, %723 : vector<16x128xf32>
    %725 = arith.addf %722, %724 : vector<16x128xf32>
    %726 = vector.broadcast %73 : f32 to vector<16x128xf32>
    %727 = arith.mulf %306, %726 : vector<16x128xf32>
    %728 = arith.addf %725, %727 : vector<16x128xf32>
    %729 = vector.broadcast %74 : f32 to vector<16x128xf32>
    %730 = arith.mulf %308, %729 : vector<16x128xf32>
    %731 = arith.addf %728, %730 : vector<16x128xf32>
    %732 = vector.broadcast %139 : f32 to vector<16x128xf32>
    %733 = arith.addf %731, %732 : vector<16x128xf32>
    %cst_556 = arith.constant 0.000000e+00 : f32
    %734 = vector.broadcast %cst_556 : f32 to vector<16x128xf32>
    %735 = arith.maximumf %733, %734 : vector<16x128xf32>
    %736 = vector.broadcast %155 : f32 to vector<16x128xf32>
    %737 = arith.mulf %735, %736 : vector<16x128xf32>
    %738 = arith.addf %687, %737 : vector<16x128xf32>
    %739 = vector.broadcast %171 : f32 to vector<16x128xf32>
    %740 = arith.mulf %735, %739 : vector<16x128xf32>
    %741 = arith.addf %690, %740 : vector<16x128xf32>
    %742 = vector.broadcast %187 : f32 to vector<16x128xf32>
    %743 = arith.mulf %735, %742 : vector<16x128xf32>
    %744 = arith.addf %693, %743 : vector<16x128xf32>
    %745 = vector.broadcast %203 : f32 to vector<16x128xf32>
    %746 = arith.mulf %735, %745 : vector<16x128xf32>
    %747 = arith.addf %696, %746 : vector<16x128xf32>
    %748 = vector.broadcast %219 : f32 to vector<16x128xf32>
    %749 = arith.mulf %735, %748 : vector<16x128xf32>
    %750 = arith.addf %699, %749 : vector<16x128xf32>
    %751 = vector.broadcast %235 : f32 to vector<16x128xf32>
    %752 = arith.mulf %735, %751 : vector<16x128xf32>
    %753 = arith.addf %702, %752 : vector<16x128xf32>
    %754 = vector.broadcast %251 : f32 to vector<16x128xf32>
    %755 = arith.mulf %735, %754 : vector<16x128xf32>
    %756 = arith.addf %705, %755 : vector<16x128xf32>
    %757 = vector.broadcast %267 : f32 to vector<16x128xf32>
    %758 = arith.mulf %735, %757 : vector<16x128xf32>
    %759 = arith.addf %708, %758 : vector<16x128xf32>
    %760 = vector.broadcast %75 : f32 to vector<16x128xf32>
    %761 = arith.mulf %294, %760 : vector<16x128xf32>
    %762 = vector.broadcast %76 : f32 to vector<16x128xf32>
    %763 = arith.mulf %296, %762 : vector<16x128xf32>
    %764 = arith.addf %761, %763 : vector<16x128xf32>
    %765 = vector.broadcast %77 : f32 to vector<16x128xf32>
    %766 = arith.mulf %298, %765 : vector<16x128xf32>
    %767 = arith.addf %764, %766 : vector<16x128xf32>
    %768 = vector.broadcast %78 : f32 to vector<16x128xf32>
    %769 = arith.mulf %300, %768 : vector<16x128xf32>
    %770 = arith.addf %767, %769 : vector<16x128xf32>
    %771 = vector.broadcast %79 : f32 to vector<16x128xf32>
    %772 = arith.mulf %302, %771 : vector<16x128xf32>
    %773 = arith.addf %770, %772 : vector<16x128xf32>
    %774 = vector.broadcast %80 : f32 to vector<16x128xf32>
    %775 = arith.mulf %304, %774 : vector<16x128xf32>
    %776 = arith.addf %773, %775 : vector<16x128xf32>
    %777 = vector.broadcast %81 : f32 to vector<16x128xf32>
    %778 = arith.mulf %306, %777 : vector<16x128xf32>
    %779 = arith.addf %776, %778 : vector<16x128xf32>
    %780 = vector.broadcast %82 : f32 to vector<16x128xf32>
    %781 = arith.mulf %308, %780 : vector<16x128xf32>
    %782 = arith.addf %779, %781 : vector<16x128xf32>
    %783 = vector.broadcast %140 : f32 to vector<16x128xf32>
    %784 = arith.addf %782, %783 : vector<16x128xf32>
    %cst_557 = arith.constant 0.000000e+00 : f32
    %785 = vector.broadcast %cst_557 : f32 to vector<16x128xf32>
    %786 = arith.maximumf %784, %785 : vector<16x128xf32>
    %787 = vector.broadcast %156 : f32 to vector<16x128xf32>
    %788 = arith.mulf %786, %787 : vector<16x128xf32>
    %789 = arith.addf %738, %788 : vector<16x128xf32>
    %790 = vector.broadcast %172 : f32 to vector<16x128xf32>
    %791 = arith.mulf %786, %790 : vector<16x128xf32>
    %792 = arith.addf %741, %791 : vector<16x128xf32>
    %793 = vector.broadcast %188 : f32 to vector<16x128xf32>
    %794 = arith.mulf %786, %793 : vector<16x128xf32>
    %795 = arith.addf %744, %794 : vector<16x128xf32>
    %796 = vector.broadcast %204 : f32 to vector<16x128xf32>
    %797 = arith.mulf %786, %796 : vector<16x128xf32>
    %798 = arith.addf %747, %797 : vector<16x128xf32>
    %799 = vector.broadcast %220 : f32 to vector<16x128xf32>
    %800 = arith.mulf %786, %799 : vector<16x128xf32>
    %801 = arith.addf %750, %800 : vector<16x128xf32>
    %802 = vector.broadcast %236 : f32 to vector<16x128xf32>
    %803 = arith.mulf %786, %802 : vector<16x128xf32>
    %804 = arith.addf %753, %803 : vector<16x128xf32>
    %805 = vector.broadcast %252 : f32 to vector<16x128xf32>
    %806 = arith.mulf %786, %805 : vector<16x128xf32>
    %807 = arith.addf %756, %806 : vector<16x128xf32>
    %808 = vector.broadcast %268 : f32 to vector<16x128xf32>
    %809 = arith.mulf %786, %808 : vector<16x128xf32>
    %810 = arith.addf %759, %809 : vector<16x128xf32>
    %811 = vector.broadcast %83 : f32 to vector<16x128xf32>
    %812 = arith.mulf %294, %811 : vector<16x128xf32>
    %813 = vector.broadcast %84 : f32 to vector<16x128xf32>
    %814 = arith.mulf %296, %813 : vector<16x128xf32>
    %815 = arith.addf %812, %814 : vector<16x128xf32>
    %816 = vector.broadcast %85 : f32 to vector<16x128xf32>
    %817 = arith.mulf %298, %816 : vector<16x128xf32>
    %818 = arith.addf %815, %817 : vector<16x128xf32>
    %819 = vector.broadcast %86 : f32 to vector<16x128xf32>
    %820 = arith.mulf %300, %819 : vector<16x128xf32>
    %821 = arith.addf %818, %820 : vector<16x128xf32>
    %822 = vector.broadcast %87 : f32 to vector<16x128xf32>
    %823 = arith.mulf %302, %822 : vector<16x128xf32>
    %824 = arith.addf %821, %823 : vector<16x128xf32>
    %825 = vector.broadcast %88 : f32 to vector<16x128xf32>
    %826 = arith.mulf %304, %825 : vector<16x128xf32>
    %827 = arith.addf %824, %826 : vector<16x128xf32>
    %828 = vector.broadcast %89 : f32 to vector<16x128xf32>
    %829 = arith.mulf %306, %828 : vector<16x128xf32>
    %830 = arith.addf %827, %829 : vector<16x128xf32>
    %831 = vector.broadcast %90 : f32 to vector<16x128xf32>
    %832 = arith.mulf %308, %831 : vector<16x128xf32>
    %833 = arith.addf %830, %832 : vector<16x128xf32>
    %834 = vector.broadcast %141 : f32 to vector<16x128xf32>
    %835 = arith.addf %833, %834 : vector<16x128xf32>
    %cst_558 = arith.constant 0.000000e+00 : f32
    %836 = vector.broadcast %cst_558 : f32 to vector<16x128xf32>
    %837 = arith.maximumf %835, %836 : vector<16x128xf32>
    %838 = vector.broadcast %157 : f32 to vector<16x128xf32>
    %839 = arith.mulf %837, %838 : vector<16x128xf32>
    %840 = arith.addf %789, %839 : vector<16x128xf32>
    %841 = vector.broadcast %173 : f32 to vector<16x128xf32>
    %842 = arith.mulf %837, %841 : vector<16x128xf32>
    %843 = arith.addf %792, %842 : vector<16x128xf32>
    %844 = vector.broadcast %189 : f32 to vector<16x128xf32>
    %845 = arith.mulf %837, %844 : vector<16x128xf32>
    %846 = arith.addf %795, %845 : vector<16x128xf32>
    %847 = vector.broadcast %205 : f32 to vector<16x128xf32>
    %848 = arith.mulf %837, %847 : vector<16x128xf32>
    %849 = arith.addf %798, %848 : vector<16x128xf32>
    %850 = vector.broadcast %221 : f32 to vector<16x128xf32>
    %851 = arith.mulf %837, %850 : vector<16x128xf32>
    %852 = arith.addf %801, %851 : vector<16x128xf32>
    %853 = vector.broadcast %237 : f32 to vector<16x128xf32>
    %854 = arith.mulf %837, %853 : vector<16x128xf32>
    %855 = arith.addf %804, %854 : vector<16x128xf32>
    %856 = vector.broadcast %253 : f32 to vector<16x128xf32>
    %857 = arith.mulf %837, %856 : vector<16x128xf32>
    %858 = arith.addf %807, %857 : vector<16x128xf32>
    %859 = vector.broadcast %269 : f32 to vector<16x128xf32>
    %860 = arith.mulf %837, %859 : vector<16x128xf32>
    %861 = arith.addf %810, %860 : vector<16x128xf32>
    %862 = vector.broadcast %91 : f32 to vector<16x128xf32>
    %863 = arith.mulf %294, %862 : vector<16x128xf32>
    %864 = vector.broadcast %92 : f32 to vector<16x128xf32>
    %865 = arith.mulf %296, %864 : vector<16x128xf32>
    %866 = arith.addf %863, %865 : vector<16x128xf32>
    %867 = vector.broadcast %93 : f32 to vector<16x128xf32>
    %868 = arith.mulf %298, %867 : vector<16x128xf32>
    %869 = arith.addf %866, %868 : vector<16x128xf32>
    %870 = vector.broadcast %94 : f32 to vector<16x128xf32>
    %871 = arith.mulf %300, %870 : vector<16x128xf32>
    %872 = arith.addf %869, %871 : vector<16x128xf32>
    %873 = vector.broadcast %95 : f32 to vector<16x128xf32>
    %874 = arith.mulf %302, %873 : vector<16x128xf32>
    %875 = arith.addf %872, %874 : vector<16x128xf32>
    %876 = vector.broadcast %96 : f32 to vector<16x128xf32>
    %877 = arith.mulf %304, %876 : vector<16x128xf32>
    %878 = arith.addf %875, %877 : vector<16x128xf32>
    %879 = vector.broadcast %97 : f32 to vector<16x128xf32>
    %880 = arith.mulf %306, %879 : vector<16x128xf32>
    %881 = arith.addf %878, %880 : vector<16x128xf32>
    %882 = vector.broadcast %98 : f32 to vector<16x128xf32>
    %883 = arith.mulf %308, %882 : vector<16x128xf32>
    %884 = arith.addf %881, %883 : vector<16x128xf32>
    %885 = vector.broadcast %142 : f32 to vector<16x128xf32>
    %886 = arith.addf %884, %885 : vector<16x128xf32>
    %cst_559 = arith.constant 0.000000e+00 : f32
    %887 = vector.broadcast %cst_559 : f32 to vector<16x128xf32>
    %888 = arith.maximumf %886, %887 : vector<16x128xf32>
    %889 = vector.broadcast %158 : f32 to vector<16x128xf32>
    %890 = arith.mulf %888, %889 : vector<16x128xf32>
    %891 = arith.addf %840, %890 : vector<16x128xf32>
    %892 = vector.broadcast %174 : f32 to vector<16x128xf32>
    %893 = arith.mulf %888, %892 : vector<16x128xf32>
    %894 = arith.addf %843, %893 : vector<16x128xf32>
    %895 = vector.broadcast %190 : f32 to vector<16x128xf32>
    %896 = arith.mulf %888, %895 : vector<16x128xf32>
    %897 = arith.addf %846, %896 : vector<16x128xf32>
    %898 = vector.broadcast %206 : f32 to vector<16x128xf32>
    %899 = arith.mulf %888, %898 : vector<16x128xf32>
    %900 = arith.addf %849, %899 : vector<16x128xf32>
    %901 = vector.broadcast %222 : f32 to vector<16x128xf32>
    %902 = arith.mulf %888, %901 : vector<16x128xf32>
    %903 = arith.addf %852, %902 : vector<16x128xf32>
    %904 = vector.broadcast %238 : f32 to vector<16x128xf32>
    %905 = arith.mulf %888, %904 : vector<16x128xf32>
    %906 = arith.addf %855, %905 : vector<16x128xf32>
    %907 = vector.broadcast %254 : f32 to vector<16x128xf32>
    %908 = arith.mulf %888, %907 : vector<16x128xf32>
    %909 = arith.addf %858, %908 : vector<16x128xf32>
    %910 = vector.broadcast %270 : f32 to vector<16x128xf32>
    %911 = arith.mulf %888, %910 : vector<16x128xf32>
    %912 = arith.addf %861, %911 : vector<16x128xf32>
    %913 = vector.broadcast %99 : f32 to vector<16x128xf32>
    %914 = arith.mulf %294, %913 : vector<16x128xf32>
    %915 = vector.broadcast %100 : f32 to vector<16x128xf32>
    %916 = arith.mulf %296, %915 : vector<16x128xf32>
    %917 = arith.addf %914, %916 : vector<16x128xf32>
    %918 = vector.broadcast %101 : f32 to vector<16x128xf32>
    %919 = arith.mulf %298, %918 : vector<16x128xf32>
    %920 = arith.addf %917, %919 : vector<16x128xf32>
    %921 = vector.broadcast %102 : f32 to vector<16x128xf32>
    %922 = arith.mulf %300, %921 : vector<16x128xf32>
    %923 = arith.addf %920, %922 : vector<16x128xf32>
    %924 = vector.broadcast %103 : f32 to vector<16x128xf32>
    %925 = arith.mulf %302, %924 : vector<16x128xf32>
    %926 = arith.addf %923, %925 : vector<16x128xf32>
    %927 = vector.broadcast %104 : f32 to vector<16x128xf32>
    %928 = arith.mulf %304, %927 : vector<16x128xf32>
    %929 = arith.addf %926, %928 : vector<16x128xf32>
    %930 = vector.broadcast %105 : f32 to vector<16x128xf32>
    %931 = arith.mulf %306, %930 : vector<16x128xf32>
    %932 = arith.addf %929, %931 : vector<16x128xf32>
    %933 = vector.broadcast %106 : f32 to vector<16x128xf32>
    %934 = arith.mulf %308, %933 : vector<16x128xf32>
    %935 = arith.addf %932, %934 : vector<16x128xf32>
    %936 = vector.broadcast %143 : f32 to vector<16x128xf32>
    %937 = arith.addf %935, %936 : vector<16x128xf32>
    %cst_560 = arith.constant 0.000000e+00 : f32
    %938 = vector.broadcast %cst_560 : f32 to vector<16x128xf32>
    %939 = arith.maximumf %937, %938 : vector<16x128xf32>
    %940 = vector.broadcast %159 : f32 to vector<16x128xf32>
    %941 = arith.mulf %939, %940 : vector<16x128xf32>
    %942 = arith.addf %891, %941 : vector<16x128xf32>
    %943 = vector.broadcast %175 : f32 to vector<16x128xf32>
    %944 = arith.mulf %939, %943 : vector<16x128xf32>
    %945 = arith.addf %894, %944 : vector<16x128xf32>
    %946 = vector.broadcast %191 : f32 to vector<16x128xf32>
    %947 = arith.mulf %939, %946 : vector<16x128xf32>
    %948 = arith.addf %897, %947 : vector<16x128xf32>
    %949 = vector.broadcast %207 : f32 to vector<16x128xf32>
    %950 = arith.mulf %939, %949 : vector<16x128xf32>
    %951 = arith.addf %900, %950 : vector<16x128xf32>
    %952 = vector.broadcast %223 : f32 to vector<16x128xf32>
    %953 = arith.mulf %939, %952 : vector<16x128xf32>
    %954 = arith.addf %903, %953 : vector<16x128xf32>
    %955 = vector.broadcast %239 : f32 to vector<16x128xf32>
    %956 = arith.mulf %939, %955 : vector<16x128xf32>
    %957 = arith.addf %906, %956 : vector<16x128xf32>
    %958 = vector.broadcast %255 : f32 to vector<16x128xf32>
    %959 = arith.mulf %939, %958 : vector<16x128xf32>
    %960 = arith.addf %909, %959 : vector<16x128xf32>
    %961 = vector.broadcast %271 : f32 to vector<16x128xf32>
    %962 = arith.mulf %939, %961 : vector<16x128xf32>
    %963 = arith.addf %912, %962 : vector<16x128xf32>
    %964 = vector.broadcast %107 : f32 to vector<16x128xf32>
    %965 = arith.mulf %294, %964 : vector<16x128xf32>
    %966 = vector.broadcast %108 : f32 to vector<16x128xf32>
    %967 = arith.mulf %296, %966 : vector<16x128xf32>
    %968 = arith.addf %965, %967 : vector<16x128xf32>
    %969 = vector.broadcast %109 : f32 to vector<16x128xf32>
    %970 = arith.mulf %298, %969 : vector<16x128xf32>
    %971 = arith.addf %968, %970 : vector<16x128xf32>
    %972 = vector.broadcast %110 : f32 to vector<16x128xf32>
    %973 = arith.mulf %300, %972 : vector<16x128xf32>
    %974 = arith.addf %971, %973 : vector<16x128xf32>
    %975 = vector.broadcast %111 : f32 to vector<16x128xf32>
    %976 = arith.mulf %302, %975 : vector<16x128xf32>
    %977 = arith.addf %974, %976 : vector<16x128xf32>
    %978 = vector.broadcast %112 : f32 to vector<16x128xf32>
    %979 = arith.mulf %304, %978 : vector<16x128xf32>
    %980 = arith.addf %977, %979 : vector<16x128xf32>
    %981 = vector.broadcast %113 : f32 to vector<16x128xf32>
    %982 = arith.mulf %306, %981 : vector<16x128xf32>
    %983 = arith.addf %980, %982 : vector<16x128xf32>
    %984 = vector.broadcast %114 : f32 to vector<16x128xf32>
    %985 = arith.mulf %308, %984 : vector<16x128xf32>
    %986 = arith.addf %983, %985 : vector<16x128xf32>
    %987 = vector.broadcast %144 : f32 to vector<16x128xf32>
    %988 = arith.addf %986, %987 : vector<16x128xf32>
    %cst_561 = arith.constant 0.000000e+00 : f32
    %989 = vector.broadcast %cst_561 : f32 to vector<16x128xf32>
    %990 = arith.maximumf %988, %989 : vector<16x128xf32>
    %991 = vector.broadcast %160 : f32 to vector<16x128xf32>
    %992 = arith.mulf %990, %991 : vector<16x128xf32>
    %993 = arith.addf %942, %992 : vector<16x128xf32>
    %994 = vector.broadcast %176 : f32 to vector<16x128xf32>
    %995 = arith.mulf %990, %994 : vector<16x128xf32>
    %996 = arith.addf %945, %995 : vector<16x128xf32>
    %997 = vector.broadcast %192 : f32 to vector<16x128xf32>
    %998 = arith.mulf %990, %997 : vector<16x128xf32>
    %999 = arith.addf %948, %998 : vector<16x128xf32>
    %1000 = vector.broadcast %208 : f32 to vector<16x128xf32>
    %1001 = arith.mulf %990, %1000 : vector<16x128xf32>
    %1002 = arith.addf %951, %1001 : vector<16x128xf32>
    %1003 = vector.broadcast %224 : f32 to vector<16x128xf32>
    %1004 = arith.mulf %990, %1003 : vector<16x128xf32>
    %1005 = arith.addf %954, %1004 : vector<16x128xf32>
    %1006 = vector.broadcast %240 : f32 to vector<16x128xf32>
    %1007 = arith.mulf %990, %1006 : vector<16x128xf32>
    %1008 = arith.addf %957, %1007 : vector<16x128xf32>
    %1009 = vector.broadcast %256 : f32 to vector<16x128xf32>
    %1010 = arith.mulf %990, %1009 : vector<16x128xf32>
    %1011 = arith.addf %960, %1010 : vector<16x128xf32>
    %1012 = vector.broadcast %272 : f32 to vector<16x128xf32>
    %1013 = arith.mulf %990, %1012 : vector<16x128xf32>
    %1014 = arith.addf %963, %1013 : vector<16x128xf32>
    %1015 = vector.broadcast %115 : f32 to vector<16x128xf32>
    %1016 = arith.mulf %294, %1015 : vector<16x128xf32>
    %1017 = vector.broadcast %116 : f32 to vector<16x128xf32>
    %1018 = arith.mulf %296, %1017 : vector<16x128xf32>
    %1019 = arith.addf %1016, %1018 : vector<16x128xf32>
    %1020 = vector.broadcast %117 : f32 to vector<16x128xf32>
    %1021 = arith.mulf %298, %1020 : vector<16x128xf32>
    %1022 = arith.addf %1019, %1021 : vector<16x128xf32>
    %1023 = vector.broadcast %118 : f32 to vector<16x128xf32>
    %1024 = arith.mulf %300, %1023 : vector<16x128xf32>
    %1025 = arith.addf %1022, %1024 : vector<16x128xf32>
    %1026 = vector.broadcast %119 : f32 to vector<16x128xf32>
    %1027 = arith.mulf %302, %1026 : vector<16x128xf32>
    %1028 = arith.addf %1025, %1027 : vector<16x128xf32>
    %1029 = vector.broadcast %120 : f32 to vector<16x128xf32>
    %1030 = arith.mulf %304, %1029 : vector<16x128xf32>
    %1031 = arith.addf %1028, %1030 : vector<16x128xf32>
    %1032 = vector.broadcast %121 : f32 to vector<16x128xf32>
    %1033 = arith.mulf %306, %1032 : vector<16x128xf32>
    %1034 = arith.addf %1031, %1033 : vector<16x128xf32>
    %1035 = vector.broadcast %122 : f32 to vector<16x128xf32>
    %1036 = arith.mulf %308, %1035 : vector<16x128xf32>
    %1037 = arith.addf %1034, %1036 : vector<16x128xf32>
    %1038 = vector.broadcast %145 : f32 to vector<16x128xf32>
    %1039 = arith.addf %1037, %1038 : vector<16x128xf32>
    %cst_562 = arith.constant 0.000000e+00 : f32
    %1040 = vector.broadcast %cst_562 : f32 to vector<16x128xf32>
    %1041 = arith.maximumf %1039, %1040 : vector<16x128xf32>
    %1042 = vector.broadcast %161 : f32 to vector<16x128xf32>
    %1043 = arith.mulf %1041, %1042 : vector<16x128xf32>
    %1044 = arith.addf %993, %1043 : vector<16x128xf32>
    %1045 = vector.broadcast %177 : f32 to vector<16x128xf32>
    %1046 = arith.mulf %1041, %1045 : vector<16x128xf32>
    %1047 = arith.addf %996, %1046 : vector<16x128xf32>
    %1048 = vector.broadcast %193 : f32 to vector<16x128xf32>
    %1049 = arith.mulf %1041, %1048 : vector<16x128xf32>
    %1050 = arith.addf %999, %1049 : vector<16x128xf32>
    %1051 = vector.broadcast %209 : f32 to vector<16x128xf32>
    %1052 = arith.mulf %1041, %1051 : vector<16x128xf32>
    %1053 = arith.addf %1002, %1052 : vector<16x128xf32>
    %1054 = vector.broadcast %225 : f32 to vector<16x128xf32>
    %1055 = arith.mulf %1041, %1054 : vector<16x128xf32>
    %1056 = arith.addf %1005, %1055 : vector<16x128xf32>
    %1057 = vector.broadcast %241 : f32 to vector<16x128xf32>
    %1058 = arith.mulf %1041, %1057 : vector<16x128xf32>
    %1059 = arith.addf %1008, %1058 : vector<16x128xf32>
    %1060 = vector.broadcast %257 : f32 to vector<16x128xf32>
    %1061 = arith.mulf %1041, %1060 : vector<16x128xf32>
    %1062 = arith.addf %1011, %1061 : vector<16x128xf32>
    %1063 = vector.broadcast %273 : f32 to vector<16x128xf32>
    %1064 = arith.mulf %1041, %1063 : vector<16x128xf32>
    %1065 = arith.addf %1014, %1064 : vector<16x128xf32>
    %1066 = vector.broadcast %123 : f32 to vector<16x128xf32>
    %1067 = arith.mulf %294, %1066 : vector<16x128xf32>
    %1068 = vector.broadcast %124 : f32 to vector<16x128xf32>
    %1069 = arith.mulf %296, %1068 : vector<16x128xf32>
    %1070 = arith.addf %1067, %1069 : vector<16x128xf32>
    %1071 = vector.broadcast %125 : f32 to vector<16x128xf32>
    %1072 = arith.mulf %298, %1071 : vector<16x128xf32>
    %1073 = arith.addf %1070, %1072 : vector<16x128xf32>
    %1074 = vector.broadcast %126 : f32 to vector<16x128xf32>
    %1075 = arith.mulf %300, %1074 : vector<16x128xf32>
    %1076 = arith.addf %1073, %1075 : vector<16x128xf32>
    %1077 = vector.broadcast %127 : f32 to vector<16x128xf32>
    %1078 = arith.mulf %302, %1077 : vector<16x128xf32>
    %1079 = arith.addf %1076, %1078 : vector<16x128xf32>
    %1080 = vector.broadcast %128 : f32 to vector<16x128xf32>
    %1081 = arith.mulf %304, %1080 : vector<16x128xf32>
    %1082 = arith.addf %1079, %1081 : vector<16x128xf32>
    %1083 = vector.broadcast %129 : f32 to vector<16x128xf32>
    %1084 = arith.mulf %306, %1083 : vector<16x128xf32>
    %1085 = arith.addf %1082, %1084 : vector<16x128xf32>
    %1086 = vector.broadcast %130 : f32 to vector<16x128xf32>
    %1087 = arith.mulf %308, %1086 : vector<16x128xf32>
    %1088 = arith.addf %1085, %1087 : vector<16x128xf32>
    %1089 = vector.broadcast %146 : f32 to vector<16x128xf32>
    %1090 = arith.addf %1088, %1089 : vector<16x128xf32>
    %cst_563 = arith.constant 0.000000e+00 : f32
    %1091 = vector.broadcast %cst_563 : f32 to vector<16x128xf32>
    %1092 = arith.maximumf %1090, %1091 : vector<16x128xf32>
    %1093 = vector.broadcast %162 : f32 to vector<16x128xf32>
    %1094 = arith.mulf %1092, %1093 : vector<16x128xf32>
    %1095 = arith.addf %1044, %1094 : vector<16x128xf32>
    %1096 = vector.broadcast %178 : f32 to vector<16x128xf32>
    %1097 = arith.mulf %1092, %1096 : vector<16x128xf32>
    %1098 = arith.addf %1047, %1097 : vector<16x128xf32>
    %1099 = vector.broadcast %194 : f32 to vector<16x128xf32>
    %1100 = arith.mulf %1092, %1099 : vector<16x128xf32>
    %1101 = arith.addf %1050, %1100 : vector<16x128xf32>
    %1102 = vector.broadcast %210 : f32 to vector<16x128xf32>
    %1103 = arith.mulf %1092, %1102 : vector<16x128xf32>
    %1104 = arith.addf %1053, %1103 : vector<16x128xf32>
    %1105 = vector.broadcast %226 : f32 to vector<16x128xf32>
    %1106 = arith.mulf %1092, %1105 : vector<16x128xf32>
    %1107 = arith.addf %1056, %1106 : vector<16x128xf32>
    %1108 = vector.broadcast %242 : f32 to vector<16x128xf32>
    %1109 = arith.mulf %1092, %1108 : vector<16x128xf32>
    %1110 = arith.addf %1059, %1109 : vector<16x128xf32>
    %1111 = vector.broadcast %258 : f32 to vector<16x128xf32>
    %1112 = arith.mulf %1092, %1111 : vector<16x128xf32>
    %1113 = arith.addf %1062, %1112 : vector<16x128xf32>
    %1114 = vector.broadcast %274 : f32 to vector<16x128xf32>
    %1115 = arith.mulf %1092, %1114 : vector<16x128xf32>
    %1116 = arith.addf %1065, %1115 : vector<16x128xf32>
    %1117 = vector.broadcast %275 : f32 to vector<16x128xf32>
    %1118 = arith.addf %1095, %1117 : vector<16x128xf32>
    %cst_564 = arith.constant 0.000000e+00 : f32
    %1119 = vector.broadcast %cst_564 : f32 to vector<16x128xf32>
    %1120 = arith.maximumf %1118, %1119 : vector<16x128xf32>
    %1121 = vector.broadcast %283 : f32 to vector<16x128xf32>
    %1122 = arith.mulf %1120, %1121 : vector<16x128xf32>
    %1123 = vector.broadcast %291 : f32 to vector<16x128xf32>
    %1124 = arith.addf %1122, %1123 : vector<16x128xf32>
    %1125 = vector.broadcast %276 : f32 to vector<16x128xf32>
    %1126 = arith.addf %1098, %1125 : vector<16x128xf32>
    %cst_565 = arith.constant 0.000000e+00 : f32
    %1127 = vector.broadcast %cst_565 : f32 to vector<16x128xf32>
    %1128 = arith.maximumf %1126, %1127 : vector<16x128xf32>
    %1129 = vector.broadcast %284 : f32 to vector<16x128xf32>
    %1130 = arith.mulf %1128, %1129 : vector<16x128xf32>
    %1131 = arith.addf %1124, %1130 : vector<16x128xf32>
    %1132 = vector.broadcast %277 : f32 to vector<16x128xf32>
    %1133 = arith.addf %1101, %1132 : vector<16x128xf32>
    %cst_566 = arith.constant 0.000000e+00 : f32
    %1134 = vector.broadcast %cst_566 : f32 to vector<16x128xf32>
    %1135 = arith.maximumf %1133, %1134 : vector<16x128xf32>
    %1136 = vector.broadcast %285 : f32 to vector<16x128xf32>
    %1137 = arith.mulf %1135, %1136 : vector<16x128xf32>
    %1138 = arith.addf %1131, %1137 : vector<16x128xf32>
    %1139 = vector.broadcast %278 : f32 to vector<16x128xf32>
    %1140 = arith.addf %1104, %1139 : vector<16x128xf32>
    %cst_567 = arith.constant 0.000000e+00 : f32
    %1141 = vector.broadcast %cst_567 : f32 to vector<16x128xf32>
    %1142 = arith.maximumf %1140, %1141 : vector<16x128xf32>
    %1143 = vector.broadcast %286 : f32 to vector<16x128xf32>
    %1144 = arith.mulf %1142, %1143 : vector<16x128xf32>
    %1145 = arith.addf %1138, %1144 : vector<16x128xf32>
    %1146 = vector.broadcast %279 : f32 to vector<16x128xf32>
    %1147 = arith.addf %1107, %1146 : vector<16x128xf32>
    %cst_568 = arith.constant 0.000000e+00 : f32
    %1148 = vector.broadcast %cst_568 : f32 to vector<16x128xf32>
    %1149 = arith.maximumf %1147, %1148 : vector<16x128xf32>
    %1150 = vector.broadcast %287 : f32 to vector<16x128xf32>
    %1151 = arith.mulf %1149, %1150 : vector<16x128xf32>
    %1152 = arith.addf %1145, %1151 : vector<16x128xf32>
    %1153 = vector.broadcast %280 : f32 to vector<16x128xf32>
    %1154 = arith.addf %1110, %1153 : vector<16x128xf32>
    %cst_569 = arith.constant 0.000000e+00 : f32
    %1155 = vector.broadcast %cst_569 : f32 to vector<16x128xf32>
    %1156 = arith.maximumf %1154, %1155 : vector<16x128xf32>
    %1157 = vector.broadcast %288 : f32 to vector<16x128xf32>
    %1158 = arith.mulf %1156, %1157 : vector<16x128xf32>
    %1159 = arith.addf %1152, %1158 : vector<16x128xf32>
    %1160 = vector.broadcast %281 : f32 to vector<16x128xf32>
    %1161 = arith.addf %1113, %1160 : vector<16x128xf32>
    %cst_570 = arith.constant 0.000000e+00 : f32
    %1162 = vector.broadcast %cst_570 : f32 to vector<16x128xf32>
    %1163 = arith.maximumf %1161, %1162 : vector<16x128xf32>
    %1164 = vector.broadcast %289 : f32 to vector<16x128xf32>
    %1165 = arith.mulf %1163, %1164 : vector<16x128xf32>
    %1166 = arith.addf %1159, %1165 : vector<16x128xf32>
    %1167 = vector.broadcast %282 : f32 to vector<16x128xf32>
    %1168 = arith.addf %1116, %1167 : vector<16x128xf32>
    %cst_571 = arith.constant 0.000000e+00 : f32
    %1169 = vector.broadcast %cst_571 : f32 to vector<16x128xf32>
    %1170 = arith.maximumf %1168, %1169 : vector<16x128xf32>
    %1171 = vector.broadcast %290 : f32 to vector<16x128xf32>
    %1172 = arith.mulf %1170, %1171 : vector<16x128xf32>
    %1173 = arith.addf %1166, %1172 : vector<16x128xf32>
    %c0_572 = arith.constant 0 : index
    %c0_573 = arith.constant 0 : index
    %1174 = vector.load %arg11[%c0_572, %c0_573] : memref<16x128xf32, #tpu.memory_space<vmem>>, vector<16x128xf32>
    tpu.vector_store %arg11[%c0_572, %c0_573], %1173 {strides = array<i32>} : memref<16x128xf32, #tpu.memory_space<vmem>>, vector<16x128xf32>,
    return
  }
  func.func @transform_0(%arg0: i32, %arg1: i32) -> (i32, i32) {
    %c0_i32 = arith.constant 0 : i32
    %c0_i32_0 = arith.constant 0 : i32
    return %arg1, %c0_i32 : i32, i32
  }
  func.func @transform_1(%arg0: i32, %arg1: i32) -> (i32, i32) {
    %c0_i32 = arith.constant 0 : i32
    %c0_i32_0 = arith.constant 0 : i32
    return %c0_i32, %arg0 : i32, i32
  }
  func.func @transform_2(%arg0: i32, %arg1: i32) -> (i32, i32) {
    %c0_i32 = arith.constant 0 : i32
    %c0_i32_0 = arith.constant 0 : i32
    %c0_i32_1 = arith.constant 0 : i32
    return %c0_i32, %c0_i32_0 : i32, i32
  }
  func.func @transform_3(%arg0: i32, %arg1: i32) -> (i32, i32) {
    %c0_i32 = arith.constant 0 : i32
    %c0_i32_0 = arith.constant 0 : i32
    %c0_i32_1 = arith.constant 0 : i32
    return %c0_i32, %c0_i32_0 : i32, i32
  }
  func.func @transform_4(%arg0: i32, %arg1: i32) -> i32 {
    %c0_i32 = arith.constant 0 : i32
    %c0_i32_0 = arith.constant 0 : i32
    return %c0_i32 : i32
  }
  func.func @transform_5(%arg0: i32, %arg1: i32) -> (i32, i32) {
    %c0_i32 = arith.constant 0 : i32
    %c0_i32_0 = arith.constant 0 : i32
    %c0_i32_1 = arith.constant 0 : i32
    return %c0_i32, %c0_i32_0 : i32, i32
  }
  func.func @transform_6(%arg0: i32, %arg1: i32) -> i32 {
    %c0_i32 = arith.constant 0 : i32
    %c0_i32_0 = arith.constant 0 : i32
    return %c0_i32 : i32
  }
  func.func @transform_7(%arg0: i32, %arg1: i32) -> i32 {
    %c0_i32 = arith.constant 0 : i32
    %c0_i32_0 = arith.constant 0 : i32
    return %c0_i32 : i32
  }
  func.func @transform_8(%arg0: i32, %arg1: i32) -> i32 {
    %c0_i32 = arith.constant 0 : i32
    %c0_i32_0 = arith.constant 0 : i32
    return %c0_i32 : i32
  }
  func.func @transform_9(%arg0: i32, %arg1: i32) -> (i32, i32) {
    %c0_i32 = arith.constant 0 : i32
    return %arg1, %arg0 : i32, i32
  }
}

</mosaic_0001>

<bundles_post_ra>
// kernel: tpu_custom_call.1
= control target key start
LH: loop header
LB: loop body
LE: loop exit
PB: predicated region body
PF: predicated region fallthrough
CT: control target
= control target key end

     0   :  { %s6022_s0 = inlined_call_operand.vmem [shape: f32[16,32], index: 0, kind: input, shape index: {}]   ;;  %s6023_s1 = inlined_call_operand.vmem [shape: f32[32,128], index: 1, kind: input, shape index: {}]   ;;  %s6024_s2 = inlined_call_operand.vmem [shape: f32[256,32], index: 2, kind: input, shape index: {}]   ;;  %s6025_s3 = inlined_call_operand.vmem [shape: f32[16,8], index: 3, kind: input, shape index: {}]   ;;  %s6026_s4 = inlined_call_operand.vmem [shape: f32[16], index: 4, kind: input, shape index: {}]   ;;  %s6027_s5 = inlined_call_operand.vmem [shape: f32[8,16], index: 5, kind: input, shape index: {}]   ;;  %s6028_s6 = inlined_call_operand.vmem [shape: f32[8], index: 6, kind: input, shape index: {}]   ;;  %s6029_s7 = inlined_call_operand.vmem [shape: f32[8], index: 7, kind: input, shape index: {}]   ;;  %s6030_s8 = inlined_call_operand.<no memory space> [shape: f32[1], index: 8, kind: input, shape index: {}]   ;;  %s6031_s9 = inlined_call_operand.hbm [shape: f32[16,128], index: 9, kind: output, shape index: {}]  }
   0x1   :  { %6157 = sst [smem:[#allocation90_spill]] %s6030_s8 }
   0x2   :  { %6158 = sst [smem:[#allocation91_spill]] %s6031_s9 }
   0x3   :  { %15 = vsyncpa [#allocation6], 0 }
   0x4   :  { %16 = vsyncpa [#allocation8], 0 }
   0x5   :  { %17 = vsyncpa [#allocation11], 0  ;;  %s43_s11 = sshll.u32 %s6026_s4, 4  ;;  %s44_s11 = int_to_ptr.vmem [resolvable:$true] %s43_s11 }
   0x6   :  { %18 = vsyncpa [#allocation5], 0  ;;  %s63_s14 = sshll.u32 %s6028_s6, 4  ;;  %s3400_s15 = scalar_lea.vmem %s44_s11, 16  ;;  %s64_s14 = int_to_ptr.vmem [resolvable:$true] %s63_s14 }
   0x7   :  { %p3401_p0 = scmp.ne.s32.totalorder %s44_s11, %s3400_s15  ;;  %p3405_p1 = scmp.lt.s32.totalorder %s44_s11, %s44_s11 }
   0x8   :  { %p3406_p2 = scmp.lt.s32.totalorder %s3400_s15, %s3400_s15 }
   0xa   :  { %p3407_p3 = por %p3406_p2, %p3405_p1 }
   0xc   :  { %p3408_p4 = pnand %p3407_p3, %p3401_p0 }
   0xe   :  { %3411 = shalt.err (!%p3408_p4)
}
   0xf   :  { %s3488_s16 = smov [#allocation7]   ;;  %s3412_s17 = scalar_lea.vmem %s64_s14, 16 }
  0x10   :  { %46 = dma.vmem_to_smem %s44_s11, 16, %s3488_s16, [#allocation8]  }
  0x11   :  { %p3413_p5 = scmp.ne.s32.totalorder %s64_s14, %s3412_s17  ;;  %p3417_p6 = scmp.lt.s32.totalorder %s64_s14, %s64_s14 }
  0x12   :  { %p3418_p7 = scmp.lt.s32.totalorder %s3412_s17, %s3412_s17 }
  0x14   :  { %p3419_p8 = por %p3418_p7, %p3417_p6 }
  0x16   :  { %p3420_p9 = pnand %p3419_p8, %p3413_p5 }
  0x18   :  { %3423 = shalt.err (!%p3420_p9)
}
  0x19   :  { %s3489_s4 = smov [#allocation10]   ;;  %s30_s19 = sshll.u32 %s6025_s3, 4  ;;  %s31_s19 = int_to_ptr.vmem [resolvable:$true] %s30_s19 }
  0x1a   :  { %66 = dma.vmem_to_smem %s64_s14, 16, %s3489_s4, [#allocation11]  }
  0x1b   :  { %s53_s22 = sshll.u32 %s6027_s5, 4  ;;  %s3424_s23 = scalar_lea.vmem %s31_s19, 256  ;;  %s54_s22 = int_to_ptr.vmem [resolvable:$true] %s53_s22 }
  0x1c   :  { %p3425_p10 = scmp.ne.s32.totalorder %s31_s19, %s3424_s23  ;;  %p3429_p11 = scmp.lt.s32.totalorder %s31_s19, %s31_s19 }
  0x1d   :  { %p3430_p12 = scmp.lt.s32.totalorder %s3424_s23, %s3424_s23 }
  0x1f   :  { %p3431_p13 = por %p3430_p12, %p3429_p11 }
  0x21   :  { %p3432_p0 = pnand %p3431_p13, %p3425_p10 }
  0x23   :  { %3435 = shalt.err (!%p3432_p0)
}
  0x24   :  { %s3490_s24 = smov [#allocation4]   ;;  %s6032_s25 = smov 128  }
  0x25   :  { %s6033_s26 = smov 8   ;;  %s3436_s3 = scalar_lea.vmem %s54_s22, 128 }
  0x26   :  { %36 = dma.vmem_to_smem %s31_s19, 256, %s3490_s24, [#allocation6], %s6032_s25, %s6032_s25, %s6033_s26  }
  0x27   :  { %p3437_p1 = scmp.ne.s32.totalorder %s54_s22, %s3436_s3  ;;  %p3441_p2 = scmp.lt.s32.totalorder %s54_s22, %s54_s22 }
  0x28   :  { %p3442_p3 = scmp.lt.s32.totalorder %s3436_s3, %s3436_s3 }
  0x2a   :  { %p3443_p4 = por %p3442_p3, %p3441_p2 }
  0x2c   :  { %p3444_p5 = pnand %p3443_p4, %p3437_p1 }
  0x2e   :  { %3447 = shalt.err (!%p3444_p5)
}
  0x2f   :  { %s3493_s5 = smov [#allocation9]   ;;  %s73_s29 = sshll.u32 %s6029_s7, 4  ;;  %s74_s29 = int_to_ptr.vmem [resolvable:$true] %s73_s29 }
  0x30   :  { %56 = dma.vmem_to_smem %s54_s22, 128, %s3493_s5, [#allocation8]  }
  0x31   :  { %s3448_s30 = scalar_lea.vmem %s74_s29, 16  ;;  %p3453_p7 = scmp.lt.s32.totalorder %s74_s29, %s74_s29 }
  0x32   :  { %p3449_p6 = scmp.ne.s32.totalorder %s74_s29, %s3448_s30  ;;  %p3454_p8 = scmp.lt.s32.totalorder %s3448_s30, %s3448_s30 }
  0x34   :  { %p3455_p9 = por %p3454_p8, %p3453_p7 }
  0x36   :  { %p3456_p10 = pnand %p3455_p9, %p3449_p6 }
  0x38   :  { %3459 = shalt.err (!%p3456_p10)
}
  0x39   :  { %s3494_s10 = smov [#allocation12]  }
  0x3a   :  { %76 = dma.vmem_to_smem %s74_s29, 16, %s3494_s10, [#allocation11]  }
  0x3b   :  { %3480 = dma.done.wait [#allocation6], 256  }
  0x3c   :  { %3481 = vsyncadd [#allocation6], 4294967040 }
  0x3d   :  { %3482 = dma.done.wait [#allocation8], 144  }
  0x3e   :  { %3483 = vsyncadd [#allocation8], 4294967152 }
  0x3f   :  { %3484 = dma.done.wait [#allocation11], 32  }
  0x40   :  { %3485 = vsyncadd [#allocation11], 4294967264 }
  0x41   :  { %94 = sfence }
  0x42   :  { %v134_v0 = vld [vmem:[%s6023_s1 + $0x18] sm:$0xff]  ;;  %v133_v1 = vld [vmem:[%s6023_s1 + $0x10] sm:$0xff]  ;;  %vm135_vm0 = vcmask 261120   ;;  %v99_v2 = vld [vmem:[%s6024_s2] sm:$0xff]  ;;  %s3748_s11 = sld [smem:[#allocation4 + $0x80]] }
  0x43   :  { %3248 = vmatprep.subr.mxu0 %v134_v0  ;;  %v132_v3 = vld [vmem:[%s6023_s1 + $0x8] sm:$0xff]  ;;  %3256 = vmatprep.mubr.msk.f32.mxu0 %vm135_vm0, %v99_v2  ;;  %v131_v4 = vld [vmem:[%s6023_s1] sm:$0xff]  ;;  %v101_v6 = vld [vmem:[%s6024_s2 + $0x10] sm:$0xff]  ;;  %s3750_s12 = sld [smem:[#allocation4 + $0x100]] }
  0x44   :  { %3249 = vmatpush3.msra.mxu0 %v134_v0  ;;  %v100_v5 = vld [vmem:[%s6024_s2 + $0x8] sm:$0xff]  ;;  %v102_v7 = vld [vmem:[%s6024_s2 + $0x18] sm:$0xff]  ;;  %v103_v8 = vld [vmem:[%s6024_s2 + $0x20] sm:$0xff]  ;;  %s3752_s7 = sld [smem:[#allocation4 + $0x180]] }
  0x45   :  { %3250 = vmatprep.subr.mxu0 %v133_v1  ;;  %v104_v9 = vld [vmem:[%s6024_s2 + $0x28] sm:$0xff]  ;;  %v105_v10 = vld [vmem:[%s6024_s2 + $0x30] sm:$0xff]  ;;  %v106_v11 = vld [vmem:[%s6024_s2 + $0x38] sm:$0xff]  ;;  %s3754_s13 = sld [smem:[#allocation4 + $0x200]] }
  0x46   :  { %3251 = vmatpush3.msra.mxu0 %v133_v1  ;;  %v107_v12 = vld [vmem:[%s6024_s2 + $0x40] sm:$0xff]  ;;  %v108_v13 = vld [vmem:[%s6024_s2 + $0x48] sm:$0xff]  ;;  %v109_v14 = vld [vmem:[%s6024_s2 + $0x50] sm:$0xff]  ;;  %s3756_s14 = sld [smem:[#allocation4 + $0x280]] }
  0x47   :  { %3252 = vmatprep.subr.mxu0 %v132_v3  ;;  %v110_v15 = vld [vmem:[%s6024_s2 + $0x58] sm:$0xff]  ;;  %v111_v16 = vld [vmem:[%s6024_s2 + $0x60] sm:$0xff]  ;;  %v112_v17 = vld [vmem:[%s6024_s2 + $0x68] sm:$0xff]  ;;  %s3758_s15 = sld [smem:[#allocation4 + $0x300]] }
  0x48   :  { %3253 = vmatpush3.msra.mxu0 %v132_v3  ;;  %v113_v18 = vld [vmem:[%s6024_s2 + $0x70] sm:$0xff]  ;;  %v114_v19 = vld [vmem:[%s6024_s2 + $0x78] sm:$0xff]  ;;  %v115_v20 = vld [vmem:[%s6024_s2 + $0x80] sm:$0xff]  ;;  %6160 = sst [smem:[#allocation19_spill]] %s3748_s11 }
  0x49   :  { %3254 = vmatprep.subr.mxu0 %v131_v4  ;;  %v116_v21 = vld [vmem:[%s6024_s2 + $0x88] sm:$0xff]  ;;  %v117_v22 = vld [vmem:[%s6024_s2 + $0x90] sm:$0xff]  ;;  %v118_v23 = vld [vmem:[%s6024_s2 + $0x98] sm:$0xff]  ;;  %6161 = sst [smem:[#allocation20_spill]] %s3750_s12 }
  0x4a   :  { %3255 = vmatpush3.msra.mxu0 %v131_v4  ;;  %v119_v24 = vld [vmem:[%s6024_s2 + $0xa0] sm:$0xff]  ;;  %v120_v25 = vld [vmem:[%s6024_s2 + $0xa8] sm:$0xff]  ;;  %v121_v26 = vld [vmem:[%s6024_s2 + $0xb0] sm:$0xff]  ;;  %6162 = sst [smem:[#allocation21_spill]] %s3752_s7 }
  0x4b   :  { %3257 = vmatmul.mubr.msk.f32.vlgmr.msra.gmra.mxu0 %vm135_vm0, %v100_v5  ;;  %v122_v27 = vld [vmem:[%s6024_s2 + $0xb8] sm:$0xff]  ;;  %v123_v28 = vld [vmem:[%s6024_s2 + $0xc0] sm:$0xff]  ;;  %v124_v29 = vld [vmem:[%s6024_s2 + $0xc8] sm:$0xff]  ;;  %6163 = sst [smem:[#allocation22_spill]] %s3754_s13 }
  0x4c   :  { %3259 = vmatprep.mubr.msk.f32.mxu0 %vm135_vm0, %v101_v6  ;;  %v125_v30 = vld [vmem:[%s6024_s2 + $0xd0] sm:$0xff]  ;;  %v126_v31 = vld [vmem:[%s6024_s2 + $0xd8] sm:$0xff]  ;;  %v127_v32 = vld [vmem:[%s6024_s2 + $0xe0] sm:$0xff]  ;;  %6164 = sst [smem:[#allocation23_spill]] %s3756_s14 }
  0x4d   :  { %v128_v33 = vld [vmem:[%s6024_s2 + $0xe8] sm:$0xff]  ;;  %v129_v34 = vld [vmem:[%s6024_s2 + $0xf0] sm:$0xff]  ;;  %v130_v35 = vld [vmem:[%s6024_s2 + $0xf8] sm:$0xff]  ;;  %6165 = sst [smem:[#allocation24_spill]] %s3758_s15 }
  0x4e   :  { %v3707_v36 = vld [vmem:[%s6022_s0] sm:$0xff]  ;;  %v3714_v43 = vld [vmem:[%s6022_s0 + $0x8] sm:$0xff]  ;;  %s3746_s0 = sld [smem:[#allocation4]] }
  0x4f   :  { %3260 = vmatmul.mubr.msk.f32.gmra.mxu0 %vm135_vm0, %v102_v7  ;;  %3312 = vmatprep.mubr.msk.f32.mxu1 %vm135_vm0, %v3707_v36  ;;  %s3760_s16 = sld [smem:[#allocation4 + $0x380]]  ;;  %v1486_v7 = vstv %s3748_s11 }
  0x50   :  { %3262 = vmatprep.mubr.msk.f32.mxu0 %vm135_vm0, %v103_v8  ;;  %s3762_s17 = sld [smem:[#allocation4 + $0x400]]  ;;  %v1569_v8 = vstv %s3750_s12 }
  0x51   :  { %s3764_s4 = sld [smem:[#allocation4 + $0x1]] }
  0x52   :  { %s3766_s6 = sld [smem:[#allocation4 + $0x81]] }
  0x53   :  { %3263 = vmatmul.mubr.msk.f32.gmra.mxu0 %vm135_vm0, %v104_v9  ;;  %s3768_s18 = sld [smem:[#allocation4 + $0x101]]  ;;  %v1652_v9 = vstv %s3752_s7 }
  0x54   :  { %3265 = vmatprep.mubr.msk.f32.mxu0 %vm135_vm0, %v105_v10  ;;  %6159 = sst [smem:[#allocation18_spill]] %s3746_s0  ;;  %v1419_v6 = vstv %s3746_s0  ;;  %v1735_v10 = vstv %s3754_s13 }
  0x55   :  { %6166 = sst [smem:[#allocation25_spill]] %s3760_s16 }
  0x56   :  { %6167 = sst [smem:[#allocation26_spill]] %s3762_s17 }
  0x57   :  { %3266 = vmatmul.mubr.msk.f32.gmra.mxu0 %vm135_vm0, %v106_v11  ;;  %6168 = sst [smem:[#allocation27_spill]] %s3764_s4  ;;  %v1818_v11 = vstv %s3756_s14 }
  0x58   :  { %3268 = vmatprep.mubr.msk.f32.mxu0 %vm135_vm0, %v107_v12  ;;  %6169 = sst [smem:[#allocation28_spill]] %s3766_s6  ;;  %v1901_v12 = vstv %s3758_s15 }
  0x59   :  { %6170 = sst [smem:[#allocation29_spill]] %s3768_s18 }
  0x5a   :  { %s3770_s19 = sld [smem:[#allocation4 + $0x181]] }
  0x5b   :  { %3269 = vmatmul.mubr.msk.f32.gmra.mxu0 %vm135_vm0, %v108_v13  ;;  %s3772_s20 = sld [smem:[#allocation4 + $0x201]]  ;;  %v1984_v13 = vstv %s3760_s16 }
  0x5c   :  { %3271 = vmatprep.mubr.msk.f32.mxu0 %vm135_vm0, %v109_v14  ;;  %s3774_s21 = sld [smem:[#allocation4 + $0x281]]  ;;  %v2067_v14 = vstv %s3762_s17 }
  0x5d   :  { %s3776_s22 = sld [smem:[#allocation4 + $0x301]] }
  0x5e   :  { %s3778_s23 = sld [smem:[#allocation4 + $0x381]] }
  0x5f   :  { %3272 = vmatmul.mubr.msk.f32.gmra.mxu0 %vm135_vm0, %v110_v15  ;;  %s3780_s1 = sld [smem:[#allocation4 + $0x401]]  ;;  %v1422_v15 = vstv %s3764_s4 }
  0x60   :  { %3274 = vmatprep.mubr.msk.f32.mxu0 %vm135_vm0, %v111_v16  ;;  %6171 = sst [smem:[#allocation30_spill]] %s3770_s19  ;;  %v1489_v16 = vstv %s3766_s6 }
  0x61   :  { %6172 = sst [smem:[#allocation31_spill]] %s3772_s20 }
  0x62   :  { %6173 = sst [smem:[#allocation32_spill]] %s3774_s21 }
  0x63   :  { %3275 = vmatmul.mubr.msk.f32.gmra.mxu0 %vm135_vm0, %v112_v17  ;;  %6174 = sst [smem:[#allocation33_spill]] %s3776_s22  ;;  %v1572_v17 = vstv %s3768_s18 }
  0x64   :  { %3277 = vmatprep.mubr.msk.f32.mxu0 %vm135_vm0, %v113_v18  ;;  %6175 = sst [smem:[#allocation34_spill]] %s3778_s23  ;;  %v1655_v18 = vstv %s3770_s19 }
  0x65   :  { %6176 = sst [smem:[#allocation35_spill]] %s3780_s1 }
  0x66   :  { %s3782_s24 = sld [smem:[#allocation4 + $0x2]] }
  0x67   :  { %3278 = vmatmul.mubr.msk.f32.gmra.mxu0 %vm135_vm0, %v114_v19  ;;  %s3784_s3 = sld [smem:[#allocation4 + $0x82]]  ;;  %v1738_v19 = vstv %s3772_s20 }
  0x68   :  { %3280 = vmatprep.mubr.msk.f32.mxu0 %vm135_vm0, %v115_v20  ;;  %s3786_s5 = sld [smem:[#allocation4 + $0x102]]  ;;  %v1821_v20 = vstv %s3774_s21 }
  0x69   :  { %s3788_s27 = sld [smem:[#allocation4 + $0x182]] }
  0x6a   :  { %s3790_s28 = sld [smem:[#allocation4 + $0x202]] }
  0x6b   :  { %3281 = vmatmul.mubr.msk.f32.gmra.mxu0 %vm135_vm0, %v116_v21  ;;  %s3792_s29 = sld [smem:[#allocation4 + $0x282]]  ;;  %v1904_v21 = vstv %s3776_s22 }
  0x6c   :  { %3283 = vmatprep.mubr.msk.f32.mxu0 %vm135_vm0, %v117_v22  ;;  %6177 = sst [smem:[#allocation36_spill]] %s3782_s24  ;;  %v1987_v22 = vstv %s3778_s23 }
  0x6d   :  { %6178 = sst [smem:[#allocation37_spill]] %s3784_s3 }
  0x6e   :  { %6179 = sst [smem:[#allocation38_spill]] %s3786_s5 }
  0x6f   :  { %3284 = vmatmul.mubr.msk.f32.gmra.mxu0 %vm135_vm0, %v118_v23  ;;  %6180 = sst [smem:[#allocation39_spill]] %s3788_s27  ;;  %v2070_v23 = vstv %s3780_s1 }
  0x70   :  { %3286 = vmatprep.mubr.msk.f32.mxu0 %vm135_vm0, %v119_v24  ;;  %6181 = sst [smem:[#allocation40_spill]] %s3790_s28  ;;  %v1427_v24 = vstv %s3782_s24 }
  0x71   :  { %6182 = sst [smem:[#allocation41_spill]] %s3792_s29 }
  0x72   :  { %s3794_s30 = sld [smem:[#allocation4 + $0x302]] }
  0x73   :  { %3287 = vmatmul.mubr.msk.f32.gmra.mxu0 %vm135_vm0, %v120_v25  ;;  %s3796_s2 = sld [smem:[#allocation4 + $0x382]]  ;;  %v1494_v25 = vstv %s3784_s3 }
  0x74   :  { %3289 = vmatprep.mubr.msk.f32.mxu0 %vm135_vm0, %v121_v26  ;;  %s3798_s10 = sld [smem:[#allocation4 + $0x3]] }
  0x75   :  { %s3800_s25 = sld [smem:[#allocation4 + $0x83]] }
  0x76   :  { %s3802_s26 = sld [smem:[#allocation4 + $0x103]] }
  0x77   :  { %3290 = vmatmul.mubr.msk.f32.gmra.mxu0 %vm135_vm0, %v122_v27  ;;  %s3804_s9 = sld [smem:[#allocation4 + $0x183]] }
  0x78   :  { %3292 = vmatprep.mubr.msk.f32.mxu0 %vm135_vm0, %v123_v28  ;;  %6183 = sst [smem:[#allocation42_spill]] %s3794_s30 }
  0x79   :  { %6184 = sst [smem:[#allocation43_spill]] %s3796_s2 }
  0x7a   :  { %6185 = sst [smem:[#allocation44_spill]] %s3798_s10 }
  0x7b   :  { %3293 = vmatmul.mubr.msk.f32.gmra.mxu0 %vm135_vm0, %v124_v29  ;;  %6186 = sst [smem:[#allocation45_spill]] %s3800_s25 }
  0x7c   :  { %3295 = vmatprep.mubr.msk.f32.mxu0 %vm135_vm0, %v125_v30  ;;  %6187 = sst [smem:[#allocation46_spill]] %s3802_s26 }
  0x7d   :  { %6188 = sst [smem:[#allocation47_spill]] %s3804_s9 }
  0x7e   :  { %s3806_s8 = sld [smem:[#allocation4 + $0x203]] }
  0x7f   :  { %3296 = vmatmul.mubr.msk.f32.gmra.mxu0 %vm135_vm0, %v126_v31  ;;  %s3808_s5 = sld [smem:[#allocation4 + $0x283]] }
  0x80   :  { %3298 = vmatprep.mubr.msk.f32.mxu0 %vm135_vm0, %v127_v32  ;;  %s3810_s27 = sld [smem:[#allocation4 + $0x303]] }
  0x81   :  { %s3812_s28 = sld [smem:[#allocation4 + $0x4]] }
  0x82   :  { %s3814_s29 = sld [smem:[#allocation4 + $0x84]] }
  0x83   :  { %3299 = vmatmul.mubr.msk.f32.gmra.mxu0 %vm135_vm0, %v128_v33  ;;  %s3816_s30 = sld [smem:[#allocation4 + $0x104]] }
  0x84   :  { %3301 = vmatprep.mubr.msk.f32.mxu0 %vm135_vm0, %v129_v34  ;;  %6189 = sst [smem:[#allocation48_spill]] %s3806_s8 }
  0x85   :  { %6190 = sst [smem:[#allocation49_spill]] %s3808_s5 }
  0x86   :  { %s3818_s2 = sld [smem:[#allocation4 + $0x184]] }
  0x87   :  { %3302 = vmatmul.mubr.msk.f32.gmra.mxu0 %vm135_vm0, %v130_v35  ;;  %6191 = sst [smem:[#allocation50_spill]] %s3812_s28  ;;  %v1665_v35 = vstv %s3804_s9 }
  0x88   :  { %6192 = sst [smem:[#allocation51_spill]] %s3814_s29 }
  0x89   :  { %6193 = sst [smem:[#allocation52_spill]] %s3816_s30 }
  0x8a   :  { %s3820_s10 = sld [smem:[#allocation4 + $0x204]] }
  0x8b   :  { %s3822_s25 = sld [smem:[#allocation4 + $0x284]] }
  0x8c   :  { %6194 = sst [smem:[#allocation53_spill]] %s3818_s2 }
  0x8d   :  { %s3824_s26 = sld [smem:[#allocation4 + $0x5]] }
  0x8e   :  { %s3826_s8 = sld [smem:[#allocation4 + $0x85]] }
  0x8f   :  { %s3828_s5 = sld [smem:[#allocation4 + $0x105]] }
  0x90   :  { %6195 = sst [smem:[#allocation54_spill]] %s3820_s10 }
  0x91   :  { %6196 = sst [smem:[#allocation55_spill]] %s3822_s25 }
  0x92   :  { %s3830_s28 = sld [smem:[#allocation4 + $0x185]] }
  0x93   :  { %6197 = sst [smem:[#allocation56_spill]] %s3824_s26 }
  0x94   :  { %6198 = sst [smem:[#allocation57_spill]] %s3826_s8 }
  0x95   :  { %6199 = sst [smem:[#allocation58_spill]] %s3828_s5 }
  0x96   :  { %s3832_s29 = sld [smem:[#allocation4 + $0x205]] }
  0x97   :  { %s3834_s30 = sld [smem:[#allocation4 + $0x285]] }
  0x98   :  { %6200 = sst [smem:[#allocation59_spill]] %s3830_s28 }
  0x99   :  { %s3836_s10 = sld [smem:[#allocation4 + $0x304]] }
  0x9a   :  { %s3838_s25 = sld [smem:[#allocation4 + $0x305]] }
  0x9b   :  { %s3840_s26 = sld [smem:[#allocation4 + $0x6]] }
  0x9c   :  { %6201 = sst [smem:[#allocation60_spill]] %s3832_s29 }
  0x9d   :  { %6202 = sst [smem:[#allocation61_spill]] %s3834_s30 }
  0x9e   :  { %s3842_s8 = sld [smem:[#allocation4 + $0x86]] }
  0x9f   :  { %6203 = sst [smem:[#allocation62_spill]] %s3836_s10 }
  0xa0   :  { %6204 = sst [smem:[#allocation63_spill]] %s3838_s25 }
  0xa1   :  { %6205 = sst [smem:[#allocation64_spill]] %s3840_s26 }
  0xa2   :  { %s3844_s5 = sld [smem:[#allocation4 + $0x106]] }
  0xa3   :  { %s3846_s28 = sld [smem:[#allocation4 + $0x186]] }
  0xa4   :  { %s3848_s29 = sld [smem:[#allocation4 + $0x206]] }
  0xa5   :  { %s3850_s30 = sld [smem:[#allocation4 + $0x7]] }
  0xa6   :  { %s3852_s10 = sld [smem:[#allocation4 + $0x87]] }
  0xa7   :  { %s3854_s25 = sld [smem:[#allocation4 + $0x107]] }
  0xa8   :  { %6206 = sst [smem:[#allocation65_spill]] %s3844_s5 }
  0xa9   :  { %6207 = sst [smem:[#allocation66_spill]] %s3846_s28 }
  0xaa   :  { %6208 = sst [smem:[#allocation67_spill]] %s3848_s29 }
  0xab   :  { %6209 = sst [smem:[#allocation68_spill]] %s3850_s30 }
  0xac   :  { %6210 = sst [smem:[#allocation69_spill]] %s3852_s10 }
  0xad   :  { %6211 = sst [smem:[#allocation70_spill]] %s3854_s25 }
  0xae   :  { %s3859_s5 = sld [smem:[#allocation4 + $0x187]] }
  0xaf   :  { %s3865_s29 = sld [smem:[#allocation4 + $0x207]] }
  0xb0   :  { %s6214_s25 = sld [smem:[#allocation38_spill]] }
  0xb1   :  { %s6215_s0 = sld [smem:[#allocation39_spill]] }
  0xb2   :  { %s6216_s11 = sld [smem:[#allocation40_spill]] }
  0xb3   :  { %s3871_s12 = sld [smem:[#allocation4 + $0x287]] }
  0xb4   :  { %6212 = sst [smem:[#allocation71_spill]] %s3859_s5 }
  0xb5   :  { %6213 = sst [smem:[#allocation72_spill]] %s3865_s29 }
  0xb6   :  { %s6218_s5 = sld [smem:[#allocation41_spill]]  ;;  %v1577_v26 = vstv %s6214_s25 }
  0xb7   :  { %s6219_s7 = sld [smem:[#allocation42_spill]]  ;;  %v1660_v27 = vstv %s6215_s0 }
  0xb8   :  { %s6220_s13 = sld [smem:[#allocation43_spill]]  ;;  %v1743_v28 = vstv %s6216_s11 }
  0xb9   :  { %6217 = sst [smem:[#allocation73_spill]] %s3871_s12 }
  0xba   :  { %s6221_s14 = sld [smem:[#allocation44_spill]] }
  0xbb   :  { %s3877_s15 = sld [smem:[#allocation4 + $0x307]] }
  0xbc   :  { %s6223_s29 = sld [smem:[#allocation45_spill]]  ;;  %v1826_v29 = vstv %s6218_s5 }
  0xbd   :  { %s6224_s16 = sld [smem:[#allocation46_spill]]  ;;  %v1909_v30 = vstv %s6219_s7 }
  0xbe   :  { %s3883_s6 = sld [smem:[#allocation7]]  ;;  %v1992_v31 = vstv %s6220_s13 }
  0xbf   :  { %s6229_s20 = sld [smem:[#allocation51_spill]] }
  0xc0   :  { %s3889_s21 = sld [smem:[#allocation7 + $0x1]]  ;;  %v1432_v32 = vstv %s6221_s14 }
  0xc1   :  { %6222 = sst [smem:[#allocation41_spill]] %s3877_s15 }
  0xc2   :  { %s6231_s18 = sld [smem:[#allocation52_spill]]  ;;  %v1499_v33 = vstv %s6223_s29 }
  0xc3   :  { %s3895_s22 = sld [smem:[#allocation7 + $0x2]]  ;;  %v1582_v34 = vstv %s6224_s16 }
  0xc4   :  { %6226 = sst [smem:[#allocation42_spill]] %s3883_s6 }
  0xc5   :  { %s3901_s11 = sld [smem:[#allocation4 + $0x286]] }
  0xc6   :  { %6230 = sst [smem:[#allocation45_spill]] %s3889_s21 }
  0xc7   :  { %s3907_s14 = sld [smem:[#allocation4 + $0x306]] }
  0xc8   :  { %s3917_s19 = sld [smem:[#allocation4 + $0x480]] }
  0xc9   :  { %6235 = sst [smem:[#allocation51_spill]] %s3895_s22 }
  0xca   :  { %s6248_s24 = sld [smem:[#allocation61_spill]] }
  0xcb   :  { %s6249_s25 = sld [smem:[#allocation62_spill]] }
  0xcc   :  { %s3929_s0 = sld [smem:[#allocation4 + $0x383]] }
  0xcd   :  { %6241 = sst [smem:[#allocation52_spill]] %s3907_s14 }
  0xce   :  { %s6251_s3 = sld [smem:[#allocation63_spill]] }
  0xcf   :  { %s3935_s26 = sld [smem:[#allocation7 + $0x3]] }
  0xd0   :  { %s3941_s13 = sld [smem:[#allocation7 + $0x4]] }
  0xd1   :  { %s3945_s17 = sld [smem:[#allocation7 + $0x5]] }
  0xd2   :  { %6250 = sst [smem:[#allocation61_spill]] %s3929_s0 }
  0xd3   :  { %s3960_s2 = sld [smem:[#allocation7 + $0x6]] }
  0xd4   :  { %s4095_s6 = sld [smem:[#allocation9]] }
  0xd5   :  { %s4106_s22 = sld [smem:[#allocation9 + $0x1]] }
  0xd6   :  { %s4120_s28 = sld [smem:[#allocation9 + $0x2]] }
  0xd7   :  { %s4135_s30 = sld [smem:[#allocation9 + $0x3]] }
  0xd8   :  { %s4151_s10 = sld [smem:[#allocation9 + $0x4]] }
  0xd9   :  { %6262 = sst [smem:[#allocation62_spill]] %s3960_s2 }
  0xda   :  { %s4160_s1 = sld [smem:[#allocation9 + $0x80]] }
  0xdb   :  { %s4164_s15 = sld [smem:[#allocation9 + $0x81]] }
  0xdc   :  { %s6291_s12 = sld [smem:[#allocation48_spill]] }
  0xdd   :  { %s4178_s16 = sld [smem:[#allocation9 + $0x82]] }
  0xde   :  { %s6292_s7 = sld [smem:[#allocation49_spill]] }
  0xdf   :  { %s4180_s14 = sld [smem:[#allocation9 + $0x83]] }
  0xe0   :  { %s4212_s4 = sld [smem:[#allocation9 + $0x5]] }
  0xe1   :  { %s4226_s29 = sld [smem:[#allocation9 + $0x84]] }
  0xe2   :  { %s6298_s21 = sld [smem:[#allocation50_spill]] }
  0xe3   :  { %s4234_s23 = sld [smem:[#allocation9 + $0x85]] }
  0xe4   :  { %s6302_s5 = sld [smem:[#allocation54_spill]] }
  0xe5   :  { %s6303_s9 = sld [smem:[#allocation55_spill]] }
  0xe6   :  { %s4299_s0 = sld [smem:[#allocation9 + $0x102]] }
  0xe7   :  { %s4320_s2 = sld [smem:[#allocation9 + $0x103]] }
  0xe9   :  { %6299 = sst [smem:[#allocation63_spill]] %s4234_s23 }
  0xea   :  { %s6378_s23 = sld [smem:[#allocation51_spill]] }
 0x10b   :  { %v3258_v37 = vpop.f32.mrf.mxu0 }
 0x10d   :  { %v298_v38 = vpop.f32.mrf.mxu0 }
 0x10f   :  { %v3261_v39 = vpop.f32.mrf.mxu0 }
 0x110   :  { %3304 = vmatprep.subr.mxu1 %v3261_v39 }
 0x111   :  { %v308_v40 = vpop.f32.mrf.mxu0  ;;  %3305 = vmatpush3.msra.mxu1 %v3261_v39 }
 0x112   :  { %3306 = vmatprep.subr.mxu1 %v308_v40 }
 0x113   :  { %v3264_v41 = vpop.f32.mrf.mxu0  ;;  %3307 = vmatpush3.msra.mxu1 %v308_v40 }
 0x114   :  { %3308 = vmatprep.subr.mxu1 %v3258_v37 }
 0x115   :  { %v318_v42 = vpop.f32.mrf.mxu0  ;;  %3309 = vmatpush3.msra.mxu1 %v3258_v37 }
 0x116   :  { %3310 = vmatprep.subr.mxu1 %v298_v38 }
 0x117   :  { %v3267_v44 = vpop.f32.mrf.mxu0  ;;  %3311 = vmatpush3.msra.mxu1 %v298_v38 }
 0x118   :  { %3313 = vmatmul.mubr.msk.f32.vlgmr.msra.gmra.mxu1 %vm135_vm0, %v3714_v43  ;;  %3315 = vmatprep.subr.mxu1 %v3267_v44 }
 0x119   :  { %v328_v45 = vpop.f32.mrf.mxu0  ;;  %3316 = vmatpush3.msra.mxu1 %v3267_v44  ;;  %3323 = vmatprep.mubr.msk.f32.mxu1 %vm135_vm0, %v3707_v36 }
 0x11a   :  { %3317 = vmatprep.subr.mxu1 %v328_v45 }
 0x11b   :  { %v3270_v46 = vpop.f32.mrf.mxu0  ;;  %3318 = vmatpush3.msra.mxu1 %v328_v45 }
 0x11c   :  { %3319 = vmatprep.subr.mxu1 %v3264_v41 }
 0x11d   :  { %v338_v47 = vpop.f32.mrf.mxu0  ;;  %3320 = vmatpush3.msra.mxu1 %v3264_v41 }
 0x11e   :  { %3321 = vmatprep.subr.mxu1 %v318_v42 }
 0x11f   :  { %v3273_v48 = vpop.f32.mrf.mxu0  ;;  %3322 = vmatpush3.msra.mxu1 %v318_v42 }
 0x120   :  { %3324 = vmatmul.mubr.msk.f32.vlgmr.msra.gmra.mxu1 %vm135_vm0, %v3714_v43  ;;  %3326 = vmatprep.subr.mxu1 %v3273_v48 }
 0x121   :  { %v348_v49 = vpop.f32.mrf.mxu0  ;;  %3327 = vmatpush3.msra.mxu1 %v3273_v48  ;;  %3334 = vmatprep.mubr.msk.f32.mxu1 %vm135_vm0, %v3707_v36 }
 0x122   :  { %3328 = vmatprep.subr.mxu1 %v348_v49 }
 0x123   :  { %v3276_v50 = vpop.f32.mrf.mxu0  ;;  %3329 = vmatpush3.msra.mxu1 %v348_v49 }
 0x124   :  { %3330 = vmatprep.subr.mxu1 %v3270_v46 }
 0x125   :  { %v358_v51 = vpop.f32.mrf.mxu0  ;;  %3331 = vmatpush3.msra.mxu1 %v3270_v46 }
 0x126   :  { %3332 = vmatprep.subr.mxu1 %v338_v47 }
 0x127   :  { %v3279_v52 = vpop.f32.mrf.mxu0  ;;  %3333 = vmatpush3.msra.mxu1 %v338_v47 }
 0x128   :  { %3335 = vmatmul.mubr.msk.f32.vlgmr.msra.gmra.mxu1 %vm135_vm0, %v3714_v43  ;;  %3337 = vmatprep.subr.mxu1 %v3279_v52 }
 0x129   :  { %v368_v53 = vpop.f32.mrf.mxu0  ;;  %3338 = vmatpush3.msra.mxu1 %v3279_v52  ;;  %3345 = vmatprep.mubr.msk.f32.mxu1 %vm135_vm0, %v3707_v36 }
 0x12a   :  { %3339 = vmatprep.subr.mxu1 %v368_v53 }
 0x12b   :  { %v3282_v54 = vpop.f32.mrf.mxu0  ;;  %3340 = vmatpush3.msra.mxu1 %v368_v53 }
 0x12c   :  { %3341 = vmatprep.subr.mxu1 %v3276_v50 }
 0x12d   :  { %v378_v55 = vpop.f32.mrf.mxu0  ;;  %3342 = vmatpush3.msra.mxu1 %v3276_v50 }
 0x12e   :  { %3343 = vmatprep.subr.mxu1 %v358_v51 }
 0x12f   :  { %v3285_v56 = vpop.f32.mrf.mxu0  ;;  %3344 = vmatpush3.msra.mxu1 %v358_v51 }
 0x130   :  { %3346 = vmatmul.mubr.msk.f32.vlgmr.msra.gmra.mxu1 %vm135_vm0, %v3714_v43  ;;  %3348 = vmatprep.subr.mxu1 %v3285_v56 }
 0x131   :  { %v388_v57 = vpop.f32.mrf.mxu0  ;;  %3349 = vmatpush3.msra.mxu1 %v3285_v56  ;;  %3356 = vmatprep.mubr.msk.f32.mxu1 %vm135_vm0, %v3707_v36 }
 0x132   :  { %3350 = vmatprep.subr.mxu1 %v388_v57 }
 0x133   :  { %v3288_v58 = vpop.f32.mrf.mxu0  ;;  %3351 = vmatpush3.msra.mxu1 %v388_v57  ;;  %v2150_v57 = vstv %s3917_s19  ;;  %s6301_s19 = sld [smem:[#allocation53_spill]] }
 0x134   :  { %3352 = vmatprep.subr.mxu1 %v3282_v54 }
 0x135   :  { %v398_v59 = vpop.f32.mrf.mxu0  ;;  %3353 = vmatpush3.msra.mxu1 %v3282_v54 }
 0x136   :  { %3354 = vmatprep.subr.mxu1 %v378_v55 }
 0x137   :  { %v3291_v60 = vpop.f32.mrf.mxu0  ;;  %3355 = vmatpush3.msra.mxu1 %v378_v55 }
 0x138   :  { %3357 = vmatmul.mubr.msk.f32.vlgmr.msra.gmra.mxu1 %vm135_vm0, %v3714_v43  ;;  %3359 = vmatprep.subr.mxu1 %v3291_v60 }
 0x139   :  { %v408_v61 = vpop.f32.mrf.mxu0  ;;  %3360 = vmatpush3.msra.mxu1 %v3291_v60  ;;  %3367 = vmatprep.mubr.msk.f32.mxu1 %vm135_vm0, %v3707_v36 }
 0x13a   :  { %3361 = vmatprep.subr.mxu1 %v408_v61 }
 0x13b   :  { %v3294_v62 = vpop.f32.mrf.mxu0  ;;  %3362 = vmatpush3.msra.mxu1 %v408_v61 }
 0x13c   :  { %3363 = vmatprep.subr.mxu1 %v3288_v58 }
 0x13d   :  { %v418_v63 = vpop.f32.mrf.mxu0  ;;  %3364 = vmatpush3.msra.mxu1 %v3288_v58 }
 0x13e   :  { %3365 = vmatprep.subr.mxu1 %v398_v59 }
 0x13f   :  { %v3297_v0 = vpop.f32.mrf.mxu0  ;;  %3366 = vmatpush3.msra.mxu1 %v398_v59 }
 0x140   :  { %3368 = vmatmul.mubr.msk.f32.vlgmr.msra.gmra.mxu1 %vm135_vm0, %v3714_v43  ;;  %3370 = vmatprep.subr.mxu1 %v3297_v0 }
 0x141   :  { %v428_v1 = vpop.f32.mrf.mxu0  ;;  %3371 = vmatpush3.msra.mxu1 %v3297_v0  ;;  %3378 = vmatprep.mubr.msk.f32.mxu1 %vm135_vm0, %v3707_v36 }
 0x142   :  { %3372 = vmatprep.subr.mxu1 %v428_v1 }
 0x143   :  { %v3300_v2 = vpop.f32.mrf.mxu0  ;;  %3373 = vmatpush3.msra.mxu1 %v428_v1 }
 0x144   :  { %3374 = vmatprep.subr.mxu1 %v3294_v62 }
 0x145   :  { %v438_v3 = vpop.f32.mrf.mxu0  ;;  %3375 = vmatpush3.msra.mxu1 %v3294_v62 }
 0x146   :  { %3376 = vmatprep.subr.mxu1 %v418_v63 }
 0x147   :  { %v3303_v4 = vpop.f32.mrf.mxu0  ;;  %3377 = vmatpush3.msra.mxu1 %v418_v63 }
 0x148   :  { %3379 = vmatmul.mubr.msk.f32.vlgmr.msra.gmra.mxu1 %vm135_vm0, %v3714_v43  ;;  %3381 = vmatprep.subr.mxu1 %v3303_v4 }
 0x149   :  { %v448_v5 = vpop.f32.mrf.mxu0  ;;  %3382 = vmatpush3.msra.mxu1 %v3303_v4  ;;  %3389 = vmatprep.mubr.msk.f32.mxu1 %vm135_vm0, %v3707_v36 }
 0x14a   :  { %3383 = vmatprep.subr.mxu1 %v448_v5 }
 0x14b   :  { %3384 = vmatpush3.msra.mxu1 %v448_v5 }
 0x14c   :  { %3385 = vmatprep.subr.mxu1 %v3300_v2 }
 0x14d   :  { %3386 = vmatpush3.msra.mxu1 %v3300_v2 }
 0x14e   :  { %3387 = vmatprep.subr.mxu1 %v438_v3 }
 0x14f   :  { %3388 = vmatpush3.msra.mxu1 %v438_v3 }
 0x150   :  { %3390 = vmatmul.mubr.msk.f32.vlgmr.msra.gmra.mxu1 %vm135_vm0, %v3714_v43 }
 0x1d8   :  { %v3919_v49 = vpop.f32.mrf.mxu1 }
 0x1d9   :  { %6246 = vst [vmem:[#allocation74_spill] sm:$0xff] %v3919_v49  ;;  %v1421_v1 = vmul.f32 %v3919_v49, %v1419_v6  ;;  %v1488_v0 = vmul.f32 %v3919_v49, %v1486_v7  ;;  %v1571_v60 = vmul.f32 %v3919_v49, %v1569_v8  ;;  %v1654_v63 = vmul.f32 %v3919_v49, %v1652_v9 }
 0x1da   :  { %v3943_v2 = vpop.f32.mrf.mxu1  ;;  %v1737_v62 = vmul.f32 %v3919_v49, %v1735_v10  ;;  %v1820_v58 = vmul.f32 %v3919_v49, %v1818_v11  ;;  %v1903_v55 = vmul.f32 %v3919_v49, %v1901_v12  ;;  %v3978_v54 = vmul.f32 %v3919_v49, %v1984_v13 }
 0x1db   :  { %6260 = vst [vmem:[#allocation75_spill] sm:$0xff] %v3943_v2  ;;  %v3983_v59 = vmul.f32 %v3919_v49, %v2067_v14  ;;  %v1420_v4 = vmul.f32 %v1419_v6, %v3943_v2  ;;  %v1487_v56 = vmul.f32 %v1486_v7, %v3943_v2  ;;  %v1570_v53 = vmul.f32 %v1569_v8, %v3943_v2 }
 0x1dc   :  { %v1653_v52 = vmul.f32 %v1652_v9, %v3943_v2  ;;  %v1736_v6 = vmul.f32 %v1735_v10, %v3943_v2  ;;  %v1819_v51 = vmul.f32 %v1818_v11, %v3943_v2  ;;  %v1902_v7 = vmul.f32 %v1901_v12, %v3943_v2 }
 0x1dd   :  { %6263 = vst [vmem:[#allocation76_spill] sm:$0xff] %v3983_v59  ;;  %v4012_v8 = vmul.f32 %v1984_v13, %v3943_v2  ;;  %v4017_v9 = vmul.f32 %v2067_v14, %v3943_v2  ;;  %v4024_v12 = vmul.f32 %v2150_v57, %v3943_v2  ;;  %v4027_v13 = vmul.f32 %v3919_v49, %v2150_v57 }
 0x1de   :  { %v6393_v2 = vstv %s4164_s15  ;;  %s4556_s15 = sld [smem:[#allocation9 + $0x202]] }
 0x1df   :  { %6273 = vst [vmem:[#allocation78_spill] sm:$0xff] %v4017_v9  ;;  %6275 = vst [vmem:[#allocation80_spill] sm:$0xff] %v4024_v12  ;;  %v6401_v9 = vstv %s4178_s16  ;;  %s4643_s16 = sld [smem:[#allocation9 + $0x282]] }
 0x1e0   :  { %v3988_v61 = vpop.f32.mrf.mxu1  ;;  %6276 = vst [vmem:[#allocation81_spill] sm:$0xff] %v4027_v13 }
 0x1e1   :  { %6265 = vst [vmem:[#allocation77_spill] sm:$0xff] %v3988_v61  ;;  %v1424_v14 = vmul.f32 %v3988_v61, %v1422_v15  ;;  %v1491_v50 = vmul.f32 %v3988_v61, %v1489_v16  ;;  %v1574_v3 = vmul.f32 %v3988_v61, %v1572_v17  ;;  %v1657_v11 = vmul.f32 %v3988_v61, %v1655_v18 }
 0x1e2   :  { %v4019_v10 = vpop.f32.mrf.mxu1  ;;  %v1740_v47 = vmul.f32 %v3988_v61, %v1738_v19  ;;  %v1823_v57 = vmul.f32 %v3988_v61, %v1821_v20  ;;  %v1906_v46 = vmul.f32 %v3988_v61, %v1904_v21  ;;  %v4054_v45 = vmul.f32 %v3988_v61, %v1987_v22 }
 0x1e3   :  { %6274 = vst [vmem:[#allocation79_spill] sm:$0xff] %v4019_v10  ;;  %v1423_v48 = vmul.f32 %v1422_v15, %v4019_v10  ;;  %v1490_v43 = vmul.f32 %v1489_v16, %v4019_v10  ;;  %v1573_v42 = vmul.f32 %v1572_v17, %v4019_v10  ;;  %v1656_v41 = vmul.f32 %v1655_v18, %v4019_v10 }
 0x1e4   :  { %v1739_v40 = vmul.f32 %v1738_v19, %v4019_v10  ;;  %v1426_v39 = vadd.f32 %v1424_v14, %v1421_v1  ;;  %v1493_v38 = vadd.f32 %v1491_v50, %v1488_v0  ;;  %v1576_v15 = vadd.f32 %v1574_v3, %v1571_v60 }
 0x1e5   :  { %v1822_v44 = vmul.f32 %v1821_v20, %v4019_v10  ;;  %v1659_v16 = vadd.f32 %v1657_v11, %v1654_v63  ;;  %v1742_v37 = vadd.f32 %v1740_v47, %v1737_v62  ;;  %v1825_v17 = vadd.f32 %v1823_v57, %v1820_v58 }
 0x1e6   :  { %v4078_v36 = vadd.f32 %v1906_v46, %v1903_v55  ;;  %v4083_v18 = vmul.f32 %v3988_v61, %v2070_v23  ;;  %v1425_v19 = vadd.f32 %v1423_v48, %v1420_v4  ;;  %v1905_v20 = vmul.f32 %v1904_v21, %v4019_v10 }
 0x1e7   :  { %v4091_v50 = vmul.f32 %v1987_v22, %v4019_v10  ;;  %v1492_v46 = vadd.f32 %v1490_v43, %v1487_v56  ;;  %v1575_v55 = vadd.f32 %v1573_v42, %v1570_v53  ;;  %v1658_v58 = vadd.f32 %v1656_v41, %v1653_v52 }
 0x1e8   :  { %v4076_v5 = vpop.f32.mrf.mxu1  ;;  %6283 = vst [vmem:[#allocation83_spill] sm:$0xff] %v4083_v18  ;;  %v1741_v60 = vadd.f32 %v1739_v40, %v1736_v6  ;;  %v1824_v48 = vadd.f32 %v1822_v44, %v1819_v51  ;;  %v4122_v51 = vadd.f32 %v1905_v20, %v1902_v7  ;;  %v4127_v52 = vmul.f32 %v2070_v23, %v4019_v10 }
 0x1e9   :  { %6278 = vst [vmem:[#allocation82_spill] sm:$0xff] %v4076_v5  ;;  %v1429_v21 = vmul.f32 %v4076_v5, %v1427_v24  ;;  %v1496_v22 = vmul.f32 %v4076_v5, %v1494_v25  ;;  %v1579_v42 = vmul.f32 %v4076_v5, %v1577_v26  ;;  %v1662_v40 = vmul.f32 %v4076_v5, %v1660_v27 }
 0x1ea   :  { %v4093_v47 = vpop.f32.mrf.mxu1  ;;  %v1745_v41 = vmul.f32 %v4076_v5, %v1743_v28  ;;  %v1828_v43 = vmul.f32 %v4076_v5, %v1826_v29  ;;  %6287 = vst [vmem:[#allocation85_spill] sm:$0xff] %v4127_v52  ;;  %v4140_v62 = vmul.f32 %v4076_v5, %v1909_v30  ;;  %v4156_v1 = vmul.f32 %v4076_v5, %v1992_v31 }
 0x1eb   :  { %6285 = vst [vmem:[#allocation84_spill] sm:$0xff] %v4093_v47  ;;  %v1428_v44 = vmul.f32 %v1427_v24, %v4093_v47  ;;  %v1495_v53 = vmul.f32 %v1494_v25, %v4093_v47  ;;  %v1578_v56 = vmul.f32 %v1577_v26, %v4093_v47  ;;  %v1661_v24 = vmul.f32 %v1660_v27, %v4093_v47 }
 0x1ec   :  { %v1744_v63 = vmul.f32 %v1743_v28, %v4093_v47  ;;  %v1827_v23 = vmul.f32 %v1826_v29, %v4093_v47  ;;  %v1431_v25 = vadd.f32 %v1429_v21, %v1426_v39  ;;  %v1498_v26 = vadd.f32 %v1496_v22, %v1493_v38 }
 0x1ed   :  { %v1581_v0 = vadd.f32 %v1579_v42, %v1576_v15  ;;  %v1664_v27 = vadd.f32 %v1662_v40, %v1659_v16  ;;  %v1747_v28 = vadd.f32 %v1745_v41, %v1742_v37  ;;  %v4162_v29 = vadd.f32 %v1828_v43, %v1825_v17 }
 0x1ee   :  { %v1430_v4 = vadd.f32 %v1428_v44, %v1425_v19  ;;  %v1497_v38 = vadd.f32 %v1495_v53, %v1492_v46  ;;  %v1580_v39 = vadd.f32 %v1578_v56, %v1575_v55  ;;  %v4169_v6 = vmul.f32 %v1909_v30, %v4093_v47 }
 0x1ef   :  { %v4174_v37 = vmul.f32 %v1992_v31, %v4093_v47  ;;  %v1663_v11 = vadd.f32 %v1661_v24, %v1658_v58  ;;  %v1746_v14 = vadd.f32 %v1744_v63, %v1741_v60  ;;  %v1829_v57 = vadd.f32 %v1827_v23, %v1824_v48 }
 0x1f0   :  { %v4158_v3 = vpop.f32.mrf.mxu1  ;;  %v6293_v20 = vstv %s6291_s12  ;;  %v6294_v42 = vstv %s6292_s7  ;;  %v6295_v41 = vstv %s3810_s27  ;;  %v6312_v22 = vstv %s6302_s5  ;;  %s6319_s27 = sld [smem:[#allocation56_spill]] }
 0x1f1   :  { %v1434_v31 = vmul.f32 %v4158_v3, %v1432_v32  ;;  %v1501_v15 = vmul.f32 %v4158_v3, %v1499_v33  ;;  %v1584_v16 = vmul.f32 %v4158_v3, %v1582_v34  ;;  %v1667_v19 = vmul.f32 %v4158_v3, %v1665_v35  ;;  %s6320_s12 = sld [smem:[#allocation57_spill]] }
 0x1f2   :  { %v4176_v7 = vpop.f32.mrf.mxu1  ;;  %v1750_v46 = vmul.f32 %v4158_v3, %v6293_v20  ;;  %v1833_v40 = vmul.f32 %v4158_v3, %v6294_v42  ;;  %v6296_v43 = vmov %v6293_v20  ;;  %v6297_v56 = vmov %v6294_v42  ;;  %s6321_s7 = sld [smem:[#allocation58_spill]] }
 0x1f3   :  { %v1433_v55 = vmul.f32 %v1432_v32, %v4176_v7  ;;  %v1500_v60 = vmul.f32 %v1499_v33, %v4176_v7  ;;  %v1583_v48 = vmul.f32 %v1582_v34, %v4176_v7  ;;  %v1666_v21 = vmul.f32 %v1665_v35, %v4176_v7  ;;  %s4297_s5 = sld [smem:[#allocation9 + $0x101]] }
 0x1f4   :  { %v4221_v32 = vmul.f32 %v4158_v3, %v6295_v41  ;;  %v1749_v33 = vmul.f32 %v6296_v43, %v4176_v7  ;;  %v1436_v44 = vadd.f32 %v1434_v31, %v1431_v25  ;;  %v1503_v35 = vadd.f32 %v1501_v15, %v1498_v26 }
 0x1f5   :  { %v1586_v53 = vadd.f32 %v1584_v16, %v1581_v0  ;;  %v1832_v24 = vmul.f32 %v6297_v56, %v4176_v7  ;;  %v1669_v23 = vadd.f32 %v1667_v19, %v1664_v27  ;;  %v1752_v20 = vadd.f32 %v1750_v46, %v1747_v28 }
 0x1f6   :  { %v6300_v42 = vmov %v6295_v41  ;;  %v1435_v26 = vadd.f32 %v1433_v55, %v1430_v4  ;;  %v1502_v31 = vadd.f32 %v1500_v60, %v1497_v38  ;;  %v1585_v15 = vadd.f32 %v1583_v48, %v1580_v39 }
 0x1f7   :  { %v4239_v25 = vmul.f32 %v6300_v42, %v4176_v7  ;;  %v1668_v16 = vadd.f32 %v1666_v21, %v1663_v11  ;;  %v1751_v27 = vadd.f32 %v1749_v33, %v1746_v14  ;;  %v6304_v43 = vstv %s6298_s21  ;;  %s6322_s21 = sld [smem:[#allocation59_spill]] }
 0x1f8   :  { %v4232_v63 = vpop.f32.mrf.mxu1  ;;  %v6305_v55 = vstv %s6229_s20  ;;  %v6306_v38 = vmov %v6304_v43  ;;  %v1834_v11 = vadd.f32 %v1832_v24, %v1829_v57  ;;  %v6307_v60 = vstv %s6231_s18  ;;  %s4280_s20 = sld [smem:[#allocation9 + $0x6]] }
 0x1f9   :  { %v1439_v4 = vmul.f32 %v4232_v63, %v6304_v43  ;;  %v1506_v56 = vmul.f32 %v4232_v63, %v6305_v55  ;;  %v1589_v48 = vmul.f32 %v4232_v63, %v6307_v60  ;;  %v6308_v14 = vmov %v6305_v55  ;;  %s4285_s18 = sld [smem:[#allocation9 + $0x86]] }
 0x1fa   :  { %v4241_v0 = vpop.f32.mrf.mxu1  ;;  %v6309_v33 = vmov %v6307_v60  ;;  %v6310_v34 = vstv %s6301_s19  ;;  %v6313_v57 = vmov %v6312_v22  ;;  %v6314_v60 = vstv %s6303_s9  ;;  %s4293_s19 = sld [smem:[#allocation9 + $0x100]] }
 0x1fb   :  { %v1438_v39 = vmul.f32 %v6306_v38, %v4241_v0  ;;  %v1505_v21 = vmul.f32 %v6308_v14, %v4241_v0  ;;  %v1588_v42 = vmul.f32 %v6309_v33, %v4241_v0  ;;  %v1671_v43 = vmul.f32 %v6310_v34, %v4241_v0  ;;  %s6323_s9 = sld [smem:[#allocation60_spill]] }
 0x1fc   :  { %v6311_v46 = vmov %v6310_v34  ;;  %v1755_v38 = vmul.f32 %v4232_v63, %v6312_v22  ;;  %v1754_v24 = vmul.f32 %v6313_v57, %v4241_v0  ;;  %v1837_v19 = vmul.f32 %v6314_v60, %v4241_v0 }
 0x1fd   :  { %v1672_v55 = vmul.f32 %v4232_v63, %v6311_v46  ;;  %v6316_v14 = vmov %v6314_v60  ;;  %v1835_v58 = vadd.f32 %v1833_v40, %v4162_v29  ;;  %v1440_v22 = vadd.f32 %v1438_v39, %v1435_v26 }
 0x1fe   :  { %6315 = sst [smem:[#allocation18_spill]] %s4280_s20  ;;  %v1838_v33 = vmul.f32 %v4232_v63, %v6316_v14  ;;  %v1441_v17 = vadd.f32 %v1439_v4, %v1436_v44  ;;  %v1508_v41 = vadd.f32 %v1506_v56, %v1503_v35  ;;  %v1507_v30 = vadd.f32 %v1505_v21, %v1502_v31 }
 0x1ff   :  { %6317 = sst [smem:[#allocation19_spill]] %s4285_s18  ;;  %v1590_v60 = vadd.f32 %v1588_v42, %v1585_v15  ;;  %v1591_v49 = vadd.f32 %v1589_v48, %v1586_v53  ;;  %v1673_v14 = vadd.f32 %v1671_v43, %v1668_v16  ;;  %v1674_v29 = vadd.f32 %v1672_v55, %v1669_v23 }
 0x200   :  { %v4290_v28 = vpop.f32.mrf.mxu1  ;;  %v1756_v40 = vadd.f32 %v1754_v24, %v1751_v27  ;;  %v1757_v44 = vadd.f32 %v1755_v38, %v1752_v20  ;;  %v1839_v35 = vadd.f32 %v1837_v19, %v1834_v11  ;;  %v1840_v53 = vadd.f32 %v1838_v33, %v1835_v58  ;;  %s6354_s18 = sld [smem:[#allocation69_spill]] }
 0x201   :  { %6318 = vst [vmem:[#allocation86_spill] sm:$0xff] %v4290_v28  ;;  %v1912_v26 = vadd.f32 %v4169_v6, %v4122_v51  ;;  %v1913_v23 = vadd.f32 %v4140_v62, %v4078_v36  ;;  %v6324_v31 = vstv %s6249_s25  ;;  %v6325_v16 = vstv %s6319_s27  ;;  %s4344_s27 = sld [smem:[#allocation9 + $0x104]] }
 0x202   :  { %v4295_v34 = vpop.f32.mrf.mxu1  ;;  %v1920_v15 = vmul.f32 %v6324_v31, %v4241_v0  ;;  %v1444_v20 = vmul.f32 %v4290_v28, %v6325_v16  ;;  %v6326_v27 = vstv %s6320_s12  ;;  %v6327_v4 = vstv %s6321_s7  ;;  %s6337_s25 = sld [smem:[#allocation64_spill]] }
 0x203   :  { %v1511_v19 = vmul.f32 %v4290_v28, %v6326_v27  ;;  %v1594_v58 = vmul.f32 %v4290_v28, %v6327_v4  ;;  %v6328_v56 = vstv %s6322_s21  ;;  %v6329_v36 = vmov %v6325_v16  ;;  %s6339_s12 = sld [smem:[#allocation65_spill]] }
 0x204   :  { %v1677_v51 = vmul.f32 %v4290_v28, %v6328_v56  ;;  %v1443_v62 = vmul.f32 %v6329_v36, %v4295_v34  ;;  %v6330_v6 = vmov %v6326_v27  ;;  %v6331_v11 = vmov %v6327_v4  ;;  %s6340_s7 = sld [smem:[#allocation66_spill]] }
 0x205   :  { %v1510_v39 = vmul.f32 %v6330_v6, %v4295_v34  ;;  %v1593_v48 = vmul.f32 %v6331_v11, %v4295_v34  ;;  %v6332_v21 = vmov %v6324_v31  ;;  %v6333_v43 = vstv %s6323_s9  ;;  %s6343_s21 = sld [smem:[#allocation67_spill]] }
 0x206   :  { %v1921_v42 = vmul.f32 %v4232_v63, %v6332_v21  ;;  %v1760_v55 = vmul.f32 %v4290_v28, %v6333_v43  ;;  %v6334_v38 = vmov %v6328_v56  ;;  %v6335_v33 = vmov %v6333_v43  ;;  %s4387_s9 = sld [smem:[#allocation9 + $0x105]] }
 0x207   :  { %v1676_v24 = vmul.f32 %v6334_v38, %v4295_v34  ;;  %v1759_v31 = vmul.f32 %v6335_v33, %v4295_v34  ;;  %v6336_v27 = vstv %s6248_s24  ;;  %v1917_v56 = vadd.f32 %v4239_v25, %v1912_v26  ;;  %s4429_s20 = sld [smem:[#allocation9 + $0x180]] }
 0x208   :  { %v1843_v4 = vmul.f32 %v4290_v28, %v6336_v27  ;;  %v1918_v36 = vadd.f32 %v4221_v32, %v1913_v23  ;;  %v4352_v11 = vpop.f32.mrf.mxu1  ;;  %v1446_v21 = vadd.f32 %v1444_v20, %v1441_v17  ;;  %v1513_v43 = vadd.f32 %v1511_v19, %v1508_v41 }
 0x209   :  { %6338 = vst [vmem:[#allocation87_spill] sm:$0xff] %v4352_v11  ;;  %v1596_v38 = vadd.f32 %v1594_v58, %v1591_v49  ;;  %v1679_v33 = vadd.f32 %v1677_v51, %v1674_v29  ;;  %v1445_v16 = vadd.f32 %v1443_v62, %v1440_v22  ;;  %v1512_v27 = vadd.f32 %v1510_v39, %v1507_v30 }
 0x20a   :  { %v1595_v25 = vadd.f32 %v1593_v48, %v1590_v60  ;;  %v1468_v32 = vstv %s4293_s19  ;;  %v4355_v26 = vpop.f32.mrf.mxu1  ;;  %v1678_v23 = vadd.f32 %v1676_v24, %v1673_v14  ;;  %v1761_v6 = vadd.f32 %v1759_v31, %v1756_v40  ;;  %s4709_s19 = sld [smem:[#allocation9 + $0x285]] }
 0x20b   :  { %6341 = vst [vmem:[#allocation88_spill] sm:$0xff] %v4355_v26  ;;  %v1762_v41 = vadd.f32 %v1760_v55, %v1757_v44  ;;  %v6342_v20 = vstv %s6337_s25  ;;  %v6344_v30 = vstv %s6248_s24  ;;  %v1845_v60 = vadd.f32 %v1843_v4, %v1840_v53  ;;  %s6352_s24 = sld [smem:[#allocation68_spill]] }
 0x20c   :  { %v1449_v49 = vmul.f32 %v4352_v11, %v6342_v20  ;;  %v1842_v29 = vmul.f32 %v6344_v30, %v4295_v34  ;;  %v6345_v19 = vstv %s3842_s8  ;;  %v6346_v14 = vstv %s6339_s12  ;;  %s6357_s8 = sld [smem:[#allocation70_spill]] }
 0x20d   :  { %v1516_v58 = vmul.f32 %v4352_v11, %v6345_v19  ;;  %v1599_v40 = vmul.f32 %v4352_v11, %v6346_v14  ;;  %v6347_v51 = vstv %s6340_s7  ;;  %v6348_v39 = vmov %v6342_v20  ;;  %s4406_s25 = sld [smem:[#allocation9 + $0x106]] }
 0x20e   :  { %v1682_v44 = vmul.f32 %v4352_v11, %v6347_v51  ;;  %v1448_v48 = vmul.f32 %v6348_v39, %v4355_v26  ;;  %v6349_v55 = vmov %v6345_v19  ;;  %v1922_v31 = vadd.f32 %v1920_v15, %v1917_v56  ;;  %s6360_s12 = sld [smem:[#allocation42_spill]] }
 0x20f   :  { %v1515_v24 = vmul.f32 %v6349_v55, %v4355_v26  ;;  %v1923_v53 = vadd.f32 %v1921_v42, %v1918_v36  ;;  %v6350_v4 = vmov %v6346_v14  ;;  %v6351_v30 = vmov %v6347_v51  ;;  %s6362_s7 = sld [smem:[#allocation45_spill]] }
 0x210   :  { %v1598_v20 = vmul.f32 %v6350_v4, %v4355_v26  ;;  %v1681_v19 = vmul.f32 %v6351_v30, %v4355_v26  ;;  %v6353_v14 = vstv %s6343_s21  ;;  %v6355_v39 = vstv %s6251_s3  ;;  %v4399_v36 = vpop.f32.mrf.mxu1  ;;  %s6366_s21 = sld [smem:[#allocation52_spill]] }
 0x211   :  { %v1765_v51 = vmul.f32 %v4352_v11, %v6353_v14  ;;  %v1925_v57 = vmul.f32 %v6355_v39, %v4295_v34  ;;  %v1451_v55 = vadd.f32 %v1449_v49, %v1446_v21  ;;  %v1844_v15 = vadd.f32 %v1842_v29, %v1839_v35 }
 0x212   :  { %v6356_v42 = vstv %s3901_s11  ;;  %v1518_v4 = vadd.f32 %v1516_v58, %v1513_v43  ;;  %v1601_v30 = vadd.f32 %v1599_v40, %v1596_v38  ;;  %v4401_v62 = vadd.f32 %v1682_v44, %v1679_v33  ;;  %v4414_v43 = vpop.f32.mrf.mxu1 }
 0x213   :  { %v1848_v56 = vmul.f32 %v4352_v11, %v6356_v42  ;;  %v1764_v22 = vmul.f32 %v6353_v14, %v4355_v26  ;;  %v1450_v35 = vadd.f32 %v1448_v48, %v1445_v16  ;;  %v6358_v21 = vstv %s6352_s24  ;;  %6361 = vst [vmem:[#allocation89_spill] sm:$0xff] %v4414_v43  ;;  %s6372_s24 = sld [smem:[#allocation72_spill]] }
 0x214   :  { %v1454_v49 = vmul.f32 %v4399_v36, %v6358_v21  ;;  %v1517_v29 = vadd.f32 %v1515_v24, %v1512_v27  ;;  %v6359_v39 = vstv %s6354_s18  ;;  %v1600_v38 = vadd.f32 %v1598_v20, %v1595_v25  ;;  %s4443_s18 = sld [smem:[#allocation9 + $0x181]] }
 0x215   :  { %v1521_v42 = vmul.f32 %v4399_v36, %v6359_v39  ;;  %v4416_v33 = vadd.f32 %v1681_v19, %v1678_v23  ;;  %v4418_v58 = vadd.f32 %v1765_v51, %v1762_v41  ;;  %v6363_v40 = vstv %s3901_s11  ;;  %s6371_s11 = sld [smem:[#allocation71_spill]] }
 0x216   :  { %v1847_v16 = vmul.f32 %v6363_v40, %v4355_v26  ;;  %v6364_v44 = vmov %v6358_v21  ;;  %v1456_v48 = vadd.f32 %v1454_v49, %v1451_v55  ;;  %v6365_v24 = vmov %v6359_v39 }
 0x217   :  { %v1453_v27 = vmul.f32 %v6364_v44, %v4414_v43  ;;  %v1520_v14 = vmul.f32 %v6365_v24, %v4414_v43  ;;  %v1523_v25 = vadd.f32 %v1521_v42, %v1518_v4  ;;  %v6367_v23 = vstv %s6357_s8  ;;  %s6374_s8 = sld [smem:[#allocation73_spill]] }
 0x218   :  { %v1603_v41 = vmul.f32 %v6367_v23, %v4414_v43  ;;  %v6368_v20 = vmov %v6367_v23  ;;  %v1766_v51 = vadd.f32 %v1764_v22, %v1761_v6  ;;  %v4437_v21 = vadd.f32 %v1848_v56, %v1845_v60 }
 0x219   :  { %v1604_v19 = vmul.f32 %v4399_v36, %v6368_v20  ;;  %v1455_v55 = vadd.f32 %v1453_v27, %v1450_v35  ;;  %v6369_v49 = vstv %s6360_s12  ;;  %v1522_v40 = vadd.f32 %v1520_v14, %v1517_v29  ;;  %s4732_s12 = sld [smem:[#allocation9 + $0x302]] }
 0x21a   :  { %v1459_v39 = vadd.f32 %v6369_v49, %v1456_v48  ;;  %v6370_v44 = vstv %s6362_s7  ;;  %v6373_v24 = vstv %s6251_s3  ;;  %v1927_v6 = vadd.f32 %v1925_v57, %v1922_v31  ;;  %s4519_s3 = sld [smem:[#allocation9 + $0x182]] }
 0x21b   :  { %v1526_v4 = vadd.f32 %v6370_v44, %v1523_v25  ;;  %v1926_v23 = vmul.f32 %v4290_v28, %v6373_v24  ;;  %v6375_v22 = vstv %s6366_s21  ;;  %v6376_v56 = vmov %v6369_v49  ;;  %s6432_s7 = sld [smem:[#allocation62_spill]] }
 0x21c   :  { %v1930_v60 = vmul.f32 %v6375_v22, %v4355_v26  ;;  %v1458_v35 = vadd.f32 %v6376_v56, %v1455_v55  ;;  %v6377_v27 = vmov %v6370_v44  ;;  %v1605_v48 = vadd.f32 %v1603_v41, %v1600_v38  ;;  %s4754_s21 = sld [smem:[#allocation9 + $0x206]] }
 0x21d   :  { %v1525_v29 = vadd.f32 %v6377_v27, %v1522_v40  ;;  %v4456_v14 = vadd.f32 %v1847_v16, %v1844_v15  ;;  %v4458_v25 = vmax.f32 %v1459_v39, 0.0  ;;  %v4460_v20 = vmax.f32 %v1526_v4, 0.0 }
 0x21e   :  { %v6379_v57 = vmov %v6375_v22  ;;  %v4468_v49 = vmax.f32 %v1458_v35, 0.0  ;;  %v1606_v38 = vadd.f32 %v1604_v19, %v1601_v30  ;;  %v6380_v15 = vstv %s6371_s11  ;;  %s4759_s11 = sld [smem:[#allocation9 + $0x304]] }
 0x21f   :  { %v4465_v31 = vmul.f32 %v4352_v11, %v6379_v57  ;;  %v1687_v16 = vmul.f32 %v4399_v36, %v6380_v15  ;;  %v6381_v41 = vstv %s6372_s24  ;;  %v4478_v40 = vmax.f32 %v1525_v29, 0.0  ;;  %s4796_s24 = sld [smem:[#allocation4 + $0x384]] }
 0x220   :  { %v4476_v39 = vmul.f32 %v4399_v36, %v6381_v41  ;;  %v6382_v44 = vstv %s6374_s8  ;;  %v4485_v24 = vadd.f32 %v1926_v23, %v1923_v53  ;;  %v4487_v30 = vadd.f32 %v1930_v60, %v1927_v6 }
 0x221   :  { %v4483_v4 = vmul.f32 %v4399_v36, %v6382_v44  ;;  %v6383_v19 = vstv %s6378_s23  ;;  %v6384_v56 = vmov %v6380_v15  ;;  %v6385_v27 = vmov %v6381_v41 }
 0x222   :  { %v1608_v22 = vadd.f32 %v6383_v19, %v1605_v48  ;;  %v1686_v35 = vmul.f32 %v6384_v56, %v4414_v43  ;;  %v1769_v29 = vmul.f32 %v6385_v27, %v4414_v43  ;;  %v1471_v57 = vstv %s4429_s20  ;;  %s4576_s20 = sld [smem:[#allocation9 + $0x203]] }
 0x223   :  { %v6386_v15 = vstv %s4095_s6  ;;  %v6387_v53 = vstv %s4160_s1  ;;  %v1470_v6 = vmul.f32 %v1468_v32, %v4458_v25  ;;  %v6388_v60 = vstv %s4106_s22  ;;  %s6394_s6 = sld [smem:[#allocation41_spill]] }
 0x224   :  { %v1464_v41 = vmul.f32 %v6386_v15, %v4458_v25  ;;  %v1467_v23 = vmul.f32 %v6387_v53, %v4458_v25  ;;  %v1531_v48 = vmul.f32 %v6388_v60, %v4460_v20  ;;  %v6389_v44 = vmov %v6386_v15  ;;  %s4531_s1 = sld [smem:[#allocation9 + $0x200]] }
 0x225   :  { %v1463_v19 = vmul.f32 %v6389_v44, %v4468_v49  ;;  %v6390_v56 = vmov %v6387_v53  ;;  %v1544_v55 = vstv %s4443_s18  ;;  %v6391_v42 = vstv %s6378_s23  ;;  %s4546_s22 = sld [smem:[#allocation9 + $0x201]] }
 0x226   :  { %v1466_v27 = vmul.f32 %v6390_v56, %v4468_v49  ;;  %v1609_v46 = vadd.f32 %v6391_v42, %v1606_v38  ;;  %v1469_v15 = vmul.f32 %v1468_v32, %v4468_v49  ;;  %v1472_v53 = vmul.f32 %v1471_v57, %v4468_v49  ;;  %s4565_s23 = sld [smem:[#allocation9 + $0x183]] }
 0x227   :  { %v6392_v17 = vmov %v6388_v60  ;;  %v1535_v44 = vmul.f32 %v6393_v2, %v4478_v40  ;;  %v6395_v56 = vmov %v6393_v2  ;;  %v6396_v38 = vstv %s4297_s5  ;;  %s4715_s5 = sld [smem:[#allocation9 + $0x300]] }
 0x228   :  { %v1530_v60 = vmul.f32 %v6392_v17, %v4478_v40  ;;  %v1536_v42 = vmul.f32 %v6395_v56, %v4460_v20  ;;  %v1540_v13 = vmul.f32 %v6396_v38, %v4478_v40  ;;  %v6397_v32 = vmov %v6396_v38  ;;  %s4778_s18 = sld [smem:[#allocation9 + $0x305]] }
 0x229   :  { %v1541_v12 = vmul.f32 %v6397_v32, %v4460_v20  ;;  %v1545_v61 = vmul.f32 %v1544_v55, %v4478_v40  ;;  %v4543_v10 = vmax.f32 %v1608_v22, 0.0  ;;  %v1689_v17 = vadd.f32 %v1687_v16, %v4401_v62 }
 0x22a   :  { %v1473_v2 = vmul.f32 %v1471_v57, %v4458_v25  ;;  %v1546_v18 = vmul.f32 %v1544_v55, %v4460_v20  ;;  %v1688_v56 = vadd.f32 %v1686_v35, %v4416_v33  ;;  %v1771_v38 = vadd.f32 %v1769_v29, %v1766_v51 }
 0x22b   :  { %v6398_v59 = vstv %s6374_s8  ;;  %v4558_v62 = vmax.f32 %v1609_v46, 0.0  ;;  %v6399_v16 = vstv %s6394_s6  ;;  %v1532_v55 = vadd.f32 %v1530_v60, %v1463_v19  ;;  %s6435_s8 = sld [smem:[#allocation18_spill]] }
 0x22c   :  { %v4554_v32 = vmul.f32 %v6398_v59, %v4414_v43  ;;  %v4563_v22 = vmul.f32 %v6399_v16, %v4414_v43  ;;  %v1533_v33 = vadd.f32 %v1531_v48, %v1464_v41  ;;  %v1537_v51 = vadd.f32 %v1535_v44, %v1466_v27 }
 0x22d   :  { %v1538_v59 = vadd.f32 %v1536_v42, %v1467_v23  ;;  %v1542_v35 = vadd.f32 %v1540_v13, %v1469_v15  ;;  %v1543_v29 = vadd.f32 %v1541_v12, %v1470_v6  ;;  %v1547_v46 = vadd.f32 %v1545_v61, %v1472_v53 }
 0x22e   :  { %v1548_v57 = vadd.f32 %v1546_v18, %v1473_v2  ;;  %v6400_v52 = vstv %s4120_s28  ;;  %v1618_v19 = vmul.f32 %v6401_v9, %v4543_v10  ;;  %v6402_v41 = vstv %s4299_s0  ;;  %s4606_s0 = sld [smem:[#allocation9 + $0x204]] }
 0x22f   :  { %v1613_v16 = vmul.f32 %v6400_v52, %v4543_v10  ;;  %v1623_v48 = vmul.f32 %v6402_v41, %v4543_v10  ;;  %v1474_v27 = vstv %s4531_s1  ;;  %v6403_v23 = vmov %v6400_v52  ;;  %s4635_s28 = sld [smem:[#allocation9 + $0x280]] }
 0x230   :  { %v1614_v60 = vmul.f32 %v6403_v23, %v4558_v62  ;;  %v6404_v13 = vstv %s3935_s26  ;;  %v1475_v6 = vmul.f32 %v1474_v27, %v4468_v49  ;;  %v1549_v52 = vstv %s4546_s22  ;;  %s4598_s26 = sld [smem:[#allocation9 + $0x184]] }
 0x231   :  { %v1691_v12 = vadd.f32 %v6404_v13, %v1688_v56  ;;  %v6405_v61 = vmov %v6404_v13  ;;  %v6406_v15 = vmov %v6401_v9  ;;  %v6407_v53 = vmov %v6402_v41  ;;  %s6436_s1 = sld [smem:[#allocation19_spill]] }
 0x232   :  { %v1692_v18 = vadd.f32 %v6405_v61, %v1689_v17  ;;  %v1619_v9 = vmul.f32 %v6406_v15, %v4558_v62  ;;  %v1624_v44 = vmul.f32 %v6407_v53, %v4558_v62  ;;  %v1476_v42 = vmul.f32 %v1474_v27, %v4458_v25  ;;  %s4810_s22 = sld [smem:[#allocation4 + $0x387]] }
 0x233   :  { %v1550_v2 = vmul.f32 %v1549_v52, %v4478_v40  ;;  %v1551_v41 = vmul.f32 %v1549_v52, %v4460_v20  ;;  %v1627_v23 = vstv %s4519_s3  ;;  %v1615_v56 = vadd.f32 %v1613_v16, %v1532_v55  ;;  %s4800_s3 = sld [smem:[#allocation4 + $0x385]] }
 0x234   :  { %v1616_v13 = vadd.f32 %v1614_v60, %v1533_v33  ;;  %v1620_v17 = vadd.f32 %v1618_v19, %v1537_v51  ;;  %v1625_v61 = vadd.f32 %v1623_v48, %v1542_v35  ;;  %v1628_v5 = vmul.f32 %v1627_v23, %v4543_v10 }
 0x235   :  { %v1632_v15 = vstv %s4556_s15  ;;  %v4602_v53 = vmax.f32 %v1691_v12, 0.0  ;;  %v4604_v27 = vmax.f32 %v1692_v18, 0.0  ;;  %v1552_v55 = vadd.f32 %v1550_v2, %v1475_v6  ;;  %s4820_s15 = sld [smem:[#allocation9 + $0x380]] }
 0x236   :  { %v1621_v33 = vadd.f32 %v1619_v9, %v1538_v59  ;;  %v1626_v51 = vadd.f32 %v1624_v44, %v1543_v29  ;;  %v1629_v35 = vmul.f32 %v1627_v23, %v4558_v62  ;;  %v1553_v16 = vadd.f32 %v1551_v41, %v1476_v42 }
 0x237   :  { %v1630_v19 = vadd.f32 %v1628_v5, %v1547_v46  ;;  %v1710_v48 = vstv %s4565_s23  ;;  %v1772_v60 = vadd.f32 %v4476_v39, %v4418_v58  ;;  %v1633_v18 = vmul.f32 %v1632_v15, %v4543_v10  ;;  %s4829_s23 = sld [smem:[#allocation9 + $0x381]] }
 0x238   :  { %v1631_v12 = vadd.f32 %v1629_v35, %v1548_v57  ;;  %v1634_v52 = vmul.f32 %v1632_v15, %v4558_v62  ;;  %v6408_v6 = vstv %s3941_s13  ;;  %v6409_v29 = vstv %s4135_s30  ;;  %s4639_s30 = sld [smem:[#allocation9 + $0x281]] }
 0x239   :  { %v1774_v59 = vadd.f32 %v6408_v6, %v1771_v38  ;;  %v1696_v9 = vmul.f32 %v6409_v29, %v4602_v53  ;;  %v6410_v44 = vmov %v6409_v29  ;;  %v6411_v5 = vstv %s4180_s14  ;;  %s4693_s14 = sld [smem:[#allocation9 + $0x185]] }
 0x23a   :  { %v1697_v2 = vmul.f32 %v6410_v44, %v4604_v27  ;;  %v1701_v46 = vmul.f32 %v6411_v5, %v4602_v53  ;;  %v1715_v42 = vstv %s4576_s20  ;;  %v1635_v41 = vadd.f32 %v1633_v18, %v1552_v55  ;;  %s4838_s20 = sld [smem:[#allocation9 + $0x382]] }
 0x23b   :  { %v6412_v58 = vmov %v6411_v5  ;;  %v6413_v57 = vstv %s4320_s2  ;;  %v1636_v35 = vadd.f32 %v1634_v52, %v1553_v16  ;;  %v1698_v6 = vadd.f32 %v1696_v9, %v1615_v56  ;;  %s4657_s2 = sld [smem:[#allocation9 + $0x284]] }
 0x23c   :  { %v1702_v39 = vmul.f32 %v6412_v58, %v4604_v27  ;;  %v1706_v23 = vmul.f32 %v6413_v57, %v4602_v53  ;;  %v6414_v15 = vmov %v6413_v57  ;;  %v1703_v29 = vadd.f32 %v1701_v46, %v1620_v17 }
 0x23d   :  { %v1707_v38 = vmul.f32 %v6414_v15, %v4604_v27  ;;  %v6415_v44 = vstv %s3941_s13  ;;  %v1699_v55 = vadd.f32 %v1697_v2, %v1616_v13  ;;  %v4641_v47 = vmax.f32 %v1774_v59, 0.0  ;;  %s4653_s13 = sld [smem:[#allocation9 + $0x283]] }
 0x23e   :  { %v1775_v5 = vadd.f32 %v6415_v44, %v1772_v60  ;;  %v1704_v18 = vadd.f32 %v1702_v39, %v1621_v33  ;;  %v1708_v58 = vadd.f32 %v1706_v23, %v1625_v61  ;;  %v1711_v15 = vmul.f32 %v1710_v48, %v4602_v53 }
 0x23f   :  { %v1709_v57 = vadd.f32 %v1707_v38, %v1626_v51  ;;  %v1712_v16 = vmul.f32 %v1710_v48, %v4604_v27  ;;  %v1716_v56 = vmul.f32 %v1715_v42, %v4602_v53  ;;  %v1717_v17 = vmul.f32 %v1715_v42, %v4604_v27 }
 0x240   :  { %v1793_v13 = vstv %s4598_s26  ;;  %v1798_v33 = vstv %s4606_s0  ;;  %v1854_v61 = vadd.f32 %v4554_v32, %v4456_v14  ;;  %v1713_v51 = vadd.f32 %v1711_v15, %v1630_v19  ;;  %s4849_s26 = sld [smem:[#allocation9 + $0x383]] }
 0x241   :  { %v1714_v60 = vadd.f32 %v1712_v16, %v1631_v12  ;;  %v1718_v52 = vadd.f32 %v1716_v56, %v1635_v41  ;;  %v4655_v59 = vmax.f32 %v1775_v5, 0.0  ;;  %v1719_v48 = vadd.f32 %v1717_v17, %v1636_v35  ;;  %s4857_s0 = sld [smem:[#allocation9 + $0x384]] }
 0x242   :  { %v6416_v9 = vstv %s4151_s10  ;;  %v6417_v46 = vstv %s4226_s29  ;;  %v1855_v32 = vadd.f32 %v4483_v4, %v4437_v21  ;;  %v1477_v19 = vstv %s4635_s28  ;;  %s4699_s10 = sld [smem:[#allocation9 + $0x205]] }
 0x243   :  { %v1779_v2 = vmul.f32 %v6416_v9, %v4641_v47  ;;  %v1784_v14 = vmul.f32 %v6417_v46, %v4641_v47  ;;  %v6418_v12 = vstv %s4344_s27  ;;  %v1794_v41 = vmul.f32 %v1793_v13, %v4641_v47  ;;  %s4706_s29 = sld [smem:[#allocation9 + $0x186]] }
 0x244   :  { %v1789_v42 = vmul.f32 %v6418_v12, %v4641_v47  ;;  %v1799_v39 = vmul.f32 %v1798_v33, %v4641_v47  ;;  %v1478_v23 = vmul.f32 %v1477_v19, %v4468_v49  ;;  %v1479_v38 = vmul.f32 %v1477_v19, %v4458_v25  ;;  %s4880_s28 = sld [smem:[#allocation9 + $0x385]] }
 0x245   :  { %v1554_v35 = vstv %s4639_s30  ;;  %v6419_v44 = vstv %s3945_s17  ;;  %v1637_v4 = vstv %s4643_s16  ;;  %v6420_v16 = vmov %v6416_v9  ;;  %s6424_s17 = sld [smem:[#allocation63_spill]] }
 0x246   :  { %v1857_v5 = vadd.f32 %v6419_v44, %v1854_v61  ;;  %v1555_v15 = vmul.f32 %v1554_v35, %v4478_v40  ;;  %v1556_v21 = vmul.f32 %v1554_v35, %v4460_v20  ;;  %v1780_v56 = vmul.f32 %v6420_v16, %v4655_v59  ;;  %s6443_s30 = sld [smem:[#allocation61_spill]] }
 0x247   :  { %v1781_v17 = vadd.f32 %v1779_v2, %v1698_v6  ;;  %v6421_v9 = vmov %v6417_v46  ;;  %v1786_v12 = vadd.f32 %v1784_v14, %v1703_v29  ;;  %v6422_v43 = vmov %v6419_v44  ;;  %s4893_s16 = sld [smem:[#allocation4 + $0x403]] }
 0x248   :  { %v1785_v46 = vmul.f32 %v6421_v9, %v4655_v59  ;;  %v1858_v11 = vadd.f32 %v6422_v43, %v1855_v32  ;;  %v1557_v19 = vadd.f32 %v1555_v15, %v1478_v23  ;;  %v1558_v26 = vadd.f32 %v1556_v21, %v1479_v38 }
 0x249   :  { %v1638_v61 = vmul.f32 %v1637_v4, %v4543_v10  ;;  %v6423_v44 = vstv %s4344_s27  ;;  %v1639_v16 = vmul.f32 %v1637_v4, %v4558_v62  ;;  %v1791_v28 = vadd.f32 %v1789_v42, %v1708_v58  ;;  %s4722_s27 = sld [smem:[#allocation9 + $0x301]] }
 0x24a   :  { %v1790_v35 = vmul.f32 %v6423_v44, %v4655_v59  ;;  %v1795_v6 = vmul.f32 %v1793_v13, %v4655_v59  ;;  %v4697_v2 = vmax.f32 %v1857_v5, 0.0  ;;  %v1720_v29 = vstv %s4653_s13  ;;  %s4900_s13 = sld [smem:[#allocation4 + $0x404]] }
 0x24b   :  { %v1640_v43 = vadd.f32 %v1638_v61, %v1557_v19  ;;  %v1782_v14 = vadd.f32 %v1780_v56, %v1699_v55  ;;  %v1796_v32 = vadd.f32 %v1794_v41, %v1713_v51  ;;  %v1641_v23 = vadd.f32 %v1639_v16, %v1558_v26 }
 0x24c   :  { %v1800_v38 = vmul.f32 %v1798_v33, %v4655_v59  ;;  %v1803_v15 = vstv %s4657_s2  ;;  %v4704_v21 = vmax.f32 %v1858_v11, 0.0  ;;  %v1721_v58 = vmul.f32 %v1720_v29, %v4602_v53  ;;  %s4906_s2 = sld [smem:[#allocation4 + $0x405]] }
 0x24d   :  { %v1787_v13 = vadd.f32 %v1785_v46, %v1704_v18  ;;  %v1792_v42 = vadd.f32 %v1790_v35, %v1709_v57  ;;  %v1801_v5 = vadd.f32 %v1799_v39, %v1718_v52  ;;  %v1722_v55 = vmul.f32 %v1720_v29, %v4604_v27 }
 0x24e   :  { %v1797_v26 = vadd.f32 %v1795_v6, %v1714_v60  ;;  %v1802_v33 = vadd.f32 %v1800_v38, %v1719_v48  ;;  %v6425_v51 = vstv %s4212_s4  ;;  %v1723_v41 = vadd.f32 %v1721_v58, %v1640_v43  ;;  %s4743_s4 = sld [smem:[#allocation9 + $0x303]] }
 0x24f   :  { %v1862_v11 = vmul.f32 %v6425_v51, %v4697_v2  ;;  %v1804_v4 = vmul.f32 %v1803_v15, %v4641_v47  ;;  %v1805_v18 = vmul.f32 %v1803_v15, %v4655_v59  ;;  %v6426_v57 = vstv %s6424_s17  ;;  %s4926_s17 = sld [smem:[#allocation9 + $0x386]] }
 0x250   :  { %v1867_v52 = vmul.f32 %v6426_v57, %v4697_v2  ;;  %v1724_v60 = vadd.f32 %v1722_v55, %v1641_v23  ;;  %v6427_v48 = vmov %v6425_v51  ;;  %v6428_v9 = vmov %v6426_v57 }
 0x251   :  { %v1863_v39 = vmul.f32 %v6427_v48, %v4704_v21  ;;  %v4727_v56 = vadd.f32 %v1862_v11, %v1781_v17  ;;  %v1868_v46 = vmul.f32 %v6428_v9, %v4704_v21  ;;  %v1933_v61 = vadd.f32 %v4465_v31, %v4485_v24 }
 0x252   :  { %v4734_v19 = vadd.f32 %v1867_v52, %v1786_v12  ;;  %v6429_v44 = vstv %s6394_s6  ;;  %v1937_v16 = vadd.f32 %v4563_v22, %v4487_v30  ;;  %v6430_v6 = vstv %s4387_s9  ;;  %s4766_s9 = sld [smem:[#allocation9 + $0x286]] }
 0x253   :  { %v1936_v35 = vmul.f32 %v4399_v36, %v6429_v44  ;;  %v4745_v17 = vadd.f32 %v1863_v39, %v1782_v14  ;;  %v1872_v43 = vmul.f32 %v6430_v6, %v4697_v2  ;;  %v6431_v12 = vmov %v6430_v6  ;;  %s4806_s6 = sld [smem:[#allocation4 + $0x386]] }
 0x254   :  { %v1873_v29 = vmul.f32 %v6431_v12, %v4704_v21  ;;  %v1876_v23 = vstv %s4693_s14  ;;  %v1806_v31 = vadd.f32 %v1804_v4, %v1723_v41  ;;  %v4756_v24 = vadd.f32 %v1868_v46, %v1787_v13  ;;  %s4916_s14 = sld [smem:[#allocation4 + $0x406]] }
 0x255   :  { %v1881_v30 = vstv %s4699_s10  ;;  %v1938_v22 = vadd.f32 %v1936_v35, %v1933_v61  ;;  %v1807_v14 = vadd.f32 %v1805_v18, %v1724_v60  ;;  %v4761_v38 = vadd.f32 %v1872_v43, %v1791_v28  ;;  %s4920_s10 = sld [smem:[#allocation9 + $0x306]] }
 0x256   :  { %v4763_v15 = vadd.f32 %v1873_v29, %v1792_v42  ;;  %v1877_v58 = vmul.f32 %v1876_v23, %v4697_v2  ;;  %v1480_v55 = vstv %s4715_s5  ;;  %v1878_v13 = vmul.f32 %v1876_v23, %v4704_v21  ;;  %s4942_s5 = sld [smem:[#allocation9 + $0x87]] }
 0x257   :  { %v1882_v51 = vmul.f32 %v1881_v30, %v4697_v2  ;;  %v6433_v11 = vstv %s6432_s7  ;;  %v1481_v4 = vmul.f32 %v1480_v55, %v4468_v49  ;;  %v1482_v28 = vmul.f32 %v1480_v55, %v4458_v25  ;;  %s4960_s7 = sld [smem:[#allocation9 + $0x287]] }
 0x258   :  { %v1940_v41 = vadd.f32 %v6433_v11, %v1937_v16  ;;  %v1559_v18 = vstv %s4722_s27  ;;  %v6434_v42 = vmov %v6433_v11  ;;  %v1642_v48 = vstv %s4732_s12  ;;  %s4948_s27 = sld [smem:[#allocation9 + $0x107]] }
 0x259   :  { %v1941_v57 = vadd.f32 %v6434_v42, %v1938_v22  ;;  %v1560_v52 = vmul.f32 %v1559_v18, %v4478_v40  ;;  %v1561_v60 = vmul.f32 %v1559_v18, %v4460_v20  ;;  %v1883_v39 = vmul.f32 %v1881_v30, %v4704_v21  ;;  %s4952_s12 = sld [smem:[#allocation9 + $0x187]] }
 0x25a   :  { %v1725_v9 = vstv %s4743_s4  ;;  %v1879_v46 = vadd.f32 %v1877_v58, %v1796_v32  ;;  %v1880_v61 = vadd.f32 %v1878_v13, %v1797_v26  ;;  %v1886_v44 = vstv %s4709_s19  ;;  %s4938_s19 = sld [smem:[#allocation9 + $0x7]] }
 0x25b   :  { %v1562_v35 = vadd.f32 %v1560_v52, %v1481_v4  ;;  %v1563_v16 = vadd.f32 %v1561_v60, %v1482_v28  ;;  %v1643_v6 = vmul.f32 %v1642_v48, %v4543_v10  ;;  %v1644_v43 = vmul.f32 %v1642_v48, %v4558_v62  ;;  %s4956_s4 = sld [smem:[#allocation9 + $0x207]] }
 0x25c   :  { %v4788_v12 = vadd.f32 %v1882_v51, %v1801_v5  ;;  %v4790_v29 = vadd.f32 %v1883_v39, %v1802_v33  ;;  %v4792_v23 = vmax.f32 %v1940_v41, 0.0  ;;  %v4794_v30 = vmax.f32 %v1941_v57, 0.0 }
 0x25d   :  { %v1645_v32 = vadd.f32 %v1643_v6, %v1562_v35  ;;  %v1646_v26 = vadd.f32 %v1644_v43, %v1563_v16  ;;  %v1726_v22 = vmul.f32 %v1725_v9, %v4602_v53  ;;  %v1727_v58 = vmul.f32 %v1725_v9, %v4604_v27 }
 0x25e   :  { %v1808_v5 = vstv %s4759_s11  ;;  %v1887_v33 = vmul.f32 %v1886_v44, %v4697_v2  ;;  %v1888_v55 = vmul.f32 %v1886_v44, %v4704_v21  ;;  %v1959_v13 = vstv %s4706_s29  ;;  %s4930_s29 = sld [smem:[#allocation7 + $0x7]] }
 0x25f   :  { %v1728_v51 = vadd.f32 %v1726_v22, %v1645_v32  ;;  %v1729_v11 = vadd.f32 %v1727_v58, %v1646_v26  ;;  %v1964_v41 = vstv %s4754_s21  ;;  %v1969_v4 = vstv %s4766_s9  ;;  %s4969_s21 = sld [smem:[#allocation9 + $0x307]] }
 0x260   :  { %v1809_v28 = vmul.f32 %v1808_v5, %v4641_v47  ;;  %v4813_v18 = vadd.f32 %v1887_v33, %v1806_v31  ;;  %v6437_v42 = vstv %s6435_s8  ;;  %v1990_v52 = vadd.f32 %v4091_v50, %v4012_v8  ;;  %s4976_s11 = sld [smem:[#allocation9 + $0x387]] }
 0x261   :  { %v1945_v57 = vmul.f32 %v6437_v42, %v4792_v23  ;;  %v1810_v60 = vmul.f32 %v1808_v5, %v4655_v59  ;;  %v4823_v48 = vadd.f32 %v1888_v55, %v1807_v14  ;;  %v1891_v39 = vstv %s4778_s18  ;;  %s4980_s9 = sld [smem:[#allocation4 + $0x407]] }
 0x262   :  { %v6438_v9 = vmov %v6437_v42  ;;  %v1811_v31 = vadd.f32 %v1809_v28, %v1728_v51  ;;  %v1892_v35 = vmul.f32 %v1891_v39, %v4697_v2  ;;  %v6439_v8 = vstv %s6436_s1  ;;  %s4986_s18 = sld [smem:[#allocation7 + $0x8]] }
 0x263   :  { %v1946_v44 = vmul.f32 %v6438_v9, %v4794_v30  ;;  %v4833_v16 = vadd.f32 %v1945_v57, %v4727_v56  ;;  %v1950_v50 = vmul.f32 %v6439_v8, %v4792_v23  ;;  %v1812_v6 = vadd.f32 %v1810_v60, %v1729_v11  ;;  %s5018_s8 = sld [smem:[#allocation4 + $0x482]] }
 0x264   :  { %v6440_v14 = vmov %v6439_v8  ;;  %v6441_v32 = vstv %s4406_s25  ;;  %v1893_v56 = vmul.f32 %v1891_v39, %v4704_v21  ;;  %v1960_v33 = vmul.f32 %v1959_v13, %v4792_v23  ;;  %s4871_s25 = sld [smem:[#allocation4 + $0x402]] }
 0x265   :  { %v1951_v43 = vmul.f32 %v6440_v14, %v4794_v30  ;;  %v1955_v26 = vmul.f32 %v6441_v32, %v4792_v23  ;;  %v6442_v22 = vmov %v6441_v32  ;;  %v4853_v5 = vadd.f32 %v1946_v44, %v4745_v17  ;;  %s5033_s1 = sld [smem:[#allocation4 + $0x485]] }
 0x266   :  { %v1956_v58 = vmul.f32 %v6442_v22, %v4794_v30  ;;  %v1961_v55 = vmul.f32 %v1959_v13, %v4794_v30  ;;  %v4860_v51 = vadd.f32 %v1950_v50, %v4734_v19  ;;  %v4873_v42 = vadd.f32 %v1892_v35, %v1811_v31 }
 0x267   :  { %v4863_v11 = vadd.f32 %v1951_v43, %v4756_v24  ;;  %v4866_v28 = vadd.f32 %v1955_v26, %v4761_v38  ;;  %v4875_v13 = vadd.f32 %v1960_v33, %v1879_v46  ;;  %v1965_v19 = vmul.f32 %v1964_v41, %v4792_v23 }
 0x268   :  { %v4869_v17 = vadd.f32 %v1956_v58, %v4763_v15  ;;  %v4877_v57 = vadd.f32 %v1961_v55, %v1880_v61  ;;  %v1483_v24 = vstv %s4820_s15  ;;  %v4883_v38 = vadd.f32 %v1893_v56, %v1812_v6  ;;  %s5040_s15 = sld [smem:[#allocation9 + $0x8]] }
 0x269   :  { %v4886_v15 = vmul.f32 %v1964_v41, %v4794_v30  ;;  %v4891_v46 = vmul.f32 %v1969_v4, %v4792_v23  ;;  %v1484_v61 = vmul.f32 %v1483_v24, %v4468_v49  ;;  %v1485_v60 = vmul.f32 %v1483_v24, %v4458_v25 }
 0x26a   :  { %v1564_v39 = vstv %s4829_s23  ;;  %v1991_v9 = vadd.f32 %v4054_v45, %v3978_v54  ;;  %v1647_v31 = vstv %s4838_s20  ;;  %v1995_v35 = vadd.f32 %v4174_v37, %v1990_v52  ;;  %s5054_s23 = sld [smem:[#allocation9 + $0x88]] }
 0x26b   :  { %v1565_v41 = vmul.f32 %v1564_v39, %v4478_v40  ;;  %v1566_v44 = vmul.f32 %v1564_v39, %v4460_v20  ;;  %v1730_v8 = vstv %s4849_s26  ;;  %v6444_v49 = vstv %s6443_s30  ;;  %s5065_s20 = sld [smem:[#allocation9 + $0x108]] }
 0x26c   :  { %v1998_v25 = vmul.f32 %v6444_v49, %v4176_v7  ;;  %v6445_v50 = vmov %v6444_v49  ;;  %v2002_v45 = vstv %s4796_s24  ;;  %v1648_v20 = vmul.f32 %v1647_v31, %v4543_v10  ;;  %s5011_s24 = sld [smem:[#allocation4 + $0x481]] }
 0x26d   :  { %v1999_v6 = vmul.f32 %v4158_v3, %v6445_v50  ;;  %v1567_v54 = vadd.f32 %v1565_v41, %v1484_v61  ;;  %v1568_v40 = vadd.f32 %v1566_v44, %v1485_v60  ;;  %v1649_v14 = vmul.f32 %v1647_v31, %v4558_v62  ;;  %v6446_v41 = vld [vmem:[#allocation86_spill] sm:$0xff]  ;;  %s5069_s26 = sld [smem:[#allocation9 + $0x188]] }
 0x26e   :  { %v1731_v37 = vmul.f32 %v1730_v8, %v4602_v53  ;;  %v1732_v52 = vmul.f32 %v1730_v8, %v4604_v27  ;;  %v1813_v43 = vstv %s4857_s0  ;;  %v1996_v32 = vadd.f32 %v4156_v1, %v1991_v9  ;;  %s5071_s0 = sld [smem:[#allocation9 + $0x208]] }
 0x26f   :  { %v1650_v26 = vadd.f32 %v1648_v20, %v1567_v54  ;;  %v1651_v22 = vadd.f32 %v1649_v14, %v1568_v40  ;;  %v2003_v10 = vmul.f32 %v2002_v45, %v4241_v0  ;;  %v2004_v62 = vmul.f32 %v4232_v63, %v2002_v45  ;;  %s5084_s30 = sld [smem:[#allocation9 + $0x388]] }
 0x270   :  { %v4933_v53 = vadd.f32 %v1965_v19, %v4788_v12  ;;  %v1971_v27 = vmul.f32 %v1969_v4, %v4794_v30  ;;  %v2000_v1 = vadd.f32 %v1998_v25, %v1995_v35  ;;  %v2001_v58 = vadd.f32 %v1999_v6, %v1996_v32  ;;  %v6447_v35 = vld [vmem:[#allocation88_spill] sm:$0xff]  ;;  %v6449_v6 = vld [vmem:[#allocation89_spill] sm:$0xff] }
 0x271   :  { %v1733_v56 = vadd.f32 %v1731_v37, %v1650_v26  ;;  %v1734_v33 = vadd.f32 %v1732_v52, %v1651_v22  ;;  %v1814_v55 = vmul.f32 %v1813_v43, %v4641_v47  ;;  %v1896_v24 = vstv %s4880_s28  ;;  %s5080_s28 = sld [smem:[#allocation9 + $0x308]] }
 0x272   :  { %v1815_v61 = vmul.f32 %v1813_v43, %v4655_v59  ;;  %v2007_v60 = vstv %s4800_s3  ;;  %v2012_v39 = vstv %s4806_s6  ;;  %v2017_v12 = vstv %s4810_s22  ;;  %v6448_v59 = vld [vmem:[#allocation87_spill] sm:$0xff]  ;;  %s5024_s3 = sld [smem:[#allocation4 + $0x483]] }
 0x273   :  { %v2005_v19 = vadd.f32 %v2003_v10, %v2000_v1  ;;  %v2006_v4 = vadd.f32 %v2004_v62, %v2001_v58  ;;  %v2008_v9 = vmul.f32 %v2007_v60, %v4295_v34  ;;  %v2009_v44 = vmul.f32 %v6446_v41, %v2007_v60  ;;  %s5028_s6 = sld [smem:[#allocation4 + $0x484]] }
 0x274   :  { %v1816_v47 = vadd.f32 %v1814_v55, %v1733_v56  ;;  %v1817_v31 = vadd.f32 %v1815_v61, %v1734_v33  ;;  %v2013_v8 = vmul.f32 %v2012_v39, %v6447_v35  ;;  %v2014_v49 = vmul.f32 %v6448_v59, %v2012_v39  ;;  %v6450_v39 = vld [vmem:[#allocation84_spill] sm:$0xff]  ;;  %s5035_s22 = sld [smem:[#allocation4 + $0x486]] }
 0x275   :  { %v2010_v25 = vadd.f32 %v2008_v9, %v2005_v19  ;;  %v2011_v50 = vadd.f32 %v2009_v44, %v2006_v4  ;;  %v2018_v45 = vmul.f32 %v2017_v12, %v6449_v6  ;;  %v2019_v54 = vmul.f32 %v4399_v36, %v2017_v12  ;;  %v6451_v12 = vld [vmem:[#allocation82_spill] sm:$0xff] }
 0x276   :  { %v1897_v40 = vmul.f32 %v1896_v24, %v4697_v2  ;;  %v1898_v20 = vmul.f32 %v1896_v24, %v4704_v21  ;;  %v4966_v14 = vadd.f32 %v4886_v15, %v4790_v29  ;;  %v1974_v37 = vstv %s4920_s10  ;;  %s5142_s10 = sld [smem:[#allocation4 + $0x500]] }
 0x277   :  { %v4973_v52 = vadd.f32 %v4891_v46, %v4813_v18  ;;  %v1979_v43 = vstv %s4926_s17  ;;  %v2015_v32 = vadd.f32 %v2013_v8, %v2010_v25  ;;  %v2016_v26 = vadd.f32 %v2014_v49, %v2011_v50  ;;  %v6452_v49 = vld [vmem:[#allocation78_spill] sm:$0xff]  ;;  %v6453_v25 = vld [vmem:[#allocation85_spill] sm:$0xff]  ;;  %s5148_s17 = sld [smem:[#allocation4 + $0x501]] }
 0x278   :  { %v1899_v2 = vadd.f32 %v1897_v40, %v1816_v47  ;;  %v1900_v22 = vadd.f32 %v1898_v20, %v1817_v31  ;;  %v1975_v21 = vmul.f32 %v1974_v37, %v4792_v23  ;;  %v2022_v29 = vstv %s4930_s29  ;;  %s5152_s29 = sld [smem:[#allocation4 + $0x502]] }
 0x279   :  { %v4983_v15 = vadd.f32 %v1971_v27, %v4823_v48  ;;  %v1976_v18 = vmul.f32 %v1974_v37, %v4794_v30  ;;  %v2020_v46 = vadd.f32 %v2018_v45, %v2015_v32  ;;  %v2021_v10 = vadd.f32 %v2019_v54, %v2016_v26  ;;  %v6454_v45 = vld [vmem:[#allocation76_spill] sm:$0xff]  ;;  %v6455_v54 = vld [vmem:[#allocation83_spill] sm:$0xff] }
 0x27a   :  { %v4989_v62 = vadd.f32 %v1975_v21, %v4873_v42  ;;  %v1980_v1 = vmul.f32 %v1979_v43, %v4792_v23  ;;  %v1981_v58 = vmul.f32 %v1979_v43, %v4794_v30  ;;  %v2075_v48 = vstv %s4871_s25  ;;  %s5075_s25 = sld [smem:[#allocation9 + $0x288]] }
 0x27b   :  { %v4995_v27 = vadd.f32 %v1976_v18, %v4883_v38  ;;  %v2023_v56 = vadd.f32 %v2022_v29, %v2020_v46  ;;  %v2024_v33 = vadd.f32 %v2022_v29, %v2021_v10  ;;  %v2027_v55 = vstv %s4938_s19  ;;  %s5157_s19 = sld [smem:[#allocation4 + $0x503]] }
 0x27c   :  { %v4998_v24 = vadd.f32 %v1980_v1, %v1899_v2  ;;  %v5000_v61 = vadd.f32 %v1981_v58, %v1900_v22  ;;  %v2032_v42 = vstv %s4942_s5  ;;  %v2037_v23 = vstv %s4948_s27  ;;  %s5159_s5 = sld [smem:[#allocation4 + $0x504]] }
 0x27d   :  { %v2042_v60 = vstv %s4952_s12  ;;  %v2076_v30 = vmul.f32 %v2075_v48, %v6450_v39  ;;  %v2077_v19 = vmul.f32 %v6451_v12, %v2075_v48  ;;  %v2080_v4 = vstv %s4893_s16  ;;  %s5096_s16 = sld [smem:[#allocation4 + $0x487]] }
 0x27e   :  { %v2025_v9 = vmax.f32 %v2023_v56, 0.0  ;;  %v2047_v38 = vstv %s4956_s4  ;;  %v2052_v44 = vstv %s4960_s7  ;;  %v2085_v47 = vstv %s4900_s13  ;;  %s5104_s13 = sld [smem:[#allocation7 + $0x9]] }
 0x27f   :  { %v2026_v31 = vmax.f32 %v2024_v33, 0.0  ;;  %v2057_v8 = vstv %s4969_s21  ;;  %v2073_v50 = vadd.f32 %v6453_v25, %v6452_v49  ;;  %v2074_v40 = vadd.f32 %v6455_v54, %v6454_v45  ;;  %s5164_s27 = sld [smem:[#allocation4 + $0x505]] }
 0x280   :  { %v2062_v20 = vstv %s4976_s11  ;;  %v2081_v37 = vmul.f32 %v2080_v4, %v4176_v7  ;;  %v2082_v43 = vmul.f32 %v4158_v3, %v2080_v4  ;;  %v2086_v32 = vmul.f32 %v2085_v47, %v4241_v0  ;;  %s5178_s12 = sld [smem:[#allocation9 + $0x109]] }
 0x281   :  { %v2078_v26 = vadd.f32 %v2076_v30, %v2073_v50  ;;  %v2079_v2 = vadd.f32 %v2077_v19, %v2074_v40  ;;  %v2087_v22 = vmul.f32 %v4232_v63, %v2085_v47  ;;  %v2090_v21 = vstv %s4906_s2  ;;  %s5114_s2 = sld [smem:[#allocation9 + $0x9]] }
 0x282   :  { %v2028_v29 = vmul.f32 %v2027_v55, %v2025_v9  ;;  %v2095_v18 = vstv %s4916_s14  ;;  %v2100_v46 = vstv %s4980_s9  ;;  %v2105_v10 = vstv %s4986_s18  ;;  %s5118_s14 = sld [smem:[#allocation9 + $0x89]] }
 0x283   :  { %v2029_v1 = vmul.f32 %v2027_v55, %v2026_v31  ;;  %v2033_v58 = vmul.f32 %v2032_v42, %v2025_v9  ;;  %v2034_v48 = vmul.f32 %v2032_v42, %v2026_v31  ;;  %v2038_v56 = vmul.f32 %v2037_v23, %v2025_v9  ;;  %s5189_s4 = sld [smem:[#allocation9 + $0x189]] }
 0x284   :  { %v5038_v33 = vadd.f32 %v2028_v29, %v4833_v16  ;;  %v2039_v30 = vmul.f32 %v2037_v23, %v2026_v31  ;;  %v2043_v19 = vmul.f32 %v2042_v60, %v2025_v9  ;;  %v2044_v4 = vmul.f32 %v2042_v60, %v2026_v31  ;;  %s5191_s7 = sld [smem:[#allocation9 + $0x209]] }
 0x285   :  { %v5043_v47 = vadd.f32 %v2029_v1, %v4853_v5  ;;  %v5046_v49 = vadd.f32 %v2033_v58, %v4860_v51  ;;  %v5049_v55 = vadd.f32 %v2034_v48, %v4863_v11  ;;  %v5052_v42 = vadd.f32 %v2038_v56, %v4866_v28  ;;  %v6456_v58 = vld [vmem:[#allocation79_spill] sm:$0xff]  ;;  %v6457_v56 = vld [vmem:[#allocation77_spill] sm:$0xff]  ;;  %s5193_s21 = sld [smem:[#allocation9 + $0x289]] }
 0x286   :  { %v5057_v16 = vadd.f32 %v2039_v30, %v4869_v17  ;;  %v5060_v23 = vadd.f32 %v2043_v19, %v4875_v13  ;;  %v5063_v5 = vadd.f32 %v2044_v4, %v4877_v57  ;;  %v2048_v60 = vmul.f32 %v2047_v38, %v2025_v9  ;;  %s5197_s11 = sld [smem:[#allocation4 + $0x506]] }
 0x287   :  { %v2083_v51 = vadd.f32 %v2081_v37, %v2078_v26  ;;  %v2084_v11 = vadd.f32 %v2082_v43, %v2079_v2  ;;  %v2091_v25 = vmul.f32 %v2090_v21, %v4295_v34  ;;  %v2092_v28 = vmul.f32 %v6446_v41, %v2090_v21  ;;  %s5208_s9 = sld [smem:[#allocation9 + $0x309]] }
 0x288   :  { %v2049_v50 = vmul.f32 %v2047_v38, %v2026_v31  ;;  %v2053_v17 = vmul.f32 %v2052_v44, %v2025_v9  ;;  %v2054_v45 = vmul.f32 %v2052_v44, %v2026_v31  ;;  %v2058_v54 = vmul.f32 %v2057_v8, %v2025_v9  ;;  %s5214_s18 = sld [smem:[#allocation9 + $0x389]] }
 0x289   :  { %v2088_v13 = vadd.f32 %v2086_v32, %v2083_v51  ;;  %v2089_v57 = vadd.f32 %v2087_v22, %v2084_v11  ;;  %v2096_v40 = vmul.f32 %v2095_v18, %v6447_v35  ;;  %v2097_v37 = vmul.f32 %v6448_v59, %v2095_v18 }
 0x28a   :  { %v5078_v43 = vadd.f32 %v2048_v60, %v4933_v53  ;;  %v2059_v26 = vmul.f32 %v2057_v8, %v2026_v31  ;;  %v2063_v2 = vmul.f32 %v2062_v20, %v2025_v9  ;;  %v2064_v38 = vmul.f32 %v2062_v20, %v2026_v31 }
 0x28b   :  { %v2093_v44 = vadd.f32 %v2091_v25, %v2088_v13  ;;  %v2094_v21 = vadd.f32 %v2092_v28, %v2089_v57  ;;  %v2101_v32 = vmul.f32 %v2100_v46, %v6449_v6  ;;  %v2102_v22 = vmul.f32 %v4399_v36, %v2100_v46  ;;  %v6459_v57 = vld [vmem:[#allocation81_spill] sm:$0xff] }
 0x28c   :  { %v5087_v29 = vadd.f32 %v2049_v50, %v4966_v14  ;;  %v5090_v53 = vadd.f32 %v2053_v17, %v4973_v52  ;;  %v5093_v9 = vadd.f32 %v2054_v45, %v4983_v15  ;;  %v2153_v31 = vstv %s5011_s24  ;;  %s5226_s24 = sld [smem:[#allocation4 + $0x507]] }
 0x28d   :  { %v5099_v8 = vadd.f32 %v2058_v54, %v4989_v62  ;;  %v5102_v20 = vadd.f32 %v2059_v26, %v4995_v27  ;;  %v2098_v14 = vadd.f32 %v2096_v40, %v2093_v44  ;;  %v2099_v18 = vadd.f32 %v2097_v37, %v2094_v21  ;;  %v6458_v54 = vld [vmem:[#allocation80_spill] sm:$0xff] }
 0x28e   :  { %v5107_v52 = vadd.f32 %v2063_v2, %v4998_v24  ;;  %v5110_v15 = vadd.f32 %v2064_v38, %v5000_v61  ;;  %v2110_v62 = vstv %s5040_s15  ;;  %v2158_v46 = vstv %s5018_s8  ;;  %s5246_s8 = sld [smem:[#allocation4 + $0x580]] }
 0x28f   :  { %v2103_v27 = vadd.f32 %v2101_v32, %v2098_v14  ;;  %v2104_v1 = vadd.f32 %v2102_v22, %v2099_v18  ;;  %v2154_v48 = vmul.f32 %v2153_v31, %v6456_v58  ;;  %v2155_v30 = vmul.f32 %v6457_v56, %v2153_v31  ;;  %s5269_s15 = sld [smem:[#allocation7 + $0xa]] }
 0x290   :  { %v2115_v24 = vstv %s5054_s23  ;;  %v2120_v19 = vstv %s5065_s20  ;;  %v2125_v61 = vstv %s5069_s26  ;;  %v2163_v4 = vstv %s5024_s3  ;;  %s5251_s3 = sld [smem:[#allocation4 + $0x581]] }
 0x291   :  { %v2106_v60 = vadd.f32 %v2105_v10, %v2103_v27  ;;  %v2107_v51 = vadd.f32 %v2105_v10, %v2104_v1  ;;  %v2159_v11 = vmul.f32 %v2158_v46, %v6450_v39  ;;  %v2160_v25 = vmul.f32 %v6451_v12, %v2158_v46  ;;  %s5275_s23 = sld [smem:[#allocation9 + $0xa]] }
 0x292   :  { %v2130_v28 = vstv %s5071_s0  ;;  %v2135_v50 = vstv %s5075_s25  ;;  %v2164_v17 = vmul.f32 %v2163_v4, %v4176_v7  ;;  %v2168_v45 = vstv %s5028_s6  ;;  %s5255_s6 = sld [smem:[#allocation4 + $0x582]] }
 0x293   :  { %v2156_v13 = vadd.f32 %v2154_v48, %v6458_v54  ;;  %v2157_v40 = vadd.f32 %v2155_v30, %v6459_v57  ;;  %v2165_v37 = vmul.f32 %v4158_v3, %v2163_v4  ;;  %v2173_v26 = vstv %s5033_s1  ;;  %s5259_s1 = sld [smem:[#allocation4 + $0x583]] }
 0x294   :  { %v2108_v2 = vmax.f32 %v2106_v60, 0.0  ;;  %v2140_v38 = vstv %s5080_s28  ;;  %v2145_v10 = vstv %s5084_s30  ;;  %v2178_v44 = vstv %s5035_s22  ;;  %s5264_s22 = sld [smem:[#allocation4 + $0x584]] }
 0x295   :  { %v2109_v21 = vmax.f32 %v2107_v51, 0.0  ;;  %v2161_v32 = vadd.f32 %v2159_v11, %v2156_v13  ;;  %v2162_v22 = vadd.f32 %v2160_v25, %v2157_v40  ;;  %v2169_v31 = vmul.f32 %v2168_v45, %v4241_v0  ;;  %s5283_s20 = sld [smem:[#allocation9 + $0x8a]] }
 0x296   :  { %v2170_v14 = vmul.f32 %v4232_v63, %v2168_v45  ;;  %v2174_v18 = vmul.f32 %v2173_v26, %v4295_v34  ;;  %v2175_v46 = vmul.f32 %v6446_v41, %v2173_v26  ;;  %v2179_v27 = vmul.f32 %v2178_v44, %v6447_v35  ;;  %s5288_s26 = sld [smem:[#allocation9 + $0x10a]] }
 0x297   :  { %v2166_v1 = vadd.f32 %v2164_v17, %v2161_v32  ;;  %v2167_v48 = vadd.f32 %v2165_v37, %v2162_v22  ;;  %v2180_v30 = vmul.f32 %v6448_v59, %v2178_v44  ;;  %v2183_v4 = vstv %s5096_s16  ;;  %s5302_s0 = sld [smem:[#allocation9 + $0x18a]] }
 0x298   :  { %v2111_v60 = vmul.f32 %v2110_v62, %v2108_v2  ;;  %v2188_v51 = vstv %s5104_s13  ;;  %v2193_v11 = vstv %s5114_s2  ;;  %v2198_v25 = vstv %s5118_s14  ;;  %s5313_s25 = sld [smem:[#allocation9 + $0x20a]] }
 0x299   :  { %v2112_v45 = vmul.f32 %v2110_v62, %v2109_v21  ;;  %v2116_v54 = vmul.f32 %v2115_v24, %v2108_v2  ;;  %v2117_v13 = vmul.f32 %v2115_v24, %v2109_v21  ;;  %v2121_v57 = vmul.f32 %v2120_v19, %v2108_v2  ;;  %s5315_s28 = sld [smem:[#allocation9 + $0x28a]] }
 0x29a   :  { %v5162_v17 = vadd.f32 %v2111_v60, %v5038_v33  ;;  %v2122_v40 = vmul.f32 %v2120_v19, %v2109_v21  ;;  %v2126_v37 = vmul.f32 %v2125_v61, %v2108_v2  ;;  %v2127_v26 = vmul.f32 %v2125_v61, %v2109_v21  ;;  %s5317_s30 = sld [smem:[#allocation4 + $0x585]] }
 0x29b   :  { %v5167_v44 = vadd.f32 %v2112_v45, %v5043_v47  ;;  %v5170_v32 = vadd.f32 %v2116_v54, %v5046_v49  ;;  %v5173_v62 = vadd.f32 %v2117_v13, %v5049_v55  ;;  %v5176_v24 = vadd.f32 %v2121_v57, %v5052_v42  ;;  %s5321_s16 = sld [smem:[#allocation9 + $0x30a]] }
 0x29c   :  { %v5181_v33 = vadd.f32 %v2122_v40, %v5057_v16  ;;  %v5184_v19 = vadd.f32 %v2126_v37, %v5060_v23  ;;  %v5187_v47 = vadd.f32 %v2127_v26, %v5063_v5  ;;  %v2131_v61 = vmul.f32 %v2130_v28, %v2108_v2  ;;  %v6460_v40 = vld [vmem:[#allocation75_spill] sm:$0xff]  ;;  %s5332_s13 = sld [smem:[#allocation4 + $0x586]] }
 0x29d   :  { %v2132_v49 = vmul.f32 %v2130_v28, %v2109_v21  ;;  %v2136_v55 = vmul.f32 %v2135_v50, %v2108_v2  ;;  %v2171_v22 = vadd.f32 %v2169_v31, %v2166_v1  ;;  %v2172_v60 = vadd.f32 %v2170_v14, %v2167_v48  ;;  %s5340_s2 = sld [smem:[#allocation9 + $0x38a]] }
 0x29e   :  { %v2137_v42 = vmul.f32 %v2135_v50, %v2109_v21  ;;  %v2141_v45 = vmul.f32 %v2140_v38, %v2108_v2  ;;  %v2142_v54 = vmul.f32 %v2140_v38, %v2109_v21  ;;  %v2146_v16 = vmul.f32 %v2145_v10, %v2108_v2  ;;  %s5368_s14 = sld [smem:[#allocation4 + $0x600]] }
 0x29f   :  { %v2176_v23 = vadd.f32 %v2174_v18, %v2171_v22  ;;  %v2177_v13 = vadd.f32 %v2175_v46, %v2172_v60  ;;  %v2184_v5 = vmul.f32 %v2183_v4, %v6449_v6  ;;  %v2185_v57 = vmul.f32 %v4399_v36, %v2183_v4 }
 0x2a0   :  { %v5200_v28 = vadd.f32 %v2131_v61, %v5078_v43  ;;  %v5203_v50 = vadd.f32 %v2132_v49, %v5087_v29  ;;  %v5206_v38 = vadd.f32 %v2136_v55, %v5090_v53  ;;  %v2147_v2 = vmul.f32 %v2145_v10, %v2109_v21  ;;  %v6461_v55 = vld [vmem:[#allocation74_spill] sm:$0xff] }
 0x2a1   :  { %v5211_v31 = vadd.f32 %v2137_v42, %v5093_v9  ;;  %v2181_v14 = vadd.f32 %v2179_v27, %v2176_v23  ;;  %v2182_v18 = vadd.f32 %v2180_v30, %v2177_v13  ;;  %v2236_v43 = vstv %s5148_s17  ;;  %s5376_s17 = sld [smem:[#allocation4 + $0x601]] }
 0x2a2   :  { %v5217_v29 = vadd.f32 %v2141_v45, %v5099_v8  ;;  %v5220_v53 = vadd.f32 %v2142_v54, %v5102_v20  ;;  %v5223_v10 = vadd.f32 %v2146_v16, %v5107_v52  ;;  %v2233_v9 = vstv %s5142_s10  ;;  %s5372_s10 = sld [smem:[#allocation4 + $0x587]] }
 0x2a3   :  { %v2186_v21 = vadd.f32 %v2184_v5, %v2181_v14  ;;  %v2187_v46 = vadd.f32 %v2185_v57, %v2182_v18  ;;  %v2237_v27 = vmul.f32 %v2236_v43, %v6456_v58  ;;  %v2241_v1 = vstv %s5152_s29  ;;  %s5382_s29 = sld [smem:[#allocation4 + $0x602]] }
 0x2a4   :  { %v5231_v8 = vadd.f32 %v2147_v2, %v5110_v15  ;;  %v2203_v20 = vstv %s5178_s12  ;;  %v2238_v48 = vmul.f32 %v6457_v56, %v2236_v43  ;;  %v2246_v30 = vstv %s5157_s19  ;;  %s5386_s19 = sld [smem:[#allocation4 + $0x603]] }
 0x2a5   :  { %v2189_v52 = vadd.f32 %v2188_v51, %v2186_v21  ;;  %v2190_v4 = vadd.f32 %v2188_v51, %v2187_v46  ;;  %v2234_v37 = vmul.f32 %v2233_v9, %v6460_v40  ;;  %v2242_v26 = vmul.f32 %v2241_v1, %v6450_v39  ;;  %s5398_s12 = sld [smem:[#allocation4 + $0x606]] }
 0x2a6   :  { %v2208_v61 = vstv %s5189_s4  ;;  %v2213_v49 = vstv %s5191_s7  ;;  %v2235_v15 = vmul.f32 %v6461_v55, %v2233_v9  ;;  %v2243_v22 = vmul.f32 %v6451_v12, %v2241_v1  ;;  %s5412_s4 = sld [smem:[#allocation7 + $0xb]] }
 0x2a7   :  { %v2218_v60 = vstv %s5193_s21  ;;  %v2239_v42 = vadd.f32 %v2237_v27, %v2234_v37  ;;  %v2247_v51 = vmul.f32 %v2246_v30, %v4176_v7  ;;  %v2251_v45 = vstv %s5159_s5  ;;  %s5391_s5 = sld [smem:[#allocation4 + $0x604]] }
 0x2a8   :  { %v2191_v54 = vmax.f32 %v2189_v52, 0.0  ;;  %v2240_v16 = vadd.f32 %v2238_v48, %v2235_v15  ;;  %v2248_v23 = vmul.f32 %v4158_v3, %v2246_v30  ;;  %v2256_v13 = vstv %s5164_s27  ;;  %s5393_s27 = sld [smem:[#allocation4 + $0x605]] }
 0x2a9   :  { %v2192_v5 = vmax.f32 %v2190_v4, 0.0  ;;  %v2223_v57 = vstv %s5208_s9  ;;  %v2244_v2 = vadd.f32 %v2242_v26, %v2239_v42  ;;  %v2261_v14 = vstv %s5197_s11  ;;  %s5423_s7 = sld [smem:[#allocation9 + $0xb]] }
 0x2aa   :  { %v2228_v18 = vstv %s5214_s18  ;;  %v2245_v43 = vadd.f32 %v2243_v22, %v2240_v16  ;;  %v2252_v9 = vmul.f32 %v2251_v45, %v4241_v0  ;;  %v2253_v21 = vmul.f32 %v4232_v63, %v2251_v45  ;;  %s5426_s21 = sld [smem:[#allocation9 + $0x8b]] }
 0x2ab   :  { %v2249_v46 = vadd.f32 %v2247_v51, %v2244_v2  ;;  %v2257_v27 = vmul.f32 %v2256_v13, %v4295_v34  ;;  %v2258_v1 = vmul.f32 %v6446_v41, %v2256_v13  ;;  %v2266_v48 = vstv %s5226_s24  ;;  %s5428_s11 = sld [smem:[#allocation9 + $0x10b]] }
 0x2ac   :  { %v2194_v30 = vmul.f32 %v2193_v11, %v2191_v54  ;;  %v2250_v52 = vadd.f32 %v2248_v23, %v2245_v43  ;;  %v2262_v4 = vmul.f32 %v2261_v14, %v6447_v35  ;;  %v2263_v37 = vmul.f32 %v6448_v59, %v2261_v14  ;;  %s5430_s9 = sld [smem:[#allocation9 + $0x18b]] }
 0x2ad   :  { %v2195_v26 = vmul.f32 %v2193_v11, %v2192_v5  ;;  %v2199_v15 = vmul.f32 %v2198_v25, %v2191_v54  ;;  %v2200_v22 = vmul.f32 %v2198_v25, %v2192_v5  ;;  %v2204_v42 = vmul.f32 %v2203_v20, %v2191_v54  ;;  %s5440_s18 = sld [smem:[#allocation9 + $0x20b]] }
 0x2ae   :  { %v5286_v51 = vadd.f32 %v2194_v30, %v5162_v17  ;;  %v2205_v45 = vmul.f32 %v2203_v20, %v2192_v5  ;;  %v2209_v16 = vmul.f32 %v2208_v61, %v2191_v54  ;;  %v2210_v23 = vmul.f32 %v2208_v61, %v2192_v5  ;;  %s5444_s24 = sld [smem:[#allocation9 + $0x28b]] }
 0x2af   :  { %v5291_v13 = vadd.f32 %v2195_v26, %v5167_v44  ;;  %v5294_v11 = vadd.f32 %v2199_v15, %v5170_v32  ;;  %v5297_v2 = vadd.f32 %v2200_v22, %v5173_v62  ;;  %v5300_v25 = vadd.f32 %v2204_v42, %v5176_v24 }
 0x2b0   :  { %v5305_v17 = vadd.f32 %v2205_v45, %v5181_v33  ;;  %v5308_v20 = vadd.f32 %v2209_v16, %v5184_v19  ;;  %v5311_v44 = vadd.f32 %v2210_v23, %v5187_v47  ;;  %v2214_v61 = vmul.f32 %v2213_v49, %v2191_v54 }
 0x2b1   :  { %v2215_v32 = vmul.f32 %v2213_v49, %v2192_v5  ;;  %v2219_v62 = vmul.f32 %v2218_v60, %v2191_v54  ;;  %v2254_v14 = vadd.f32 %v2252_v9, %v2249_v46  ;;  %v2255_v43 = vadd.f32 %v2253_v21, %v2250_v52 }
 0x2b2   :  { %v2220_v24 = vmul.f32 %v2218_v60, %v2192_v5  ;;  %v2224_v30 = vmul.f32 %v2223_v57, %v2191_v54  ;;  %v2225_v26 = vmul.f32 %v2223_v57, %v2192_v5  ;;  %v2229_v33 = vmul.f32 %v2228_v18, %v2191_v54 }
 0x2b3   :  { %v2259_v19 = vadd.f32 %v2257_v27, %v2254_v14  ;;  %v2260_v15 = vadd.f32 %v2258_v1, %v2255_v43  ;;  %v2267_v47 = vmul.f32 %v2266_v48, %v6449_v6  ;;  %v2268_v22 = vmul.f32 %v4399_v36, %v2266_v48 }
 0x2b4   :  { %v5324_v49 = vadd.f32 %v2214_v61, %v5200_v28  ;;  %v5327_v60 = vadd.f32 %v2215_v32, %v5203_v50  ;;  %v5330_v54 = vadd.f32 %v2219_v62, %v5206_v38  ;;  %v2230_v57 = vmul.f32 %v2228_v18, %v2192_v5 }
 0x2b5   :  { %v5335_v9 = vadd.f32 %v2220_v24, %v5211_v31  ;;  %v5338_v21 = vadd.f32 %v2224_v30, %v5217_v29  ;;  %v2264_v28 = vadd.f32 %v2262_v4, %v2259_v19  ;;  %v2265_v46 = vadd.f32 %v2263_v37, %v2260_v15 }
 0x2b6   :  { %v5343_v50 = vadd.f32 %v2225_v26, %v5220_v53  ;;  %v5346_v38 = vadd.f32 %v2229_v33, %v5223_v10  ;;  %v2271_v5 = vstv %s5269_s15  ;;  %v2319_v31 = vstv %s5251_s3  ;;  %s5462_s3 = sld [smem:[#allocation9 + $0x38b]] }
 0x2b7   :  { %v5351_v18 = vadd.f32 %v2230_v57, %v5231_v8  ;;  %v2269_v29 = vadd.f32 %v2267_v47, %v2264_v28  ;;  %v2270_v27 = vadd.f32 %v2268_v22, %v2265_v46  ;;  %v2316_v1 = vstv %s5246_s8  ;;  %s5456_s8 = sld [smem:[#allocation9 + $0x30b]] }
 0x2b8   :  { %v2276_v48 = vstv %s5275_s23  ;;  %v2281_v52 = vstv %s5283_s20  ;;  %v2320_v53 = vmul.f32 %v2319_v31, %v6456_v58  ;;  %v2324_v4 = vstv %s5255_s6  ;;  %s5470_s6 = sld [smem:[#allocation4 + $0x607]] }
 0x2b9   :  { %v2272_v37 = vadd.f32 %v2271_v5, %v2269_v29  ;;  %v2273_v10 = vadd.f32 %v2271_v5, %v2270_v27  ;;  %v2286_v42 = vstv %s5288_s26  ;;  %v2321_v45 = vmul.f32 %v6457_v56, %v2319_v31  ;;  %s5493_s15 = sld [smem:[#allocation4 + $0x682]] }
 0x2ba   :  { %v2291_v16 = vstv %s5302_s0  ;;  %v2296_v8 = vstv %s5313_s25  ;;  %v2301_v23 = vstv %s5315_s28  ;;  %v2317_v61 = vmul.f32 %v2316_v1, %v6460_v40  ;;  %s5497_s23 = sld [smem:[#allocation4 + $0x683]] }
 0x2bb   :  { %v2318_v32 = vmul.f32 %v6461_v55, %v2316_v1  ;;  %v2325_v62 = vmul.f32 %v2324_v4, %v6450_v39  ;;  %v2326_v14 = vmul.f32 %v6451_v12, %v2324_v4  ;;  %v2329_v43 = vstv %s5259_s1  ;;  %s5484_s1 = sld [smem:[#allocation4 + $0x680]] }
 0x2bc   :  { %v2274_v24 = vmax.f32 %v2272_v37, 0.0  ;;  %v2306_v30 = vstv %s5321_s16  ;;  %v2322_v26 = vadd.f32 %v2320_v53, %v2317_v61  ;;  %v2334_v33 = vstv %s5264_s22  ;;  %s5489_s22 = sld [smem:[#allocation4 + $0x681]] }
 0x2bd   :  { %v2275_v19 = vmax.f32 %v2273_v10, 0.0  ;;  %v2323_v15 = vadd.f32 %v2321_v45, %v2318_v32  ;;  %v2339_v47 = vstv %s5317_s30  ;;  %v2344_v22 = vstv %s5332_s13  ;;  %s5502_s20 = sld [smem:[#allocation7 + $0xc]] }
 0x2be   :  { %v2311_v57 = vstv %s5340_s2  ;;  %v2330_v28 = vmul.f32 %v2329_v43, %v4176_v7  ;;  %v2331_v46 = vmul.f32 %v4158_v3, %v2329_v43  ;;  %v2335_v5 = vmul.f32 %v2334_v33, %v4241_v0  ;;  %s5507_s26 = sld [smem:[#allocation9 + $0xc]] }
 0x2bf   :  { %v2327_v31 = vadd.f32 %v2325_v62, %v2322_v26  ;;  %v2328_v29 = vadd.f32 %v2326_v14, %v2323_v15  ;;  %v2336_v27 = vmul.f32 %v4232_v63, %v2334_v33  ;;  %v2340_v1 = vmul.f32 %v2339_v47, %v4295_v34  ;;  %s5511_s0 = sld [smem:[#allocation9 + $0x8c]] }
 0x2c0   :  { %v2277_v53 = vmul.f32 %v2276_v48, %v2274_v24  ;;  %v2341_v4 = vmul.f32 %v6446_v41, %v2339_v47  ;;  %v2345_v37 = vmul.f32 %v2344_v22, %v6447_v35  ;;  %v2346_v10 = vmul.f32 %v6448_v59, %v2344_v22  ;;  %s5513_s25 = sld [smem:[#allocation9 + $0x10c]] }
 0x2c1   :  { %v2278_v45 = vmul.f32 %v2276_v48, %v2275_v19  ;;  %v2282_v61 = vmul.f32 %v2281_v52, %v2274_v24  ;;  %v2283_v32 = vmul.f32 %v2281_v52, %v2275_v19  ;;  %v2287_v62 = vmul.f32 %v2286_v42, %v2274_v24  ;;  %s5518_s28 = sld [smem:[#allocation9 + $0x18c]] }
 0x2c2   :  { %v5396_v14 = vadd.f32 %v2277_v53, %v5286_v51  ;;  %v2288_v43 = vmul.f32 %v2286_v42, %v2275_v19  ;;  %v2292_v26 = vmul.f32 %v2291_v16, %v2274_v24  ;;  %v2293_v33 = vmul.f32 %v2291_v16, %v2275_v19  ;;  %s5532_s30 = sld [smem:[#allocation9 + $0x20c]] }
 0x2c3   :  { %v5401_v15 = vadd.f32 %v2278_v45, %v5291_v13  ;;  %v5404_v47 = vadd.f32 %v2282_v61, %v5294_v11  ;;  %v5407_v48 = vadd.f32 %v2283_v32, %v5297_v2  ;;  %v5410_v52 = vadd.f32 %v2287_v62, %v5300_v25  ;;  %s5543_s16 = sld [smem:[#allocation9 + $0x28c]] }
 0x2c4   :  { %v5415_v51 = vadd.f32 %v2288_v43, %v5305_v17  ;;  %v5418_v42 = vadd.f32 %v2292_v26, %v5308_v20  ;;  %v5421_v13 = vadd.f32 %v2293_v33, %v5311_v44  ;;  %v2297_v16 = vmul.f32 %v2296_v8, %v2274_v24  ;;  %s5547_s13 = sld [smem:[#allocation9 + $0x30c]] }
 0x2c5   :  { %v2298_v11 = vmul.f32 %v2296_v8, %v2275_v19  ;;  %v2332_v2 = vadd.f32 %v2330_v28, %v2327_v31  ;;  %v2333_v22 = vadd.f32 %v2331_v46, %v2328_v29  ;;  %v2349_v53 = vstv %s5372_s10  ;;  %s5549_s2 = sld [smem:[#allocation4 + $0x684]] }
 0x2c6   :  { %v2302_v25 = vmul.f32 %v2301_v23, %v2274_v24  ;;  %v2303_v45 = vmul.f32 %v2301_v23, %v2275_v19  ;;  %v2307_v17 = vmul.f32 %v2306_v30, %v2274_v24  ;;  %v2308_v61 = vmul.f32 %v2306_v30, %v2275_v19  ;;  %s5560_s10 = sld [smem:[#allocation4 + $0x685]] }
 0x2c7   :  { %v2312_v20 = vmul.f32 %v2311_v57, %v2274_v24  ;;  %v2313_v44 = vmul.f32 %v2311_v57, %v2275_v19  ;;  %v2337_v32 = vadd.f32 %v2335_v5, %v2332_v2  ;;  %v2338_v62 = vadd.f32 %v2336_v27, %v2333_v22 }
 0x2c8   :  { %v5433_v8 = vadd.f32 %v2297_v16, %v5324_v49  ;;  %v5436_v28 = vadd.f32 %v2298_v11, %v5327_v60  ;;  %v2350_v23 = vmul.f32 %v2349_v53, %v6449_v6  ;;  %v2351_v46 = vmul.f32 %v4399_v36, %v2349_v53 }
 0x2c9   :  { %v2342_v30 = vadd.f32 %v2340_v1, %v2337_v32  ;;  %v2343_v24 = vadd.f32 %v2341_v4, %v2338_v62  ;;  %v2399_v19 = vstv %s5368_s14  ;;  %v2402_v57 = vstv %s5376_s17  ;;  %s5551_s14 = sld [smem:[#allocation9 + $0x38c]] }
 0x2ca   :  { %v5447_v49 = vadd.f32 %v2302_v25, %v5330_v54  ;;  %v5450_v60 = vadd.f32 %v2303_v45, %v5335_v9  ;;  %v5453_v5 = vadd.f32 %v2307_v17, %v5338_v21  ;;  %v2403_v31 = vmul.f32 %v2402_v57, %v6456_v58  ;;  %s5568_s17 = sld [smem:[#allocation4 + $0x686]] }
 0x2cb   :  { %v5459_v29 = vadd.f32 %v2308_v61, %v5343_v50  ;;  %v2347_v27 = vadd.f32 %v2345_v37, %v2342_v30  ;;  %v2348_v1 = vadd.f32 %v2346_v10, %v2343_v24  ;;  %v2407_v4 = vstv %s5382_s29  ;;  %s5595_s29 = sld [smem:[#allocation4 + $0x687]] }
 0x2cc   :  { %v5465_v54 = vadd.f32 %v2312_v20, %v5346_v38  ;;  %v2354_v9 = vstv %s5412_s4  ;;  %v2400_v21 = vmul.f32 %v2399_v19, %v6460_v40  ;;  %v2404_v43 = vmul.f32 %v6457_v56, %v2402_v57  ;;  %s5617_s4 = sld [smem:[#allocation4 + $0x704]] }
 0x2cd   :  { %v2352_v50 = vadd.f32 %v2350_v23, %v2347_v27  ;;  %v2353_v26 = vadd.f32 %v2351_v46, %v2348_v1  ;;  %v2408_v37 = vmul.f32 %v2407_v4, %v6450_v39  ;;  %v2412_v10 = vstv %s5386_s19  ;;  %s5600_s19 = sld [smem:[#allocation4 + $0x700]] }
 0x2ce   :  { %v5475_v38 = vadd.f32 %v2313_v44, %v5351_v18  ;;  %v2401_v33 = vmul.f32 %v6461_v55, %v2399_v19  ;;  %v2405_v16 = vadd.f32 %v2403_v31, %v2400_v21  ;;  %v2409_v11 = vmul.f32 %v6451_v12, %v2407_v4 }
 0x2cf   :  { %v2355_v2 = vadd.f32 %v2354_v9, %v2352_v50  ;;  %v2356_v22 = vadd.f32 %v2354_v9, %v2353_v26  ;;  %v2413_v53 = vmul.f32 %v2412_v10, %v4176_v7  ;;  %v2417_v25 = vstv %s5391_s5  ;;  %s5606_s5 = sld [smem:[#allocation4 + $0x701]] }
 0x2d0   :  { %v2359_v45 = vstv %s5423_s7  ;;  %v2364_v17 = vstv %s5426_s21  ;;  %v2406_v61 = vadd.f32 %v2404_v43, %v2401_v33  ;;  %v2414_v20 = vmul.f32 %v4158_v3, %v2412_v10  ;;  %s5622_s7 = sld [smem:[#allocation4 + $0x705]] }
 0x2d1   :  { %v2369_v18 = vstv %s5428_s11  ;;  %v2374_v44 = vstv %s5430_s9  ;;  %v2410_v32 = vadd.f32 %v2408_v37, %v2405_v16  ;;  %v2418_v62 = vmul.f32 %v2417_v25, %v4241_v0  ;;  %s5636_s21 = sld [smem:[#allocation4 + $0x706]] }
 0x2d2   :  { %v2357_v23 = vmax.f32 %v2355_v2, 0.0  ;;  %v2411_v46 = vadd.f32 %v2409_v11, %v2406_v61  ;;  %v2419_v30 = vmul.f32 %v4232_v63, %v2417_v25  ;;  %v2422_v24 = vstv %s5393_s27  ;;  %s5610_s27 = sld [smem:[#allocation4 + $0x702]] }
 0x2d3   :  { %v2358_v19 = vmax.f32 %v2356_v22, 0.0  ;;  %v2379_v57 = vstv %s5440_s18  ;;  %v2415_v31 = vadd.f32 %v2413_v53, %v2410_v32  ;;  %v2427_v27 = vstv %s5398_s12  ;;  %s5615_s12 = sld [smem:[#allocation4 + $0x703]] }
 0x2d4   :  { %v2384_v1 = vstv %s5444_s24  ;;  %v2389_v4 = vstv %s5456_s8  ;;  %v2394_v9 = vstv %s5462_s3  ;;  %v2416_v21 = vadd.f32 %v2414_v20, %v2411_v46  ;;  %s5647_s11 = sld [smem:[#allocation7 + $0xd]] }
 0x2d5   :  { %v2420_v43 = vadd.f32 %v2418_v62, %v2415_v31  ;;  %v2423_v50 = vmul.f32 %v2422_v24, %v4295_v34  ;;  %v2424_v26 = vmul.f32 %v6446_v41, %v2422_v24  ;;  %v2432_v37 = vstv %s5470_s6  ;;  %s5649_s9 = sld [smem:[#allocation9 + $0xd]] }
 0x2d6   :  { %v2360_v10 = vmul.f32 %v2359_v45, %v2357_v23  ;;  %v2421_v33 = vadd.f32 %v2419_v30, %v2416_v21  ;;  %v2428_v16 = vmul.f32 %v2427_v27, %v6447_v35  ;;  %v2429_v11 = vmul.f32 %v6448_v59, %v2427_v27  ;;  %s5652_s18 = sld [smem:[#allocation4 + $0x707]] }
 0x2d7   :  { %v2361_v2 = vmul.f32 %v2359_v45, %v2358_v19  ;;  %v2365_v22 = vmul.f32 %v2364_v17, %v2357_v23  ;;  %v2366_v53 = vmul.f32 %v2364_v17, %v2358_v19  ;;  %v2370_v25 = vmul.f32 %v2369_v18, %v2357_v23  ;;  %s5656_s24 = sld [smem:[#allocation9 + $0x8d]] }
 0x2d8   :  { %v5516_v61 = vadd.f32 %v2360_v10, %v5396_v14  ;;  %v2371_v20 = vmul.f32 %v2369_v18, %v2358_v19  ;;  %v2375_v32 = vmul.f32 %v2374_v44, %v2357_v23  ;;  %v2376_v62 = vmul.f32 %v2374_v44, %v2358_v19  ;;  %s5664_s8 = sld [smem:[#allocation9 + $0x10d]] }
 0x2d9   :  { %v5521_v46 = vadd.f32 %v2361_v2, %v5401_v15  ;;  %v5524_v30 = vadd.f32 %v2365_v22, %v5404_v47  ;;  %v5527_v45 = vadd.f32 %v2366_v53, %v5407_v48  ;;  %v5530_v17 = vadd.f32 %v2370_v25, %v5410_v52  ;;  %s5668_s3 = sld [smem:[#allocation9 + $0x18d]] }
 0x2da   :  { %v5535_v14 = vadd.f32 %v2371_v20, %v5415_v51  ;;  %v5538_v18 = vadd.f32 %v2375_v32, %v5418_v42  ;;  %v5541_v15 = vadd.f32 %v2376_v62, %v5421_v13  ;;  %v2380_v44 = vmul.f32 %v2379_v57, %v2357_v23  ;;  %s5678_s6 = sld [smem:[#allocation9 + $0x20d]] }
 0x2db   :  { %v2425_v47 = vadd.f32 %v2423_v50, %v2420_v43  ;;  %v2426_v48 = vadd.f32 %v2424_v26, %v2421_v33  ;;  %v2433_v24 = vmul.f32 %v2432_v37, %v6449_v6  ;;  %v2434_v52 = vmul.f32 %v4399_v36, %v2432_v37 }
 0x2dc   :  { %v2381_v51 = vmul.f32 %v2379_v57, %v2358_v19  ;;  %v2385_v31 = vmul.f32 %v2384_v1, %v2357_v23  ;;  %v2386_v27 = vmul.f32 %v2384_v1, %v2358_v19  ;;  %v2390_v42 = vmul.f32 %v2389_v4, %v2357_v23 }
 0x2dd   :  { %v2391_v13 = vmul.f32 %v2389_v4, %v2358_v19  ;;  %v2395_v21 = vmul.f32 %v2394_v9, %v2357_v23  ;;  %v2430_v10 = vadd.f32 %v2428_v16, %v2425_v47  ;;  %v2431_v2 = vadd.f32 %v2429_v11, %v2426_v48 }
 0x2de   :  { %v5554_v43 = vadd.f32 %v2380_v44, %v5433_v8  ;;  %v5557_v50 = vadd.f32 %v2381_v51, %v5436_v28  ;;  %v2396_v57 = vmul.f32 %v2394_v9, %v2358_v19  ;;  %v2437_v1 = vstv %s5502_s20  ;;  %s5713_s20 = sld [smem:[#allocation4 + $0x781]] }
 0x2df   :  { %v5563_v23 = vadd.f32 %v2385_v31, %v5447_v49  ;;  %v5566_v4 = vadd.f32 %v2386_v27, %v5450_v60  ;;  %v2435_v8 = vadd.f32 %v2433_v24, %v2430_v10  ;;  %v2436_v26 = vadd.f32 %v2434_v52, %v2431_v2 }
 0x2e0   :  { %v5571_v28 = vadd.f32 %v2390_v42, %v5453_v5  ;;  %v5574_v19 = vadd.f32 %v2391_v13, %v5459_v29  ;;  %v5577_v49 = vadd.f32 %v2395_v21, %v5465_v54  ;;  %v2485_v9 = vstv %s5489_s22  ;;  %s5694_s22 = sld [smem:[#allocation9 + $0x30d]] }
 0x2e1   :  { %v5581_v60 = vadd.f32 %v2396_v57, %v5475_v38  ;;  %v2438_v37 = vadd.f32 %v2437_v1, %v2435_v8  ;;  %v2439_v33 = vadd.f32 %v2437_v1, %v2436_v26  ;;  %v2442_v16 = vstv %s5507_s26  ;;  %s5717_s26 = sld [smem:[#allocation4 + $0x782]] }
 0x2e2   :  { %v2447_v11 = vstv %s5511_s0  ;;  %v2452_v5 = vstv %s5513_s25  ;;  %v2457_v22 = vstv %s5518_s28  ;;  %v2482_v29 = vstv %s5484_s1  ;;  %s5682_s1 = sld [smem:[#allocation9 + $0x28d]] }
 0x2e3   :  { %v2462_v53 = vstv %s5532_s30  ;;  %v2486_v25 = vmul.f32 %v2485_v9, %v6456_v58  ;;  %v2487_v54 = vmul.f32 %v6457_v56, %v2485_v9  ;;  %v2490_v20 = vstv %s5493_s15  ;;  %s5700_s15 = sld [smem:[#allocation9 + $0x38d]] }
 0x2e4   :  { %v2440_v32 = vmax.f32 %v2438_v37, 0.0  ;;  %v2467_v62 = vstv %s5543_s16  ;;  %v2472_v44 = vstv %s5547_s13  ;;  %v2495_v38 = vstv %s5497_s23  ;;  %s5708_s23 = sld [smem:[#allocation4 + $0x780]] }
 0x2e5   :  { %v2441_v47 = vmax.f32 %v2439_v33, 0.0  ;;  %v2483_v48 = vmul.f32 %v2482_v29, %v6460_v40  ;;  %v2484_v24 = vmul.f32 %v6461_v55, %v2482_v29  ;;  %v2500_v52 = vstv %s5549_s2  ;;  %s5722_s0 = sld [smem:[#allocation4 + $0x783]] }
 0x2e6   :  { %v2477_v51 = vstv %s5551_s14  ;;  %v2491_v31 = vmul.f32 %v2490_v20, %v6450_v39  ;;  %v2492_v27 = vmul.f32 %v6451_v12, %v2490_v20  ;;  %v2496_v42 = vmul.f32 %v2495_v38, %v4176_v7  ;;  %s5727_s25 = sld [smem:[#allocation4 + $0x784]] }
 0x2e7   :  { %v2488_v13 = vadd.f32 %v2486_v25, %v2483_v48  ;;  %v2489_v21 = vadd.f32 %v2487_v54, %v2484_v24  ;;  %v2497_v10 = vmul.f32 %v4158_v3, %v2495_v38  ;;  %v2501_v2 = vmul.f32 %v2500_v52, %v4241_v0  ;;  %s5731_s28 = sld [smem:[#allocation4 + $0x785]] }
 0x2e8   :  { %v2443_v57 = vmul.f32 %v2442_v16, %v2440_v32  ;;  %v2502_v1 = vmul.f32 %v4232_v63, %v2500_v52  ;;  %v2505_v8 = vstv %s5560_s10  ;;  %v2510_v26 = vstv %s5568_s17  ;;  %s5735_s30 = sld [smem:[#allocation4 + $0x786]] }
 0x2e9   :  { %v2444_v9 = vmul.f32 %v2442_v16, %v2441_v47  ;;  %v2448_v37 = vmul.f32 %v2447_v11, %v2440_v32  ;;  %v2449_v33 = vmul.f32 %v2447_v11, %v2441_v47  ;;  %v2453_v29 = vmul.f32 %v2452_v5, %v2440_v32  ;;  %s5740_s16 = sld [smem:[#allocation4 + $0x787]] }
 0x2ea   :  { %v5620_v25 = vadd.f32 %v2443_v57, %v5516_v61  ;;  %v2454_v54 = vmul.f32 %v2452_v5, %v2441_v47  ;;  %v2458_v20 = vmul.f32 %v2457_v22, %v2440_v32  ;;  %v2459_v38 = vmul.f32 %v2457_v22, %v2441_v47  ;;  %s5745_s13 = sld [smem:[#allocation7 + $0xe]] }
 0x2eb   :  { %v5625_v48 = vadd.f32 %v2444_v9, %v5521_v46  ;;  %v5628_v24 = vadd.f32 %v2448_v37, %v5524_v30  ;;  %v5631_v16 = vadd.f32 %v2449_v33, %v5527_v45  ;;  %v5634_v11 = vadd.f32 %v2453_v29, %v5530_v17  ;;  %s5749_s2 = sld [smem:[#allocation9 + $0xe]] }
 0x2ec   :  { %v5639_v61 = vadd.f32 %v2454_v54, %v5535_v14  ;;  %v5642_v5 = vadd.f32 %v2458_v20, %v5538_v18  ;;  %v5645_v46 = vadd.f32 %v2459_v38, %v5541_v15  ;;  %v2463_v30 = vmul.f32 %v2462_v53, %v2440_v32  ;;  %s5751_s14 = sld [smem:[#allocation9 + $0x8e]] }
 0x2ed   :  { %v2464_v45 = vmul.f32 %v2462_v53, %v2441_v47  ;;  %v2468_v22 = vmul.f32 %v2467_v62, %v2440_v32  ;;  %v2493_v52 = vadd.f32 %v2491_v31, %v2488_v13  ;;  %v2494_v17 = vadd.f32 %v2492_v27, %v2489_v21  ;;  %s5756_s10 = sld [smem:[#allocation9 + $0x10e]] }
 0x2ee   :  { %v2469_v57 = vmul.f32 %v2467_v62, %v2441_v47  ;;  %v2473_v9 = vmul.f32 %v2472_v44, %v2440_v32  ;;  %v2474_v14 = vmul.f32 %v2472_v44, %v2441_v47  ;;  %v2506_v37 = vmul.f32 %v2505_v8, %v4295_v34  ;;  %s5770_s17 = sld [smem:[#allocation9 + $0x18e]] }
 0x2ef   :  { %v2498_v18 = vadd.f32 %v2496_v42, %v2493_v52  ;;  %v2499_v15 = vadd.f32 %v2497_v10, %v2494_v17  ;;  %v2507_v33 = vmul.f32 %v6446_v41, %v2505_v8  ;;  %v2515_v29 = vstv %s5595_s29  ;;  %s5781_s29 = sld [smem:[#allocation9 + $0x20e]] }
 0x2f0   :  { %v5659_v53 = vadd.f32 %v2463_v30, %v5554_v43  ;;  %v5662_v31 = vadd.f32 %v2464_v45, %v5557_v50  ;;  %v2478_v62 = vmul.f32 %v2477_v51, %v2440_v32  ;;  %v2479_v44 = vmul.f32 %v2477_v51, %v2441_v47 }
 0x2f1   :  { %v2503_v27 = vadd.f32 %v2501_v2, %v2498_v18  ;;  %v2504_v42 = vadd.f32 %v2502_v1, %v2499_v15  ;;  %v2511_v13 = vmul.f32 %v2510_v26, %v6447_v35  ;;  %v2512_v21 = vmul.f32 %v6448_v59, %v2510_v26 }
 0x2f2   :  { %v5671_v43 = vadd.f32 %v2468_v22, %v5563_v23  ;;  %v5674_v50 = vadd.f32 %v2469_v57, %v5566_v4  ;;  %v2516_v32 = vmul.f32 %v2515_v29, %v6449_v6  ;;  %v2517_v47 = vmul.f32 %v4399_v36, %v2515_v29 }
 0x2f3   :  { %v2508_v51 = vadd.f32 %v2506_v37, %v2503_v27  ;;  %v2509_v10 = vadd.f32 %v2507_v33, %v2504_v42  ;;  %v2565_v2 = vstv %s5600_s19  ;;  %v2568_v1 = vstv %s5606_s5  ;;  %s5783_s19 = sld [smem:[#allocation9 + $0x28e]] }
 0x2f4   :  { %v5685_v23 = vadd.f32 %v2473_v9, %v5571_v28  ;;  %v5688_v4 = vadd.f32 %v2474_v14, %v5574_v19  ;;  %v5691_v8 = vadd.f32 %v2478_v62, %v5577_v49  ;;  %v2569_v26 = vmul.f32 %v2568_v1, %v6456_v58  ;;  %s5785_s5 = sld [smem:[#allocation9 + $0x30e]] }
 0x2f5   :  { %v5697_v54 = vadd.f32 %v2479_v44, %v5581_v60  ;;  %v2513_v20 = vadd.f32 %v2511_v13, %v2508_v51  ;;  %v2514_v38 = vadd.f32 %v2512_v21, %v2509_v10  ;;  %v2573_v30 = vstv %s5610_s27  ;;  %s5790_s27 = sld [smem:[#allocation9 + $0x38e]] }
 0x2f6   :  { %v2520_v28 = vstv %s5647_s11  ;;  %v2525_v19 = vstv %s5649_s9  ;;  %v2566_v45 = vmul.f32 %v2565_v2, %v6460_v40  ;;  %v2570_v49 = vmul.f32 %v6457_v56, %v2568_v1  ;;  %s5830_s11 = sld [smem:[#allocation9 + $0x18f]] }
 0x2f7   :  { %v2518_v22 = vadd.f32 %v2516_v32, %v2513_v20  ;;  %v2519_v52 = vadd.f32 %v2517_v47, %v2514_v38  ;;  %v2574_v17 = vmul.f32 %v2573_v30, %v6450_v39  ;;  %v2578_v60 = vstv %s5615_s12  ;;  %s5802_s12 = sld [smem:[#allocation7 + $0xf]] }
 0x2f8   :  { %v2530_v57 = vstv %s5656_s24  ;;  %v2567_v9 = vmul.f32 %v6461_v55, %v2565_v2  ;;  %v2571_v14 = vadd.f32 %v2569_v26, %v2566_v45  ;;  %v2575_v37 = vmul.f32 %v6451_v12, %v2573_v30  ;;  %s5836_s9 = sld [smem:[#allocation9 + $0x20f]] }
 0x2f9   :  { %v2521_v18 = vadd.f32 %v2520_v28, %v2518_v22  ;;  %v2522_v15 = vadd.f32 %v2520_v28, %v2519_v52  ;;  %v2579_v33 = vmul.f32 %v2578_v60, %v4176_v7  ;;  %v2583_v29 = vstv %s5617_s4  ;;  %s5808_s4 = sld [smem:[#allocation9 + $0xf]] }
 0x2fa   :  { %v2535_v62 = vstv %s5664_s8  ;;  %v2540_v44 = vstv %s5668_s3  ;;  %v2572_v27 = vadd.f32 %v2570_v49, %v2567_v9  ;;  %v2580_v42 = vmul.f32 %v4158_v3, %v2578_v60  ;;  %s5845_s24 = sld [smem:[#allocation9 + $0x30f]] }
 0x2fb   :  { %v2545_v13 = vstv %s5678_s6  ;;  %v2576_v21 = vadd.f32 %v2574_v17, %v2571_v14  ;;  %v2584_v32 = vmul.f32 %v2583_v29, %v4241_v0  ;;  %v2588_v47 = vstv %s5622_s7  ;;  %s5820_s7 = sld [smem:[#allocation9 + $0x8f]] }
 0x2fc   :  { %v2523_v51 = vmax.f32 %v2521_v18, 0.0  ;;  %v2577_v10 = vadd.f32 %v2575_v37, %v2572_v27  ;;  %v2585_v2 = vmul.f32 %v4232_v63, %v2583_v29  ;;  %v2593_v1 = vstv %s5636_s21  ;;  %s5824_s21 = sld [smem:[#allocation9 + $0x10f]] }
 0x2fd   :  { %v2524_v26 = vmax.f32 %v2522_v15, 0.0  ;;  %v2550_v20 = vstv %s5682_s1  ;;  %v2581_v38 = vadd.f32 %v2579_v33, %v2576_v21  ;;  %v2598_v30 = vstv %s5652_s18  ;;  %s5841_s18 = sld [smem:[#allocation9 + $0x28f]] }
 0x2fe   :  { %v2555_v28 = vstv %s5694_s22  ;;  %v2560_v45 = vstv %s5700_s15  ;;  %v2582_v49 = vadd.f32 %v2580_v42, %v2577_v10  ;;  %v2589_v22 = vmul.f32 %v2588_v47, %v4295_v34  ;;  %s5850_s8 = sld [smem:[#allocation9 + $0x38f]] }
 0x2ff   :  { %v2586_v52 = vadd.f32 %v2584_v32, %v2581_v38  ;;  %v2590_v17 = vmul.f32 %v6446_v41, %v2588_v47  ;;  %v2594_v60 = vmul.f32 %v2593_v1, %v6447_v35  ;;  %v2595_v9 = vmul.f32 %v6448_v59, %v2593_v1  ;;  %s5855_s3 = sld [smem:[#allocation10]] }
 0x300   :  { %v2526_v14 = vmul.f32 %v2525_v19, %v2523_v51  ;;  %v2587_v37 = vadd.f32 %v2585_v2, %v2582_v49  ;;  %v2599_v18 = vmul.f32 %v2598_v30, %v6449_v6  ;;  %v2600_v15 = vmul.f32 %v4399_v36, %v2598_v30  ;;  %s5859_s6 = sld [smem:[#allocation10 + $0x1]] }
 0x301   :  { %v2527_v33 = vmul.f32 %v2525_v19, %v2524_v26  ;;  %v2531_v29 = vmul.f32 %v2530_v57, %v2523_v51  ;;  %v2532_v27 = vmul.f32 %v2530_v57, %v2524_v26  ;;  %v2536_v42 = vmul.f32 %v2535_v62, %v2523_v51  ;;  %s5861_s1 = sld [smem:[#allocation10 + $0x2]] }
 0x302   :  { %v5754_v21 = vadd.f32 %v2526_v14, %v5620_v25  ;;  %v2537_v32 = vmul.f32 %v2535_v62, %v2524_v26  ;;  %v2541_v47 = vmul.f32 %v2540_v44, %v2523_v51  ;;  %v2542_v10 = vmul.f32 %v2540_v44, %v2524_v26  ;;  %s5866_s22 = sld [smem:[#allocation10 + $0x3]] }
 0x303   :  { %v5759_v2 = vadd.f32 %v2527_v33, %v5625_v48  ;;  %v5762_v1 = vadd.f32 %v2531_v29, %v5628_v24  ;;  %v5765_v19 = vadd.f32 %v2532_v27, %v5631_v16  ;;  %v5768_v57 = vadd.f32 %v2536_v42, %v5634_v11  ;;  %s5880_s15 = sld [smem:[#allocation10 + $0x4]] }
 0x304   :  { %v5773_v25 = vadd.f32 %v2537_v32, %v5639_v61  ;;  %v5776_v62 = vadd.f32 %v2541_v47, %v5642_v5  ;;  %v5779_v48 = vadd.f32 %v2542_v10, %v5645_v46  ;;  %v2546_v44 = vmul.f32 %v2545_v13, %v2523_v51 }
 0x305   :  { %v2547_v24 = vmul.f32 %v2545_v13, %v2524_v26  ;;  %v2551_v16 = vmul.f32 %v2550_v20, %v2523_v51  ;;  %v2591_v38 = vadd.f32 %v2589_v22, %v2586_v52  ;;  %v2592_v11 = vadd.f32 %v2590_v17, %v2587_v37 }
 0x306   :  { %v2552_v30 = vmul.f32 %v2550_v20, %v2524_v26  ;;  %v2556_v49 = vmul.f32 %v2555_v28, %v2523_v51  ;;  %v2557_v61 = vmul.f32 %v2555_v28, %v2524_v26  ;;  %v2561_v14 = vmul.f32 %v2560_v45, %v2523_v51 }
 0x307   :  { %v5788_v5 = vadd.f32 %v2546_v44, %v5659_v53  ;;  %v2562_v46 = vmul.f32 %v2560_v45, %v2524_v26  ;;  %v2596_v33 = vadd.f32 %v2594_v60, %v2591_v38  ;;  %v2597_v13 = vadd.f32 %v2595_v9, %v2592_v11 }
 0x308   :  { %v5793_v22 = vadd.f32 %v2547_v24, %v5662_v31  ;;  %v5796_v20 = vadd.f32 %v2551_v16, %v5671_v43  ;;  %v5799_v28 = vadd.f32 %v2552_v30, %v5674_v50  ;;  %v2603_v51 = vstv %s5745_s13 }
 0x309   :  { %v5805_v53 = vadd.f32 %v2556_v49, %v5685_v23  ;;  %v2601_v26 = vadd.f32 %v2599_v18, %v2596_v33  ;;  %v2602_v45 = vadd.f32 %v2600_v15, %v2597_v13  ;;  %v2651_v31 = vstv %s5713_s20  ;;  %s5895_s20 = sld [smem:[#allocation12]] }
 0x30a   :  { %v5811_v43 = vadd.f32 %v2557_v61, %v5688_v4  ;;  %v5814_v50 = vadd.f32 %v2561_v14, %v5691_v8  ;;  %v5817_v52 = vadd.f32 %v2562_v46, %v5697_v54  ;;  %v2648_v17 = vstv %s5708_s23  ;;  %s5891_s23 = sld [smem:[#allocation10 + $0x5]] }
 0x30b   :  { %v2604_v23 = vadd.f32 %v2603_v51, %v2601_v26  ;;  %v2605_v60 = vadd.f32 %v2603_v51, %v2602_v45  ;;  %v2652_v9 = vmul.f32 %v2651_v31, %v6456_v58  ;;  %v2656_v37 = vstv %s5717_s26  ;;  %s5898_s26 = sld [smem:[#allocation12 + $0x1]] }
 0x30c   :  { %v2608_v4 = vstv %s5749_s2  ;;  %v2613_v18 = vstv %s5751_s14  ;;  %v2618_v8 = vstv %s5756_s10  ;;  %v2653_v54 = vmul.f32 %v6457_v56, %v2651_v31  ;;  %s6462_s2 = sld [smem:[#allocation90_spill]] }
 0x30d   :  { %v2623_v15 = vstv %s5770_s17  ;;  %v2649_v29 = vmul.f32 %v2648_v17, %v6460_v40  ;;  %v2650_v58 = vmul.f32 %v6461_v55, %v2648_v17  ;;  %v2657_v27 = vmul.f32 %v2656_v37, %v6450_v39  ;;  %s5962_s14 = sld [smem:[#allocation10 + $0x7]] }
 0x30e   :  { %v2606_v42 = vmax.f32 %v2604_v23, 0.0  ;;  %v2658_v32 = vmul.f32 %v6451_v12, %v2656_v37  ;;  %v2661_v47 = vstv %s5722_s0  ;;  %v2666_v10 = vstv %s5727_s25  ;;  %s5902_s0 = sld [smem:[#allocation12 + $0x2]] }
 0x30f   :  { %v2607_v56 = vmax.f32 %v2605_v60, 0.0  ;;  %v2628_v44 = vstv %s5781_s29  ;;  %v2633_v24 = vstv %s5783_s19  ;;  %v2654_v16 = vadd.f32 %v2652_v9, %v2649_v29  ;;  %s5904_s25 = sld [smem:[#allocation12 + $0x3]] }
 0x310   :  { %v2638_v40 = vstv %s5785_s5  ;;  %v2643_v55 = vstv %s5790_s27  ;;  %v2655_v39 = vadd.f32 %v2653_v54, %v2650_v58  ;;  %v2662_v38 = vmul.f32 %v2661_v47, %v4176_v7  ;;  %s5964_s10 = sld [smem:[#allocation12 + $0x5]] }
 0x311   :  { %v2659_v12 = vadd.f32 %v2657_v27, %v2654_v16  ;;  %v2663_v11 = vmul.f32 %v4158_v3, %v2661_v47  ;;  %v2667_v30 = vmul.f32 %v2666_v10, %v4241_v0  ;;  %v2668_v49 = vmul.f32 %v4232_v63, %v2666_v10  ;;  %s5972_s17 = sld [smem:[#allocation12 + $0x6]] }
 0x312   :  { %v2609_v61 = vmul.f32 %v2608_v4, %v2606_v42  ;;  %v2660_v14 = vadd.f32 %v2658_v32, %v2655_v39  ;;  %v2671_v46 = vstv %s5731_s28  ;;  %v2676_v33 = vstv %s5735_s30  ;;  %s5908_s28 = sld [smem:[#allocation12 + $0x4]] }
 0x313   :  { %v2610_v13 = vmul.f32 %v2608_v4, %v2607_v56  ;;  %v2614_v51 = vmul.f32 %v2613_v18, %v2606_v42  ;;  %v2615_v7 = vmul.f32 %v2613_v18, %v2607_v56  ;;  %v2619_v26 = vmul.f32 %v2618_v8, %v2606_v42  ;;  %s5918_s30 = sld [smem:[#allocation10 + $0x6]] }
 0x314   :  { %v5864_v3 = vadd.f32 %v2609_v61, %v5754_v21  ;;  %v2620_v0 = vmul.f32 %v2618_v8, %v2607_v56  ;;  %v2624_v45 = vmul.f32 %v2623_v15, %v2606_v42  ;;  %v2625_v63 = vmul.f32 %v2623_v15, %v2607_v56 }
 0x315   :  { %v5869_v31 = vadd.f32 %v2610_v13, %v5759_v2  ;;  %v5872_v17 = vadd.f32 %v2614_v51, %v5762_v1  ;;  %v5875_v23 = vadd.f32 %v2615_v7, %v5765_v19  ;;  %v5878_v60 = vadd.f32 %v2619_v26, %v5768_v57 }
 0x316   :  { %v5883_v21 = vadd.f32 %v2620_v0, %v5773_v25  ;;  %v5886_v9 = vadd.f32 %v2624_v45, %v5776_v62  ;;  %v5889_v2 = vadd.f32 %v2625_v63, %v5779_v48  ;;  %v2629_v1 = vmul.f32 %v2628_v44, %v2606_v42 }
 0x317   :  { %v2664_v19 = vadd.f32 %v2662_v38, %v2659_v12  ;;  %v2665_v37 = vadd.f32 %v2663_v11, %v2660_v14  ;;  %v2672_v4 = vmul.f32 %v2671_v46, %v4295_v34  ;;  %v2673_v57 = vmul.f32 %v6446_v41, %v2671_v46 }
 0x318   :  { %v2630_v18 = vmul.f32 %v2628_v44, %v2607_v56  ;;  %v2634_v25 = vmul.f32 %v2633_v24, %v2606_v42  ;;  %v2635_v8 = vmul.f32 %v2633_v24, %v2607_v56  ;;  %v2681_v54 = vstv %s5740_s16 }
 0x319   :  { %v2669_v62 = vadd.f32 %v2667_v30, %v2664_v19  ;;  %v2670_v48 = vadd.f32 %v2668_v49, %v2665_v37  ;;  %v2677_v15 = vmul.f32 %v2676_v33, %v6447_v35  ;;  %v2678_v29 = vmul.f32 %v6448_v59, %v2676_v33 }
 0x31a   :  { %v2639_v58 = vmul.f32 %v2638_v40, %v2606_v42  ;;  %v2640_v34 = vmul.f32 %v2638_v40, %v2607_v56  ;;  %v2644_v27 = vmul.f32 %v2643_v55, %v2606_v42  ;;  %v2645_v41 = vmul.f32 %v2643_v55, %v2607_v56 }
 0x31b   :  { %v2674_v32 = vadd.f32 %v2672_v4, %v2669_v62  ;;  %v2675_v47 = vadd.f32 %v2673_v57, %v2670_v48  ;;  %v2682_v10 = vmul.f32 %v2681_v54, %v6449_v6  ;;  %v2683_v44 = vmul.f32 %v4399_v36, %v2681_v54 }
 0x31c   :  { %v2631_v35 = vadd.f32 %v2629_v1, %v5788_v5  ;;  %v2632_v59 = vadd.f32 %v2630_v18, %v5793_v22  ;;  %v5913_v42 = vadd.f32 %v2634_v25, %v5796_v20  ;;  %v5916_v56 = vadd.f32 %v2635_v8, %v5799_v28 }
 0x31d   :  { %v2641_v36 = vadd.f32 %v2639_v58, %v5805_v53  ;;  %v2642_v6 = vadd.f32 %v2640_v34, %v5811_v43  ;;  %v2679_v5 = vadd.f32 %v2677_v15, %v2674_v32  ;;  %v2680_v24 = vadd.f32 %v2678_v29, %v2675_v47 }
 0x31e   :  { %v5923_v22 = vadd.f32 %v2644_v27, %v5814_v50  ;;  %v5926_v20 = vadd.f32 %v2645_v41, %v5817_v52  ;;  %v2686_v28 = vstv %s5802_s12  ;;  %v2691_v16 = vstv %s5808_s4  ;;  %s5994_s12 = sld [smem:[#allocation12 + $0x7]]  ;;  %s3495_s4 = smov [#allocation13]  }
 0x31f   :  { %v2684_v40 = vadd.f32 %v2682_v10, %v2679_v5  ;;  %v2685_v55 = vadd.f32 %v2683_v44, %v2680_v24  ;;  %v2696_v53 = vstv %s5820_s7  ;;  %v2701_v43 = vstv %s5824_s21  ;;  %s2819_s7 = sshll.u32 %s3495_s4, 4  ;;  %s2820_s7 = int_to_ptr.vmem [resolvable:$true] %s2819_s7 }
 0x320   :  { %v2706_v39 = vstv %s5830_s11  ;;  %v2711_v38 = vstv %s5836_s9  ;;  %v2716_v50 = vstv %s5841_s18  ;;  %v2721_v12 = vstv %s5845_s24  ;;  %s3460_s21 = scalar_lea.vmem %s2820_s7, 256  ;;  %p3465_p12 = scmp.lt.s32.totalorder %s2820_s7, %s2820_s7 }
 0x321   :  { %v2687_v52 = vadd.f32 %v2686_v28, %v2684_v40  ;;  %v2688_v11 = vadd.f32 %v2686_v28, %v2685_v55  ;;  %v2726_v30 = vstv %s5850_s8  ;;  %v2731_v49 = vstv %s5855_s3  ;;  %p3461_p11 = scmp.ne.s32.totalorder %s2820_s7, %s3460_s21  ;;  %p3466_p13 = scmp.lt.s32.totalorder %s3460_s21, %s3460_s21 }
 0x322   :  { %v2736_v61 = vstv %s5895_s20  ;;  %v2739_v14 = vstv %s6462_s2  ;;  %v2742_v46 = vstv %s5859_s6  ;;  %v2747_v33 = vstv %s5898_s26 }
 0x323   :  { %v2689_v13 = vmax.f32 %v2687_v52, 0.0  ;;  %v2690_v51 = vmax.f32 %v2688_v11, 0.0  ;;  %v2752_v7 = vstv %s5861_s1  ;;  %v2757_v26 = vstv %s5902_s0  ;;  %p3467_p0 = por %p3466_p13, %p3465_p12 }
 0x324   :  { %v2762_v0 = vstv %s5866_s22  ;;  %v2767_v45 = vstv %s5904_s25  ;;  %v2772_v63 = vstv %s5880_s15  ;;  %v2777_v1 = vstv %s5908_s28 }
 0x325   :  { %v2692_v19 = vmul.f32 %v2691_v16, %v2689_v13  ;;  %v2693_v37 = vmul.f32 %v2691_v16, %v2690_v51  ;;  %v2782_v4 = vstv %s5891_s23  ;;  %v2792_v57 = vstv %s5918_s30  ;;  %p3468_p1 = pnand %p3467_p0, %p3461_p11 }
 0x326   :  { %v2697_v18 = vmul.f32 %v2696_v53, %v2689_v13  ;;  %v2698_v25 = vmul.f32 %v2696_v53, %v2690_v51  ;;  %v2702_v8 = vmul.f32 %v2701_v43, %v2689_v13  ;;  %v2703_v54 = vmul.f32 %v2701_v43, %v2690_v51 }
 0x327   :  { %v2694_v62 = vadd.f32 %v2692_v19, %v5864_v3  ;;  %v2695_v48 = vadd.f32 %v2693_v37, %v5869_v31  ;;  %v2707_v15 = vmul.f32 %v2706_v39, %v2689_v13  ;;  %v2708_v29 = vmul.f32 %v2706_v39, %v2690_v51 }
 0x328   :  { %v2699_v58 = vadd.f32 %v2697_v18, %v5872_v17  ;;  %v2700_v34 = vadd.f32 %v2698_v25, %v5875_v23  ;;  %v2704_v27 = vadd.f32 %v2702_v8, %v5878_v60  ;;  %v2705_v41 = vadd.f32 %v2703_v54, %v5883_v21 }
 0x329   :  { %v2709_v32 = vadd.f32 %v2707_v15, %v5886_v9  ;;  %v2710_v47 = vadd.f32 %v2708_v29, %v5889_v2  ;;  %v2712_v10 = vmul.f32 %v2711_v38, %v2689_v13  ;;  %v2713_v44 = vmul.f32 %v2711_v38, %v2690_v51 }
 0x32a   :  { %v2717_v5 = vmul.f32 %v2716_v50, %v2689_v13  ;;  %v2718_v3 = vmul.f32 %v2716_v50, %v2690_v51  ;;  %v2722_v24 = vmul.f32 %v2721_v12, %v2689_v13  ;;  %v2723_v31 = vmul.f32 %v2721_v12, %v2690_v51 }
 0x32b   :  { %v2714_v28 = vadd.f32 %v2712_v10, %v2631_v35  ;;  %v2715_v16 = vadd.f32 %v2713_v44, %v2632_v59  ;;  %v2727_v40 = vmul.f32 %v2726_v30, %v2689_v13  ;;  %v2728_v17 = vmul.f32 %v2726_v30, %v2690_v51 }
 0x32c   :  { %v2719_v23 = vadd.f32 %v2717_v5, %v5913_v42  ;;  %v2720_v60 = vadd.f32 %v2718_v3, %v5916_v56  ;;  %v2724_v55 = vadd.f32 %v2722_v24, %v2641_v36  ;;  %v2725_v21 = vadd.f32 %v2723_v31, %v2642_v6 }
 0x32d   :  { %v2732_v9 = vadd.f32 %v2731_v49, %v2694_v62  ;;  %v2733_v2 = vadd.f32 %v2731_v49, %v2695_v48  ;;  %v2743_v53 = vadd.f32 %v2742_v46, %v2699_v58  ;;  %v2744_v43 = vadd.f32 %v2742_v46, %v2700_v34 }
 0x32e   :  { %v2753_v35 = vadd.f32 %v2752_v7, %v2704_v27  ;;  %v2754_v59 = vadd.f32 %v2752_v7, %v2705_v41  ;;  %v2763_v39 = vadd.f32 %v2762_v0, %v2709_v32  ;;  %v2764_v42 = vadd.f32 %v2762_v0, %v2710_v47 }
 0x32f   :  { %v2734_v56 = vmax.f32 %v2732_v9, 0.0  ;;  %v2735_v36 = vmax.f32 %v2733_v2, 0.0  ;;  %v2745_v6 = vmax.f32 %v2743_v53, 0.0  ;;  %v2746_v38 = vmax.f32 %v2744_v43, 0.0 }
 0x330   :  { %v2729_v50 = vadd.f32 %v2727_v40, %v5923_v22  ;;  %v2730_v12 = vadd.f32 %v2728_v17, %v5926_v20  ;;  %v2755_v52 = vmax.f32 %v2753_v35, 0.0  ;;  %v2756_v11 = vmax.f32 %v2754_v59, 0.0 }
 0x331   :  { %v2737_v30 = vmul.f32 %v2736_v61, %v2734_v56  ;;  %v2738_v49 = vmul.f32 %v2736_v61, %v2735_v36  ;;  %v2765_v46 = vmax.f32 %v2763_v39, 0.0  ;;  %v2766_v13 = vmax.f32 %v2764_v42, 0.0 }
 0x332   :  { %v2748_v51 = vmul.f32 %v2747_v33, %v2745_v6  ;;  %v2749_v22 = vmul.f32 %v2747_v33, %v2746_v38  ;;  %v2758_v20 = vmul.f32 %v2757_v26, %v2755_v52  ;;  %v2759_v7 = vmul.f32 %v2757_v26, %v2756_v11 }
 0x333   :  { %v2740_v0 = vadd.f32 %v2739_v14, %v2737_v30  ;;  %v2741_v61 = vadd.f32 %v2739_v14, %v2738_v49  ;;  %v2773_v19 = vadd.f32 %v2772_v63, %v2714_v28  ;;  %v2774_v33 = vadd.f32 %v2772_v63, %v2715_v16 }
 0x334   :  { %v2783_v26 = vadd.f32 %v2782_v4, %v2719_v23  ;;  %v2784_v37 = vadd.f32 %v2782_v4, %v2720_v60  ;;  %v2793_v18 = vadd.f32 %v2792_v57, %v2724_v55  ;;  %v2794_v25 = vadd.f32 %v2792_v57, %v2725_v21 }
 0x335   :  { %v2750_v8 = vadd.f32 %v2748_v51, %v2740_v0  ;;  %v2751_v14 = vadd.f32 %v2749_v22, %v2741_v61  ;;  %v2775_v54 = vmax.f32 %v2773_v19, 0.0  ;;  %v2776_v62 = vmax.f32 %v2774_v33, 0.0 }
 0x336   :  { %v2785_v48 = vmax.f32 %v2783_v26, 0.0  ;;  %v2786_v63 = vmax.f32 %v2784_v37, 0.0  ;;  %v2787_v15 = vstv %s5964_s10  ;;  %v2802_v29 = vstv %s5962_s14 }
 0x337   :  { %v2760_v58 = vadd.f32 %v2758_v20, %v2750_v8  ;;  %v2761_v34 = vadd.f32 %v2759_v7, %v2751_v14  ;;  %v2768_v27 = vmul.f32 %v2767_v45, %v2765_v46  ;;  %v2769_v4 = vmul.f32 %v2767_v45, %v2766_v13 }
 0x338   :  { %v2778_v41 = vmul.f32 %v2777_v1, %v2775_v54  ;;  %v2779_v57 = vmul.f32 %v2777_v1, %v2776_v62  ;;  %v2795_v32 = vmax.f32 %v2793_v18, 0.0  ;;  %v2796_v47 = vmax.f32 %v2794_v25, 0.0 }
 0x339   :  { %v2770_v10 = vadd.f32 %v2768_v27, %v2760_v58  ;;  %v2771_v44 = vadd.f32 %v2769_v4, %v2761_v34  ;;  %v2803_v5 = vadd.f32 %v2802_v29, %v2729_v50  ;;  %v2804_v3 = vadd.f32 %v2802_v29, %v2730_v12 }
 0x33a   :  { %v2788_v24 = vmul.f32 %v2787_v15, %v2785_v48  ;;  %v2789_v31 = vmul.f32 %v2787_v15, %v2786_v63  ;;  %v2797_v28 = vstv %s5972_s17  ;;  %v2807_v60 = vstv %s5994_s12 }
 0x33b   :  { %v2780_v16 = vadd.f32 %v2778_v41, %v2770_v10  ;;  %v2781_v40 = vadd.f32 %v2779_v57, %v2771_v44  ;;  %v2805_v17 = vmax.f32 %v2803_v5, 0.0  ;;  %v2806_v23 = vmax.f32 %v2804_v3, 0.0 }
 0x33c   :  { %v2798_v21 = vmul.f32 %v2797_v28, %v2795_v32  ;;  %v2799_v9 = vmul.f32 %v2797_v28, %v2796_v47 }
 0x33d   :  { %v2790_v45 = vadd.f32 %v2788_v24, %v2780_v16  ;;  %v2791_v55 = vadd.f32 %v2789_v31, %v2781_v40  ;;  %v2808_v53 = vmul.f32 %v2807_v60, %v2805_v17  ;;  %v2809_v43 = vmul.f32 %v2807_v60, %v2806_v23 }
 0x33f   :  { %v2800_v1 = vadd.f32 %v2798_v21, %v2790_v45  ;;  %v2801_v2 = vadd.f32 %v2799_v9, %v2791_v55 }
 0x341   :  { %v2810_v35 = vadd.f32 %v2808_v53, %v2800_v1  ;;  %v2811_v59 = vadd.f32 %v2809_v43, %v2801_v2 }
 0x343   :  { %2812 = vst [vmem:[#allocation13] sm:$0xff] %v2810_v35  ;;  %2813 = vst [vmem:[#allocation13 + $0x8] sm:$0xff] %v2811_v59 }
 0x344   :  { %3471 = shalt.err (!%p3468_p1)
}
 0x345   :  { %s6463_s11 = smov 8   ;;  %s6464_s9 = smov 128  }
 0x346   :  { %s6465_s8 = sld [smem:[#allocation91_spill]] }
 0x34c   :  { %2825 = dma.vmem_to_hbm [thread:$0]  %s2820_s7, 256, %s6465_s8, [#allocation5], %s6464_s9, %s6464_s9, %s6463_s11  }
 0x34d   :  { %3486 = dma.done.wait [#allocation5], 256  }
 0x34e   :  { %3487 = vsyncadd [#allocation5], 4294967040 }
 0x34f   :  { %2829 = vsyncpa [#allocation5], 1 }
 0x350   :  { %2830 = vsyncpa [#allocation6], 1 }
 0x351   :  { %2831 = vsyncpa [#allocation8], 1 }
 0x352   :  { %2832 = vsyncpa [#allocation11], 1 }

</bundles_post_ra>
